<compile_context>
chip_gen: v7x
topology: tpu7x:2x2x1
jax: 0.10.0
libtpu: 0.0.40
codegen_flags: <defaults>
</compile_context>

<pallas_src>
import functools
import math

import jax
import jax.numpy as jnp
import numpy as np
from jax.experimental import pallas as pl
from jax.experimental.pallas import tpu as pltpu

LANE = 128
SUBLANE = 8


def _round_up(n, m):
    return (n + m - 1) // m * m


def _pad_to(a, shape):
    return jnp.pad(a, [(0, t - s) for s, t in zip(a.shape, shape)])


def _vmem_cap_bytes():
    """~85% of physical VMEM (109 MiB on v5e/v6e, ~54 MiB on v7x); 64 MiB fallback."""
    try:
        info = pltpu.get_tpu_info()
        cap = int(getattr(info, "vmem_capacity_bytes", 0) or 0)
        if cap > 0:
            return max(32 * 2 ** 20, int(cap * 0.85))
    except Exception:
        pass
    return 64 * 2 ** 20


def _pick_batch_block(B, S):
    """Batch rows per grid step: fill MXU rows (Bt*S ~ 256) when S is small, but
    keep >= 2 grid steps when B allows so both v7x TensorCores get work."""
    if S % SUBLANE != 0:
        return 1
    target = max(1, 256 // S)
    divisors = [d for d in range(1, B + 1) if B % d == 0]
    ok = [d for d in divisors if d <= target and B // d >= 2]
    if ok:
        return max(ok)
    ok = [d for d in divisors if d <= target]
    return max(ok) if ok else 1


# ----------------------------- Pallas kernel ------------------------------ #

def encoder_layer_kernel(
    x_ref,
    wqkv_ref, bqkv_ref,
    wo_ref, bo_ref,
    g1_ref, be1_ref,
    w1_ref, bf1_ref,
    w2_ref, bf2_ref,
    g2_ref, be2_ref,
    out_ref,
    *, num_heads, d_k, d_model, eps, compute_dtype, approx_recip,
):
    f32 = jnp.float32
    cd = compute_dtype
    Bt, S, Dp = x_ref.shape
    H = num_heads
    dkp = wo_ref.shape[0] // H
    M = Bt * S
    scale = 1.0 / math.sqrt(d_k)

    x = x_ref[...].reshape(M, Dp)                  # (M, Dp) f32, padded lanes are 0
    xc = x.astype(cd)

    # --- fused QKV projection: one wide MXU matmul (N = 3*H*dkp), f32 accumulate ---
    qkv = jnp.dot(xc, wqkv_ref[...], preferred_element_type=f32) + bqkv_ref[...]

    # --- per-head attention; every slice is lane-aligned (dkp % 128 == 0) ---
    ctx_heads = []
    for h in range(H):
        q = (qkv[:, h * dkp:(h + 1) * dkp] * scale).reshape(Bt, S, dkp).astype(cd)
        k = qkv[:, (H + h) * dkp:(H + h + 1) * dkp].reshape(Bt, S, dkp).astype(cd)
        v = qkv[:, (2 * H + h) * dkp:(2 * H + h + 1) * dkp].reshape(Bt, S, dkp).astype(cd)

        s = jnp.einsum("bqe,bke->bqk", q, k, preferred_element_type=f32)  # (Bt,S,S)
        m = jnp.max(s, axis=-1, keepdims=True)
        p = jnp.exp(s - m)
        l = jnp.sum(p, axis=-1, keepdims=True)
        ctx = jnp.einsum("bqk,bke->bqe", p.astype(cd), v,
                         preferred_element_type=f32)                      # (Bt,S,dkp)
        # normalize AFTER the PV matmul (EUP reciprocal, H*S*dkp multiplies)
        ctx = ctx * pl.reciprocal(l, approx=approx_recip)
        ctx_heads.append(ctx.reshape(M, dkp))

    ctx = ctx_heads[0] if H == 1 else jnp.concatenate(ctx_heads, axis=-1)  # (M, H*dkp)

    # --- output projection: head reduction happens in the MXU K dim (K = H*dkp) ---
    attn_out = jnp.dot(ctx.astype(cd), wo_ref[...],
                       preferred_element_type=f32) + bo_ref[...]           # (M, Dp)

    # --- LayerNorm: two-pass form; exact correction for the zero-padded lanes ---
    inv_d = 1.0 / d_model
    n_pad = float(Dp - d_model)

    def layer_norm(hv, g, b):
        mean = jnp.sum(hv, axis=-1, keepdims=True) * inv_d
        c = hv - mean                                   # padded lanes become -mean
        var = (jnp.sum(c * c, axis=-1, keepdims=True) - n_pad * mean * mean) * inv_d
        return c * jax.lax.rsqrt(var + eps) * g + b     # g,b are 0 on padded lanes

    h1 = layer_norm(x + attn_out, g1_ref[...], be1_ref[...])

    # --- position-wise FFN ---
    f = jnp.dot(h1.astype(cd), w1_ref[...], preferred_element_type=f32) + bf1_ref[...]
    f = jnp.maximum(f, 0.0)
    f = jnp.dot(f.astype(cd), w2_ref[...], preferred_element_type=f32) + bf2_ref[...]

    out = layer_norm(h1 + f, g2_ref[...], be2_ref[...])
    out_ref[...] = out.reshape(Bt, S, Dp)


# ------------------------------ Host wrappers ------------------------------ #

def prepare_layer_params(p, *, num_heads, compute_dtype):
    """Done ONCE (hoisted out of the forward): fuse QKV into one weight, place each
    head on a lane-aligned dkp-wide column block, zero-pad all lane dims to
    multiples of 128, cast matmul weights to the compute dtype."""
    D = p["wq"].shape[0]
    d_ff = p["w1"].shape[1]
    assert D % num_heads == 0
    H = num_heads
    d_k = D // H
    Dp, Fp, dkp = _round_up(D, LANE), _round_up(d_ff, LANE), _round_up(d_k, LANE)
    cd, f32 = compute_dtype, jnp.float32

    def head_cols(w):                       # (D, D) -> (Dp, H*dkp), lane-aligned heads
        w = w.reshape(D, H, d_k)
        return _pad_to(w, (Dp, H, dkp)).reshape(Dp, H * dkp)

    def head_bias(b):                       # (1, D) -> (1, H*dkp)
        b = b.reshape(H, d_k)
        return _pad_to(b, (H, dkp)).reshape(1, H * dkp)

    wqkv = jnp.concatenate(
        [head_cols(p["wq"]), head_cols(p["wk"]), head_cols(p["wv"])], axis=1)
    bqkv = jnp.concatenate(
        [head_bias(p["bq"]), head_bias(p["bk"]), head_bias(p["bv"])], axis=1)

    wo = p["wo"].reshape(H, d_k, D)         # -> (H*dkp, Dp): head reduction in MXU K
    wo = _pad_to(wo, (H, dkp, Dp)).reshape(H * dkp, Dp)

    return {
        "wqkv": wqkv.astype(cd),
        "bqkv": bqkv.astype(f32),
        "wo": wo.astype(cd),
        "bo": _pad_to(p["bo"], (1, Dp)).astype(f32),
        "g1": _pad_to(p["g1"], (1, Dp)).astype(f32),
        "be1": _pad_to(p["be1"], (1, Dp)).astype(f32),
        "g2": _pad_to(p["g2"], (1, Dp)).astype(f32),
        "be2": _pad_to(p["be2"], (1, Dp)).astype(f32),
        "w1": _pad_to(p["w1"], (Dp, Fp)).astype(cd),
        "bf1": _pad_to(p["bf1"], (1, Fp)).astype(f32),
        "w2": _pad_to(p["w2"], (Fp, Dp)).astype(cd),
        "bf2": _pad_to(p["bf2"], (1, Dp)).astype(f32),
    }


def prepare_encoder_params(layer_params, *, num_heads, compute_dtype):
    return [prepare_layer_params(p, num_heads=num_heads, compute_dtype=compute_dtype)
            for p in layer_params]


def encoder_layer(xp, wp, *, d_model, num_heads, compute_dtype):
    B, S, Dp = xp.shape
    H = num_heads
    d_k = d_model // H
    dkp = wp["wo"].shape[0] // H
    Fp = wp["w1"].shape[1]

    Bt = _pick_batch_block(B, S)
    grid = (B // Bt,)

    ordered = [wp["wqkv"], wp["bqkv"], wp["wo"], wp["bo"],
               wp["g1"], wp["be1"], wp["w1"], wp["bf1"],
               wp["w2"], wp["bf2"], wp["g2"], wp["be2"]]

    def const_spec(arr):
        shape = arr.shape
        # Grid-invariant block -> single-buffered: halves weight-resident VMEM.
        return pl.BlockSpec(shape, lambda b: (0,) * len(shape),
                            pipeline_mode=pl.Buffered(1))

    x_spec = pl.BlockSpec((Bt, S, Dp), lambda b: (b, 0, 0))
    in_specs = [x_spec] + [const_spec(a) for a in ordered]
    out_spec = pl.BlockSpec((Bt, S, Dp), lambda b: (b, 0, 0))

    weight_bytes = sum(int(a.size) * a.dtype.itemsize for a in ordered)
    flops = 2 * B * S * (Dp * 3 * H * dkp + 2 * H * S * dkp
                         + H * dkp * Dp + 2 * Dp * Fp)
    transcendentals = B * H * S * S
    bytes_accessed = int(weight_bytes + 2 * B * S * Dp * 4)

    # VMEM budget: single-buffered weights + double-buffered x/out blocks +
    # f32 intermediates with 2x headroom, capped near physical VMEM.
    M = Bt * S
    interm = 4 * (M * 3 * H * dkp + M * H * dkp + 2 * Bt * S * S
                  + 6 * M * Dp + 2 * M * Fp)
    need = weight_bytes + 4 * (Bt * S * Dp * 4) + 2 * interm
    vmem_limit = int(min(_vmem_cap_bytes(), max(32 * 2 ** 20, need)))

    kernel = functools.partial(
        encoder_layer_kernel,
        num_heads=H, d_k=d_k, d_model=d_model, eps=1e-5,
        compute_dtype=compute_dtype,
        approx_recip=(np.dtype(compute_dtype) != np.dtype(jnp.float32)),
    )

    return pl.pallas_call(
        kernel,
        out_shape=jax.ShapeDtypeStruct((B, S, Dp), jnp.float32),
        grid=grid,
        in_specs=in_specs,
        out_specs=out_spec,
        compiler_params=pltpu.CompilerParams(
            dimension_semantics=("parallel",),
            vmem_limit_bytes=vmem_limit,
        ),
        cost_estimate=pl.CostEstimate(
            flops=int(flops),
            transcendentals=int(transcendentals),
            bytes_accessed=bytes_accessed,
        ),
    )(xp, *ordered)


def transformer_encoder(x, prepared_layers, *, num_heads, compute_dtype=jnp.bfloat16):
    B, S, D = x.shape
    Dp = _round_up(D, LANE)
    xp = _pad_to(x.astype(jnp.float32), (B, S, Dp))     # lane-dense, zero padded
    for wp in prepared_layers:
        xp = encoder_layer(xp, wp, d_model=D, num_heads=num_heads,
                           compute_dtype=compute_dtype)
    return xp[:, :, :D]


# ------------------------- Deterministic parameters ------------------------ #

def init_layer_params(key, d_model, d_ff):
    ks = jax.random.split(key, 12)
    scale = 0.05

    def w(k, shape):
        return (scale * jax.random.normal(k, shape)).astype(jnp.float32)

    return {
        # attention projections (stored pre-transposed as (in, out))
        "wq": w(ks[0], (d_model, d_model)), "bq": w(ks[1], (1, d_model)),
        "wk": w(ks[2], (d_model, d_model)), "bk": w(ks[3], (1, d_model)),
        "wv": w(ks[4], (d_model, d_model)), "bv": w(ks[5], (1, d_model)),
        "wo": w(ks[6], (d_model, d_model)), "bo": w(ks[7], (1, d_model)),
        # layer norms (PyTorch default init)
        "g1": jnp.ones((1, d_model), jnp.float32),
        "be1": jnp.zeros((1, d_model), jnp.float32),
        "g2": jnp.ones((1, d_model), jnp.float32),
        "be2": jnp.zeros((1, d_model), jnp.float32),
        # FFN
        "w1": w(ks[8], (d_model, d_ff)), "bf1": w(ks[9], (1, d_ff)),
        "w2": w(ks[10], (d_ff, d_model)), "bf2": w(ks[11], (1, d_model)),
    }


# ----------------------------- Pure JAX reference -------------------------- #

def ref_layer(x, p, num_heads, compute_dtype=jnp.float32):
    B, S, D = x.shape
    d_k = D // num_heads
    cd = compute_dtype
    f32 = jnp.float32

    def lin(a, w, b):
        return jnp.einsum("bsd,de->bse", a.astype(cd), w.astype(cd),
                          preferred_element_type=f32) + b

    q = lin(x, p["wq"], p["bq"]).reshape(B, S, num_heads, d_k).transpose(0, 2, 1, 3)
    k = lin(x, p["wk"], p["bk"]).reshape(B, S, num_heads, d_k).transpose(0, 2, 1, 3)
    v = lin(x, p["wv"], p["bv"]).reshape(B, S, num_heads, d_k).transpose(0, 2, 1, 3)
    scores = jnp.einsum("bhqd,bhkd->bhqk", q.astype(cd), k.astype(cd),
                        preferred_element_type=f32) / jnp.sqrt(jnp.float32(d_k))
    attn = jax.nn.softmax(scores, axis=-1)
    o = jnp.einsum("bhqk,bhkd->bhqd", attn.astype(cd), v.astype(cd),
                   preferred_element_type=f32)
    o = o.transpose(0, 2, 1, 3).reshape(B, S, D)
    o = lin(o, p["wo"], p["bo"])

    def ln(h, g, b):
        m = jnp.mean(h, axis=-1, keepdims=True)
        var = jnp.mean((h - m) ** 2, axis=-1, keepdims=True)
        return (h - m) / jnp.sqrt(var + 1e-5) * g + b

    h1 = ln(x + o, p["g1"], p["be1"])
    f = jnp.maximum(lin(h1, p["w1"], p["bf1"]), 0.0)
    f = lin(f, p["w2"], p["bf2"])
    return ln(h1 + f, p["g2"], p["be2"])


def ref_encoder(x, layer_params, num_heads, compute_dtype=jnp.float32):
    for p in layer_params:
        x = ref_layer(x, p, num_heads, compute_dtype)
    return x


# ---------------------------------- Main ----------------------------------- #

if __name__ == "__main__":
    config = dict(d_model=32, num_heads=4, d_ff=64, num_layers=2, dropout=0.0)
    B, S = 2, 8

    key = jax.random.PRNGKey(0)
    kx, *layer_keys = jax.random.split(key, config["num_layers"] + 1)

    x = jax.random.normal(kx, (B, S, config["d_model"]), dtype=jnp.float32)
    layer_params = [
        init_layer_params(k, config["d_model"], config["d_ff"]) for k in layer_keys
    ]

    # Weight preparation (pad / head-split / fuse / cast) hoisted out of the forward.
    prep_f32 = prepare_encoder_params(layer_params, num_heads=config["num_heads"],
                                      compute_dtype=jnp.float32)
    prep_bf16 = prepare_encoder_params(layer_params, num_heads=config["num_heads"],
                                       compute_dtype=jnp.bfloat16)

    run_f32 = jax.jit(functools.partial(
        transformer_encoder, num_heads=config["num_heads"],
        compute_dtype=jnp.float32))
    run_bf16 = jax.jit(functools.partial(
        transformer_encoder, num_heads=config["num_heads"],
        compute_dtype=jnp.bfloat16))

    out_f32 = jax.block_until_ready(run_f32(x, prep_f32))
    out_bf16 = jax.block_until_ready(run_bf16(x, prep_bf16))

    ref_f32 = jax.block_until_ready(
        ref_encoder(x, layer_params, config["num_heads"], jnp.float32))
    ref_bf16 = jax.block_until_ready(
        ref_encoder(x, layer_params, config["num_heads"], jnp.bfloat16))

    assert out_f32.shape == (B, S, config["d_model"])
    err_f32 = float(jnp.max(jnp.abs(out_f32 - ref_f32)))
    assert jnp.allclose(out_f32, ref_f32, atol=2e-4, rtol=2e-4), err_f32

    # bf16 fast path vs a reference using bf16 matmul operands (f32 accumulation).
    # NOTE: softmax uses pl.reciprocal(approx=True) on this path (rows sum to 1
    # within ~2^-12); gate on the f32 path for accuracy-sensitive use.
    err_bf16 = float(jnp.max(jnp.abs(out_bf16 - ref_bf16)))
    assert jnp.allclose(out_bf16, ref_bf16, atol=2e-2, rtol=2e-2), err_bf16

    print("KERNEL_OK")
</pallas_src>

<mosaic_0001>
module attributes {stable_mosaic.version = 11 : i64} {
  func.func @encoder_layer_kernel(%arg0: i32, %arg1: memref<1x8x128xf32, #tpu.memory_space<vmem>>, %arg2: memref<128x1536xf32, #tpu.memory_space<vmem>>, %arg3: memref<1x1536xf32, #tpu.memory_space<vmem>>, %arg4: memref<512x128xf32, #tpu.memory_space<vmem>>, %arg5: memref<1x128xf32, #tpu.memory_space<vmem>>, %arg6: memref<1x128xf32, #tpu.memory_space<vmem>>, %arg7: memref<1x128xf32, #tpu.memory_space<vmem>>, %arg8: memref<128x128xf32, #tpu.memory_space<vmem>>, %arg9: memref<1x128xf32, #tpu.memory_space<vmem>>, %arg10: memref<128x128xf32, #tpu.memory_space<vmem>>, %arg11: memref<1x128xf32, #tpu.memory_space<vmem>>, %arg12: memref<1x128xf32, #tpu.memory_space<vmem>>, %arg13: memref<1x128xf32, #tpu.memory_space<vmem>>, %arg14: memref<1x8x128xf32, #tpu.memory_space<vmem>>) attributes {dimension_semantics = [#tpu.dimension_semantics<parallel>], iteration_bounds = array<i64: 2>, scalar_prefetch = 0 : i64, scratch_operands = 0 : i64, tpu.core_type = #tpu.core_type<tc>, window_params = [{transform_indices = @transform_0, window_bounds = array<i64: 1, 8, 128>}, {pipeline_mode = #tpu.pipeline_mode<synchronous>, transform_indices = @transform_1, window_bounds = array<i64: 128, 1536>}, {pipeline_mode = #tpu.pipeline_mode<synchronous>, transform_indices = @transform_2, window_bounds = array<i64: 1, 1536>}, {pipeline_mode = #tpu.pipeline_mode<synchronous>, transform_indices = @transform_3, window_bounds = array<i64: 512, 128>}, {pipeline_mode = #tpu.pipeline_mode<synchronous>, transform_indices = @transform_4, window_bounds = array<i64: 1, 128>}, {pipeline_mode = #tpu.pipeline_mode<synchronous>, transform_indices = @transform_5, window_bounds = array<i64: 1, 128>}, {pipeline_mode = #tpu.pipeline_mode<synchronous>, transform_indices = @transform_6, window_bounds = array<i64: 1, 128>}, {pipeline_mode = #tpu.pipeline_mode<synchronous>, transform_indices = @transform_7, window_bounds = array<i64: 128, 128>}, {pipeline_mode = #tpu.pipeline_mode<synchronous>, transform_indices = @transform_8, window_bounds = array<i64: 1, 128>}, {pipeline_mode = #tpu.pipeline_mode<synchronous>, transform_indices = @transform_9, window_bounds = array<i64: 128, 128>}, {pipeline_mode = #tpu.pipeline_mode<synchronous>, transform_indices = @transform_10, window_bounds = array<i64: 1, 128>}, {pipeline_mode = #tpu.pipeline_mode<synchronous>, transform_indices = @transform_11, window_bounds = array<i64: 1, 128>}, {pipeline_mode = #tpu.pipeline_mode<synchronous>, transform_indices = @transform_12, window_bounds = array<i64: 1, 128>}, {transform_indices = @transform_13, window_bounds = array<i64: 1, 8, 128>}]} {
    %c0 = arith.constant 0 : index
    %c0_0 = arith.constant 0 : index
    %c0_1 = arith.constant 0 : index
    %0 = vector.load %arg1[%c0, %c0_0, %c0_1] : memref<1x8x128xf32, #tpu.memory_space<vmem>>, vector<1x8x128xf32>
    %1 = vector.shape_cast %0 : vector<1x8x128xf32> to vector<8x128xf32>
    %c0_2 = arith.constant 0 : index
    %c0_3 = arith.constant 0 : index
    %2 = vector.load %arg2[%c0_2, %c0_3] : memref<128x1536xf32, #tpu.memory_space<vmem>>, vector<128x1536xf32>
    %cst = arith.constant dense<0.000000e+00> : vector<8x1536xf32>
    %3 = tpu.matmul %1, %2, %cst {dimension_numbers = #tpu.dot_dimension_numbers<[1], [0], [0], [1], [0, 0, 1, 1], [], []>} : vector<8x128xf32>, vector<128x1536xf32>, vector<8x1536xf32> -> vector<8x1536xf32>
    %c0_4 = arith.constant 0 : index
    %c0_5 = arith.constant 0 : index
    %4 = vector.load %arg3[%c0_4, %c0_5] : memref<1x1536xf32, #tpu.memory_space<vmem>>, vector<1x1536xf32>
    %5 = vector.broadcast %4 : vector<1x1536xf32> to vector<8x1536xf32>
    %6 = arith.addf %3, %5 : vector<8x1536xf32>
    %7 = vector.extract_strided_slice %6 {offsets = [0, 0], sizes = [8, 128], strides = [1, 1]} : vector<8x1536xf32> to vector<8x128xf32>
    %cst_6 = arith.constant 0.353553385 : f32
    %8 = vector.broadcast %cst_6 : f32 to vector<8x128xf32>
    %9 = arith.mulf %7, %8 : vector<8x128xf32>
    %10 = vector.shape_cast %9 : vector<8x128xf32> to vector<1x8x128xf32>
    %11 = vector.extract_strided_slice %6 {offsets = [0, 512], sizes = [8, 128], strides = [1, 1]} : vector<8x1536xf32> to vector<8x128xf32>
    %12 = vector.shape_cast %11 : vector<8x128xf32> to vector<1x8x128xf32>
    %13 = vector.extract_strided_slice %6 {offsets = [0, 1024], sizes = [8, 128], strides = [1, 1]} : vector<8x1536xf32> to vector<8x128xf32>
    %14 = vector.shape_cast %13 : vector<8x128xf32> to vector<1x8x128xf32>
    "tpu.trace_start"() <{level = 10 : i32, message = "bqe,bke->bqk"}> : () -> ()
    %cst_7 = arith.constant dense<0.000000e+00> : vector<1x8x8xf32>
    %15 = tpu.matmul %10, %12, %cst_7 {dimension_numbers = #tpu.dot_dimension_numbers<[2], [2], [1], [1], [0, 0, 0, 1, 1, 1], [0], [0]>} : vector<1x8x128xf32>, vector<1x8x128xf32>, vector<1x8x8xf32> -> vector<1x8x8xf32>
    "tpu.trace_stop"() : () -> ()
    %cst_8 = arith.constant dense<0xFF800000> : vector<1x8xf32>
    %16 = vector.multi_reduction <maximumf>, %15, %cst_8 [2] : vector<1x8x8xf32> to vector<1x8xf32>
    %17 = vector.shape_cast %16 : vector<1x8xf32> to vector<1x8x1xf32>
    %18 = vector.broadcast %17 : vector<1x8x1xf32> to vector<1x8x8xf32>
    %19 = arith.subf %15, %18 : vector<1x8x8xf32>
    %20 = math.exp %19 : vector<1x8x8xf32>
    %cst_9 = arith.constant dense<0.000000e+00> : vector<1x8xf32>
    %21 = vector.multi_reduction <add>, %20, %cst_9 [2] : vector<1x8x8xf32> to vector<1x8xf32>
    %22 = vector.shape_cast %21 : vector<1x8xf32> to vector<1x8x1xf32>
    "tpu.trace_start"() <{level = 10 : i32, message = "bqk,bke->bqe"}> : () -> ()
    %cst_10 = arith.constant dense<0.000000e+00> : vector<1x8x128xf32>
    %23 = tpu.matmul %20, %14, %cst_10 {dimension_numbers = #tpu.dot_dimension_numbers<[2], [1], [1], [2], [0, 0, 0, 1, 1, 2], [0], [0]>} : vector<1x8x8xf32>, vector<1x8x128xf32>, vector<1x8x128xf32> -> vector<1x8x128xf32>
    "tpu.trace_stop"() : () -> ()
    %24 = tpu.reciprocal %22 : vector<1x8x1xf32> -> vector<1x8x1xf32>
    %25 = vector.broadcast %24 : vector<1x8x1xf32> to vector<1x8x128xf32>
    %26 = arith.mulf %23, %25 : vector<1x8x128xf32>
    %27 = vector.shape_cast %26 : vector<1x8x128xf32> to vector<8x128xf32>
    %28 = vector.extract_strided_slice %6 {offsets = [0, 128], sizes = [8, 128], strides = [1, 1]} : vector<8x1536xf32> to vector<8x128xf32>
    %cst_11 = arith.constant 0.353553385 : f32
    %29 = vector.broadcast %cst_11 : f32 to vector<8x128xf32>
    %30 = arith.mulf %28, %29 : vector<8x128xf32>
    %31 = vector.shape_cast %30 : vector<8x128xf32> to vector<1x8x128xf32>
    %32 = vector.extract_strided_slice %6 {offsets = [0, 640], sizes = [8, 128], strides = [1, 1]} : vector<8x1536xf32> to vector<8x128xf32>
    %33 = vector.shape_cast %32 : vector<8x128xf32> to vector<1x8x128xf32>
    %34 = vector.extract_strided_slice %6 {offsets = [0, 1152], sizes = [8, 128], strides = [1, 1]} : vector<8x1536xf32> to vector<8x128xf32>
    %35 = vector.shape_cast %34 : vector<8x128xf32> to vector<1x8x128xf32>
    "tpu.trace_start"() <{level = 10 : i32, message = "bqe,bke->bqk"}> : () -> ()
    %cst_12 = arith.constant dense<0.000000e+00> : vector<1x8x8xf32>
    %36 = tpu.matmul %31, %33, %cst_12 {dimension_numbers = #tpu.dot_dimension_numbers<[2], [2], [1], [1], [0, 0, 0, 1, 1, 1], [0], [0]>} : vector<1x8x128xf32>, vector<1x8x128xf32>, vector<1x8x8xf32> -> vector<1x8x8xf32>
    "tpu.trace_stop"() : () -> ()
    %cst_13 = arith.constant dense<0xFF800000> : vector<1x8xf32>
    %37 = vector.multi_reduction <maximumf>, %36, %cst_13 [2] : vector<1x8x8xf32> to vector<1x8xf32>
    %38 = vector.shape_cast %37 : vector<1x8xf32> to vector<1x8x1xf32>
    %39 = vector.broadcast %38 : vector<1x8x1xf32> to vector<1x8x8xf32>
    %40 = arith.subf %36, %39 : vector<1x8x8xf32>
    %41 = math.exp %40 : vector<1x8x8xf32>
    %cst_14 = arith.constant dense<0.000000e+00> : vector<1x8xf32>
    %42 = vector.multi_reduction <add>, %41, %cst_14 [2] : vector<1x8x8xf32> to vector<1x8xf32>
    %43 = vector.shape_cast %42 : vector<1x8xf32> to vector<1x8x1xf32>
    "tpu.trace_start"() <{level = 10 : i32, message = "bqk,bke->bqe"}> : () -> ()
    %cst_15 = arith.constant dense<0.000000e+00> : vector<1x8x128xf32>
    %44 = tpu.matmul %41, %35, %cst_15 {dimension_numbers = #tpu.dot_dimension_numbers<[2], [1], [1], [2], [0, 0, 0, 1, 1, 2], [0], [0]>} : vector<1x8x8xf32>, vector<1x8x128xf32>, vector<1x8x128xf32> -> vector<1x8x128xf32>
    "tpu.trace_stop"() : () -> ()
    %45 = tpu.reciprocal %43 : vector<1x8x1xf32> -> vector<1x8x1xf32>
    %46 = vector.broadcast %45 : vector<1x8x1xf32> to vector<1x8x128xf32>
    %47 = arith.mulf %44, %46 : vector<1x8x128xf32>
    %48 = vector.shape_cast %47 : vector<1x8x128xf32> to vector<8x128xf32>
    %49 = vector.extract_strided_slice %6 {offsets = [0, 256], sizes = [8, 128], strides = [1, 1]} : vector<8x1536xf32> to vector<8x128xf32>
    %cst_16 = arith.constant 0.353553385 : f32
    %50 = vector.broadcast %cst_16 : f32 to vector<8x128xf32>
    %51 = arith.mulf %49, %50 : vector<8x128xf32>
    %52 = vector.shape_cast %51 : vector<8x128xf32> to vector<1x8x128xf32>
    %53 = vector.extract_strided_slice %6 {offsets = [0, 768], sizes = [8, 128], strides = [1, 1]} : vector<8x1536xf32> to vector<8x128xf32>
    %54 = vector.shape_cast %53 : vector<8x128xf32> to vector<1x8x128xf32>
    %55 = vector.extract_strided_slice %6 {offsets = [0, 1280], sizes = [8, 128], strides = [1, 1]} : vector<8x1536xf32> to vector<8x128xf32>
    %56 = vector.shape_cast %55 : vector<8x128xf32> to vector<1x8x128xf32>
    "tpu.trace_start"() <{level = 10 : i32, message = "bqe,bke->bqk"}> : () -> ()
    %cst_17 = arith.constant dense<0.000000e+00> : vector<1x8x8xf32>
    %57 = tpu.matmul %52, %54, %cst_17 {dimension_numbers = #tpu.dot_dimension_numbers<[2], [2], [1], [1], [0, 0, 0, 1, 1, 1], [0], [0]>} : vector<1x8x128xf32>, vector<1x8x128xf32>, vector<1x8x8xf32> -> vector<1x8x8xf32>
    "tpu.trace_stop"() : () -> ()
    %cst_18 = arith.constant dense<0xFF800000> : vector<1x8xf32>
    %58 = vector.multi_reduction <maximumf>, %57, %cst_18 [2] : vector<1x8x8xf32> to vector<1x8xf32>
    %59 = vector.shape_cast %58 : vector<1x8xf32> to vector<1x8x1xf32>
    %60 = vector.broadcast %59 : vector<1x8x1xf32> to vector<1x8x8xf32>
    %61 = arith.subf %57, %60 : vector<1x8x8xf32>
    %62 = math.exp %61 : vector<1x8x8xf32>
    %cst_19 = arith.constant dense<0.000000e+00> : vector<1x8xf32>
    %63 = vector.multi_reduction <add>, %62, %cst_19 [2] : vector<1x8x8xf32> to vector<1x8xf32>
    %64 = vector.shape_cast %63 : vector<1x8xf32> to vector<1x8x1xf32>
    "tpu.trace_start"() <{level = 10 : i32, message = "bqk,bke->bqe"}> : () -> ()
    %cst_20 = arith.constant dense<0.000000e+00> : vector<1x8x128xf32>
    %65 = tpu.matmul %62, %56, %cst_20 {dimension_numbers = #tpu.dot_dimension_numbers<[2], [1], [1], [2], [0, 0, 0, 1, 1, 2], [0], [0]>} : vector<1x8x8xf32>, vector<1x8x128xf32>, vector<1x8x128xf32> -> vector<1x8x128xf32>
    "tpu.trace_stop"() : () -> ()
    %66 = tpu.reciprocal %64 : vector<1x8x1xf32> -> vector<1x8x1xf32>
    %67 = vector.broadcast %66 : vector<1x8x1xf32> to vector<1x8x128xf32>
    %68 = arith.mulf %65, %67 : vector<1x8x128xf32>
    %69 = vector.shape_cast %68 : vector<1x8x128xf32> to vector<8x128xf32>
    %70 = vector.extract_strided_slice %6 {offsets = [0, 384], sizes = [8, 128], strides = [1, 1]} : vector<8x1536xf32> to vector<8x128xf32>
    %cst_21 = arith.constant 0.353553385 : f32
    %71 = vector.broadcast %cst_21 : f32 to vector<8x128xf32>
    %72 = arith.mulf %70, %71 : vector<8x128xf32>
    %73 = vector.shape_cast %72 : vector<8x128xf32> to vector<1x8x128xf32>
    %74 = vector.extract_strided_slice %6 {offsets = [0, 896], sizes = [8, 128], strides = [1, 1]} : vector<8x1536xf32> to vector<8x128xf32>
    %75 = vector.shape_cast %74 : vector<8x128xf32> to vector<1x8x128xf32>
    %76 = vector.extract_strided_slice %6 {offsets = [0, 1408], sizes = [8, 128], strides = [1, 1]} : vector<8x1536xf32> to vector<8x128xf32>
    %77 = vector.shape_cast %76 : vector<8x128xf32> to vector<1x8x128xf32>
    "tpu.trace_start"() <{level = 10 : i32, message = "bqe,bke->bqk"}> : () -> ()
    %cst_22 = arith.constant dense<0.000000e+00> : vector<1x8x8xf32>
    %78 = tpu.matmul %73, %75, %cst_22 {dimension_numbers = #tpu.dot_dimension_numbers<[2], [2], [1], [1], [0, 0, 0, 1, 1, 1], [0], [0]>} : vector<1x8x128xf32>, vector<1x8x128xf32>, vector<1x8x8xf32> -> vector<1x8x8xf32>
    "tpu.trace_stop"() : () -> ()
    %cst_23 = arith.constant dense<0xFF800000> : vector<1x8xf32>
    %79 = vector.multi_reduction <maximumf>, %78, %cst_23 [2] : vector<1x8x8xf32> to vector<1x8xf32>
    %80 = vector.shape_cast %79 : vector<1x8xf32> to vector<1x8x1xf32>
    %81 = vector.broadcast %80 : vector<1x8x1xf32> to vector<1x8x8xf32>
    %82 = arith.subf %78, %81 : vector<1x8x8xf32>
    %83 = math.exp %82 : vector<1x8x8xf32>
    %cst_24 = arith.constant dense<0.000000e+00> : vector<1x8xf32>
    %84 = vector.multi_reduction <add>, %83, %cst_24 [2] : vector<1x8x8xf32> to vector<1x8xf32>
    %85 = vector.shape_cast %84 : vector<1x8xf32> to vector<1x8x1xf32>
    "tpu.trace_start"() <{level = 10 : i32, message = "bqk,bke->bqe"}> : () -> ()
    %cst_25 = arith.constant dense<0.000000e+00> : vector<1x8x128xf32>
    %86 = tpu.matmul %83, %77, %cst_25 {dimension_numbers = #tpu.dot_dimension_numbers<[2], [1], [1], [2], [0, 0, 0, 1, 1, 2], [0], [0]>} : vector<1x8x8xf32>, vector<1x8x128xf32>, vector<1x8x128xf32> -> vector<1x8x128xf32>
    "tpu.trace_stop"() : () -> ()
    %87 = tpu.reciprocal %85 : vector<1x8x1xf32> -> vector<1x8x1xf32>
    %88 = vector.broadcast %87 : vector<1x8x1xf32> to vector<1x8x128xf32>
    %89 = arith.mulf %86, %88 : vector<1x8x128xf32>
    %90 = vector.shape_cast %89 : vector<1x8x128xf32> to vector<8x128xf32>
    %91 = tpu.concatenate %27, %48, %69, %90 in 1 : vector<8x128xf32>, vector<8x128xf32>, vector<8x128xf32>, vector<8x128xf32> -> vector<8x512xf32>
    %c0_26 = arith.constant 0 : index
    %c0_27 = arith.constant 0 : index
    %92 = vector.load %arg4[%c0_26, %c0_27] : memref<512x128xf32, #tpu.memory_space<vmem>>, vector<512x128xf32>
    %cst_28 = arith.constant dense<0.000000e+00> : vector<8x128xf32>
    %93 = tpu.matmul %91, %92, %cst_28 {dimension_numbers = #tpu.dot_dimension_numbers<[1], [0], [0], [1], [0, 0, 1, 1], [], []>} : vector<8x512xf32>, vector<512x128xf32>, vector<8x128xf32> -> vector<8x128xf32>
    %c0_29 = arith.constant 0 : index
    %c0_30 = arith.constant 0 : index
    %94 = vector.load %arg5[%c0_29, %c0_30] : memref<1x128xf32, #tpu.memory_space<vmem>>, vector<1x128xf32>
    %95 = vector.broadcast %94 : vector<1x128xf32> to vector<8x128xf32>
    %96 = arith.addf %93, %95 : vector<8x128xf32>
    %97 = arith.addf %1, %96 : vector<8x128xf32>
    %c0_31 = arith.constant 0 : index
    %c0_32 = arith.constant 0 : index
    %98 = vector.load %arg6[%c0_31, %c0_32] : memref<1x128xf32, #tpu.memory_space<vmem>>, vector<1x128xf32>
    %c0_33 = arith.constant 0 : index
    %c0_34 = arith.constant 0 : index
    %99 = vector.load %arg7[%c0_33, %c0_34] : memref<1x128xf32, #tpu.memory_space<vmem>>, vector<1x128xf32>
    %cst_35 = arith.constant dense<0.000000e+00> : vector<8xf32>
    %100 = vector.multi_reduction <add>, %97, %cst_35 [1] : vector<8x128xf32> to vector<8xf32>
    %101 = vector.shape_cast %100 : vector<8xf32> to vector<8x1xf32>
    %cst_36 = arith.constant 3.125000e-02 : f32
    %102 = vector.broadcast %cst_36 : f32 to vector<8x1xf32>
    %103 = arith.mulf %101, %102 : vector<8x1xf32>
    %104 = vector.broadcast %103 : vector<8x1xf32> to vector<8x128xf32>
    %105 = arith.subf %97, %104 : vector<8x128xf32>
    %106 = arith.mulf %105, %105 : vector<8x128xf32>
    %cst_37 = arith.constant dense<0.000000e+00> : vector<8xf32>
    %107 = vector.multi_reduction <add>, %106, %cst_37 [1] : vector<8x128xf32> to vector<8xf32>
    %108 = vector.shape_cast %107 : vector<8xf32> to vector<8x1xf32>
    %cst_38 = arith.constant 9.600000e+01 : f32
    %109 = vector.broadcast %cst_38 : f32 to vector<8x1xf32>
    %110 = arith.mulf %109, %103 : vector<8x1xf32>
    %111 = arith.mulf %110, %103 : vector<8x1xf32>
    %112 = arith.subf %108, %111 : vector<8x1xf32>
    %cst_39 = arith.constant 3.125000e-02 : f32
    %113 = vector.broadcast %cst_39 : f32 to vector<8x1xf32>
    %114 = arith.mulf %112, %113 : vector<8x1xf32>
    %cst_40 = arith.constant 9.99999974E-6 : f32
    %115 = vector.broadcast %cst_40 : f32 to vector<8x1xf32>
    %116 = arith.addf %114, %115 : vector<8x1xf32>
    %117 = math.rsqrt %116 : vector<8x1xf32>
    %118 = vector.broadcast %117 : vector<8x1xf32> to vector<8x128xf32>
    %119 = arith.mulf %105, %118 : vector<8x128xf32>
    %120 = vector.broadcast %98 : vector<1x128xf32> to vector<8x128xf32>
    %121 = arith.mulf %119, %120 : vector<8x128xf32>
    %122 = vector.broadcast %99 : vector<1x128xf32> to vector<8x128xf32>
    %123 = arith.addf %121, %122 : vector<8x128xf32>
    %c0_41 = arith.constant 0 : index
    %c0_42 = arith.constant 0 : index
    %124 = vector.load %arg8[%c0_41, %c0_42] : memref<128x128xf32, #tpu.memory_space<vmem>>, vector<128x128xf32>
    %cst_43 = arith.constant dense<0.000000e+00> : vector<8x128xf32>
    %125 = tpu.matmul %123, %124, %cst_43 {dimension_numbers = #tpu.dot_dimension_numbers<[1], [0], [0], [1], [0, 0, 1, 1], [], []>} : vector<8x128xf32>, vector<128x128xf32>, vector<8x128xf32> -> vector<8x128xf32>
    %c0_44 = arith.constant 0 : index
    %c0_45 = arith.constant 0 : index
    %126 = vector.load %arg9[%c0_44, %c0_45] : memref<1x128xf32, #tpu.memory_space<vmem>>, vector<1x128xf32>
    %127 = vector.broadcast %126 : vector<1x128xf32> to vector<8x128xf32>
    %128 = arith.addf %125, %127 : vector<8x128xf32>
    %cst_46 = arith.constant 0.000000e+00 : f32
    %129 = vector.broadcast %cst_46 : f32 to vector<8x128xf32>
    %130 = arith.maximumf %128, %129 : vector<8x128xf32>
    %c0_47 = arith.constant 0 : index
    %c0_48 = arith.constant 0 : index
    %131 = vector.load %arg10[%c0_47, %c0_48] : memref<128x128xf32, #tpu.memory_space<vmem>>, vector<128x128xf32>
    %cst_49 = arith.constant dense<0.000000e+00> : vector<8x128xf32>
    %132 = tpu.matmul %130, %131, %cst_49 {dimension_numbers = #tpu.dot_dimension_numbers<[1], [0], [0], [1], [0, 0, 1, 1], [], []>} : vector<8x128xf32>, vector<128x128xf32>, vector<8x128xf32> -> vector<8x128xf32>
    %c0_50 = arith.constant 0 : index
    %c0_51 = arith.constant 0 : index
    %133 = vector.load %arg11[%c0_50, %c0_51] : memref<1x128xf32, #tpu.memory_space<vmem>>, vector<1x128xf32>
    %134 = vector.broadcast %133 : vector<1x128xf32> to vector<8x128xf32>
    %135 = arith.addf %132, %134 : vector<8x128xf32>
    %136 = arith.addf %123, %135 : vector<8x128xf32>
    %c0_52 = arith.constant 0 : index
    %c0_53 = arith.constant 0 : index
    %137 = vector.load %arg12[%c0_52, %c0_53] : memref<1x128xf32, #tpu.memory_space<vmem>>, vector<1x128xf32>
    %c0_54 = arith.constant 0 : index
    %c0_55 = arith.constant 0 : index
    %138 = vector.load %arg13[%c0_54, %c0_55] : memref<1x128xf32, #tpu.memory_space<vmem>>, vector<1x128xf32>
    %cst_56 = arith.constant dense<0.000000e+00> : vector<8xf32>
    %139 = vector.multi_reduction <add>, %136, %cst_56 [1] : vector<8x128xf32> to vector<8xf32>
    %140 = vector.shape_cast %139 : vector<8xf32> to vector<8x1xf32>
    %cst_57 = arith.constant 3.125000e-02 : f32
    %141 = vector.broadcast %cst_57 : f32 to vector<8x1xf32>
    %142 = arith.mulf %140, %141 : vector<8x1xf32>
    %143 = vector.broadcast %142 : vector<8x1xf32> to vector<8x128xf32>
    %144 = arith.subf %136, %143 : vector<8x128xf32>
    %145 = arith.mulf %144, %144 : vector<8x128xf32>
    %cst_58 = arith.constant dense<0.000000e+00> : vector<8xf32>
    %146 = vector.multi_reduction <add>, %145, %cst_58 [1] : vector<8x128xf32> to vector<8xf32>
    %147 = vector.shape_cast %146 : vector<8xf32> to vector<8x1xf32>
    %cst_59 = arith.constant 9.600000e+01 : f32
    %148 = vector.broadcast %cst_59 : f32 to vector<8x1xf32>
    %149 = arith.mulf %148, %142 : vector<8x1xf32>
    %150 = arith.mulf %149, %142 : vector<8x1xf32>
    %151 = arith.subf %147, %150 : vector<8x1xf32>
    %cst_60 = arith.constant 3.125000e-02 : f32
    %152 = vector.broadcast %cst_60 : f32 to vector<8x1xf32>
    %153 = arith.mulf %151, %152 : vector<8x1xf32>
    %cst_61 = arith.constant 9.99999974E-6 : f32
    %154 = vector.broadcast %cst_61 : f32 to vector<8x1xf32>
    %155 = arith.addf %153, %154 : vector<8x1xf32>
    %156 = math.rsqrt %155 : vector<8x1xf32>
    %157 = vector.broadcast %156 : vector<8x1xf32> to vector<8x128xf32>
    %158 = arith.mulf %144, %157 : vector<8x128xf32>
    %159 = vector.broadcast %137 : vector<1x128xf32> to vector<8x128xf32>
    %160 = arith.mulf %158, %159 : vector<8x128xf32>
    %161 = vector.broadcast %138 : vector<1x128xf32> to vector<8x128xf32>
    %162 = arith.addf %160, %161 : vector<8x128xf32>
    %163 = vector.shape_cast %162 : vector<8x128xf32> to vector<1x8x128xf32>
    %c0_62 = arith.constant 0 : index
    %c0_63 = arith.constant 0 : index
    %c0_64 = arith.constant 0 : index
    %164 = vector.load %arg14[%c0_62, %c0_63, %c0_64] : memref<1x8x128xf32, #tpu.memory_space<vmem>>, vector<1x8x128xf32>
    tpu.vector_store %arg14[%c0_62, %c0_63, %c0_64], %163 {strides = array<i32>} : memref<1x8x128xf32, #tpu.memory_space<vmem>>, vector<1x8x128xf32>,
    return
  }
  func.func @transform_0(%arg0: i32) -> (i32, i32, i32) {
    %c0_i32 = arith.constant 0 : i32
    %c0_i32_0 = arith.constant 0 : i32
    %c0_i32_1 = arith.constant 0 : i32
    return %arg0, %c0_i32, %c0_i32_0 : i32, i32, i32
  }
  func.func @transform_1(%arg0: i32) -> (i32, i32) {
    %c0_i32 = arith.constant 0 : i32
    %c0_i32_0 = arith.constant 0 : i32
    %c0_i32_1 = arith.constant 0 : i32
    return %c0_i32, %c0_i32_0 : i32, i32
  }
  func.func @transform_2(%arg0: i32) -> (i32, i32) {
    %c0_i32 = arith.constant 0 : i32
    %c0_i32_0 = arith.constant 0 : i32
    %c0_i32_1 = arith.constant 0 : i32
    return %c0_i32, %c0_i32_0 : i32, i32
  }
  func.func @transform_3(%arg0: i32) -> (i32, i32) {
    %c0_i32 = arith.constant 0 : i32
    %c0_i32_0 = arith.constant 0 : i32
    %c0_i32_1 = arith.constant 0 : i32
    return %c0_i32, %c0_i32_0 : i32, i32
  }
  func.func @transform_4(%arg0: i32) -> (i32, i32) {
    %c0_i32 = arith.constant 0 : i32
    %c0_i32_0 = arith.constant 0 : i32
    %c0_i32_1 = arith.constant 0 : i32
    return %c0_i32, %c0_i32_0 : i32, i32
  }
  func.func @transform_5(%arg0: i32) -> (i32, i32) {
    %c0_i32 = arith.constant 0 : i32
    %c0_i32_0 = arith.constant 0 : i32
    %c0_i32_1 = arith.constant 0 : i32
    return %c0_i32, %c0_i32_0 : i32, i32
  }
  func.func @transform_6(%arg0: i32) -> (i32, i32) {
    %c0_i32 = arith.constant 0 : i32
    %c0_i32_0 = arith.constant 0 : i32
    %c0_i32_1 = arith.constant 0 : i32
    return %c0_i32, %c0_i32_0 : i32, i32
  }
  func.func @transform_7(%arg0: i32) -> (i32, i32) {
    %c0_i32 = arith.constant 0 : i32
    %c0_i32_0 = arith.constant 0 : i32
    %c0_i32_1 = arith.constant 0 : i32
    return %c0_i32, %c0_i32_0 : i32, i32
  }
  func.func @transform_8(%arg0: i32) -> (i32, i32) {
    %c0_i32 = arith.constant 0 : i32
    %c0_i32_0 = arith.constant 0 : i32
    %c0_i32_1 = arith.constant 0 : i32
    return %c0_i32, %c0_i32_0 : i32, i32
  }
  func.func @transform_9(%arg0: i32) -> (i32, i32) {
    %c0_i32 = arith.constant 0 : i32
    %c0_i32_0 = arith.constant 0 : i32
    %c0_i32_1 = arith.constant 0 : i32
    return %c0_i32, %c0_i32_0 : i32, i32
  }
  func.func @transform_10(%arg0: i32) -> (i32, i32) {
    %c0_i32 = arith.constant 0 : i32
    %c0_i32_0 = arith.constant 0 : i32
    %c0_i32_1 = arith.constant 0 : i32
    return %c0_i32, %c0_i32_0 : i32, i32
  }
  func.func @transform_11(%arg0: i32) -> (i32, i32) {
    %c0_i32 = arith.constant 0 : i32
    %c0_i32_0 = arith.constant 0 : i32
    %c0_i32_1 = arith.constant 0 : i32
    return %c0_i32, %c0_i32_0 : i32, i32
  }
  func.func @transform_12(%arg0: i32) -> (i32, i32) {
    %c0_i32 = arith.constant 0 : i32
    %c0_i32_0 = arith.constant 0 : i32
    %c0_i32_1 = arith.constant 0 : i32
    return %c0_i32, %c0_i32_0 : i32, i32
  }
  func.func @transform_13(%arg0: i32) -> (i32, i32, i32) {
    %c0_i32 = arith.constant 0 : i32
    %c0_i32_0 = arith.constant 0 : i32
    %c0_i32_1 = arith.constant 0 : i32
    return %arg0, %c0_i32, %c0_i32_0 : i32, i32, i32
  }
}

module attributes {stable_mosaic.version = 11 : i64} {
  func.func @encoder_layer_kernel(%arg0: i32, %arg1: memref<1x8x128xf32, #tpu.memory_space<vmem>>, %arg2: memref<128x1536xf32, #tpu.memory_space<vmem>>, %arg3: memref<1x1536xf32, #tpu.memory_space<vmem>>, %arg4: memref<512x128xf32, #tpu.memory_space<vmem>>, %arg5: memref<1x128xf32, #tpu.memory_space<vmem>>, %arg6: memref<1x128xf32, #tpu.memory_space<vmem>>, %arg7: memref<1x128xf32, #tpu.memory_space<vmem>>, %arg8: memref<128x128xf32, #tpu.memory_space<vmem>>, %arg9: memref<1x128xf32, #tpu.memory_space<vmem>>, %arg10: memref<128x128xf32, #tpu.memory_space<vmem>>, %arg11: memref<1x128xf32, #tpu.memory_space<vmem>>, %arg12: memref<1x128xf32, #tpu.memory_space<vmem>>, %arg13: memref<1x128xf32, #tpu.memory_space<vmem>>, %arg14: memref<1x8x128xf32, #tpu.memory_space<vmem>>) attributes {dimension_semantics = [#tpu.dimension_semantics<parallel>], iteration_bounds = array<i64: 2>, scalar_prefetch = 0 : i64, scratch_operands = 0 : i64, tpu.core_type = #tpu.core_type<tc>, window_params = [{transform_indices = @transform_0, window_bounds = array<i64: 1, 8, 128>}, {pipeline_mode = #tpu.pipeline_mode<synchronous>, transform_indices = @transform_1, window_bounds = array<i64: 128, 1536>}, {pipeline_mode = #tpu.pipeline_mode<synchronous>, transform_indices = @transform_2, window_bounds = array<i64: 1, 1536>}, {pipeline_mode = #tpu.pipeline_mode<synchronous>, transform_indices = @transform_3, window_bounds = array<i64: 512, 128>}, {pipeline_mode = #tpu.pipeline_mode<synchronous>, transform_indices = @transform_4, window_bounds = array<i64: 1, 128>}, {pipeline_mode = #tpu.pipeline_mode<synchronous>, transform_indices = @transform_5, window_bounds = array<i64: 1, 128>}, {pipeline_mode = #tpu.pipeline_mode<synchronous>, transform_indices = @transform_6, window_bounds = array<i64: 1, 128>}, {pipeline_mode = #tpu.pipeline_mode<synchronous>, transform_indices = @transform_7, window_bounds = array<i64: 128, 128>}, {pipeline_mode = #tpu.pipeline_mode<synchronous>, transform_indices = @transform_8, window_bounds = array<i64: 1, 128>}, {pipeline_mode = #tpu.pipeline_mode<synchronous>, transform_indices = @transform_9, window_bounds = array<i64: 128, 128>}, {pipeline_mode = #tpu.pipeline_mode<synchronous>, transform_indices = @transform_10, window_bounds = array<i64: 1, 128>}, {pipeline_mode = #tpu.pipeline_mode<synchronous>, transform_indices = @transform_11, window_bounds = array<i64: 1, 128>}, {pipeline_mode = #tpu.pipeline_mode<synchronous>, transform_indices = @transform_12, window_bounds = array<i64: 1, 128>}, {transform_indices = @transform_13, window_bounds = array<i64: 1, 8, 128>}]} {
    %c0 = arith.constant 0 : index
    %c0_0 = arith.constant 0 : index
    %c0_1 = arith.constant 0 : index
    %0 = vector.load %arg1[%c0, %c0_0, %c0_1] : memref<1x8x128xf32, #tpu.memory_space<vmem>>, vector<1x8x128xf32>
    %1 = vector.shape_cast %0 : vector<1x8x128xf32> to vector<8x128xf32>
    %c0_2 = arith.constant 0 : index
    %c0_3 = arith.constant 0 : index
    %2 = vector.load %arg2[%c0_2, %c0_3] : memref<128x1536xf32, #tpu.memory_space<vmem>>, vector<128x1536xf32>
    %cst = arith.constant dense<0.000000e+00> : vector<8x1536xf32>
    %3 = tpu.matmul %1, %2, %cst {dimension_numbers = #tpu.dot_dimension_numbers<[1], [0], [0], [1], [0, 0, 1, 1], [], []>} : vector<8x128xf32>, vector<128x1536xf32>, vector<8x1536xf32> -> vector<8x1536xf32>
    %c0_4 = arith.constant 0 : index
    %c0_5 = arith.constant 0 : index
    %4 = vector.load %arg3[%c0_4, %c0_5] : memref<1x1536xf32, #tpu.memory_space<vmem>>, vector<1x1536xf32>
    %5 = vector.broadcast %4 : vector<1x1536xf32> to vector<8x1536xf32>
    %6 = arith.addf %3, %5 : vector<8x1536xf32>
    %7 = vector.extract_strided_slice %6 {offsets = [0, 0], sizes = [8, 128], strides = [1, 1]} : vector<8x1536xf32> to vector<8x128xf32>
    %cst_6 = arith.constant 0.353553385 : f32
    %8 = vector.broadcast %cst_6 : f32 to vector<8x128xf32>
    %9 = arith.mulf %7, %8 : vector<8x128xf32>
    %10 = vector.shape_cast %9 : vector<8x128xf32> to vector<1x8x128xf32>
    %11 = vector.extract_strided_slice %6 {offsets = [0, 512], sizes = [8, 128], strides = [1, 1]} : vector<8x1536xf32> to vector<8x128xf32>
    %12 = vector.shape_cast %11 : vector<8x128xf32> to vector<1x8x128xf32>
    %13 = vector.extract_strided_slice %6 {offsets = [0, 1024], sizes = [8, 128], strides = [1, 1]} : vector<8x1536xf32> to vector<8x128xf32>
    %14 = vector.shape_cast %13 : vector<8x128xf32> to vector<1x8x128xf32>
    "tpu.trace_start"() <{level = 10 : i32, message = "bqe,bke->bqk"}> : () -> ()
    %cst_7 = arith.constant dense<0.000000e+00> : vector<1x8x8xf32>
    %15 = tpu.matmul %10, %12, %cst_7 {dimension_numbers = #tpu.dot_dimension_numbers<[2], [2], [1], [1], [0, 0, 0, 1, 1, 1], [0], [0]>} : vector<1x8x128xf32>, vector<1x8x128xf32>, vector<1x8x8xf32> -> vector<1x8x8xf32>
    "tpu.trace_stop"() : () -> ()
    %cst_8 = arith.constant dense<0xFF800000> : vector<1x8xf32>
    %16 = vector.multi_reduction <maximumf>, %15, %cst_8 [2] : vector<1x8x8xf32> to vector<1x8xf32>
    %17 = vector.shape_cast %16 : vector<1x8xf32> to vector<1x8x1xf32>
    %18 = vector.broadcast %17 : vector<1x8x1xf32> to vector<1x8x8xf32>
    %19 = arith.subf %15, %18 : vector<1x8x8xf32>
    %20 = math.exp %19 : vector<1x8x8xf32>
    %cst_9 = arith.constant dense<0.000000e+00> : vector<1x8xf32>
    %21 = vector.multi_reduction <add>, %20, %cst_9 [2] : vector<1x8x8xf32> to vector<1x8xf32>
    %22 = vector.shape_cast %21 : vector<1x8xf32> to vector<1x8x1xf32>
    "tpu.trace_start"() <{level = 10 : i32, message = "bqk,bke->bqe"}> : () -> ()
    %cst_10 = arith.constant dense<0.000000e+00> : vector<1x8x128xf32>
    %23 = tpu.matmul %20, %14, %cst_10 {dimension_numbers = #tpu.dot_dimension_numbers<[2], [1], [1], [2], [0, 0, 0, 1, 1, 2], [0], [0]>} : vector<1x8x8xf32>, vector<1x8x128xf32>, vector<1x8x128xf32> -> vector<1x8x128xf32>
    "tpu.trace_stop"() : () -> ()
    %24 = tpu.reciprocal %22 : vector<1x8x1xf32> -> vector<1x8x1xf32>
    %25 = vector.broadcast %24 : vector<1x8x1xf32> to vector<1x8x128xf32>
    %26 = arith.mulf %23, %25 : vector<1x8x128xf32>
    %27 = vector.shape_cast %26 : vector<1x8x128xf32> to vector<8x128xf32>
    %28 = vector.extract_strided_slice %6 {offsets = [0, 128], sizes = [8, 128], strides = [1, 1]} : vector<8x1536xf32> to vector<8x128xf32>
    %cst_11 = arith.constant 0.353553385 : f32
    %29 = vector.broadcast %cst_11 : f32 to vector<8x128xf32>
    %30 = arith.mulf %28, %29 : vector<8x128xf32>
    %31 = vector.shape_cast %30 : vector<8x128xf32> to vector<1x8x128xf32>
    %32 = vector.extract_strided_slice %6 {offsets = [0, 640], sizes = [8, 128], strides = [1, 1]} : vector<8x1536xf32> to vector<8x128xf32>
    %33 = vector.shape_cast %32 : vector<8x128xf32> to vector<1x8x128xf32>
    %34 = vector.extract_strided_slice %6 {offsets = [0, 1152], sizes = [8, 128], strides = [1, 1]} : vector<8x1536xf32> to vector<8x128xf32>
    %35 = vector.shape_cast %34 : vector<8x128xf32> to vector<1x8x128xf32>
    "tpu.trace_start"() <{level = 10 : i32, message = "bqe,bke->bqk"}> : () -> ()
    %cst_12 = arith.constant dense<0.000000e+00> : vector<1x8x8xf32>
    %36 = tpu.matmul %31, %33, %cst_12 {dimension_numbers = #tpu.dot_dimension_numbers<[2], [2], [1], [1], [0, 0, 0, 1, 1, 1], [0], [0]>} : vector<1x8x128xf32>, vector<1x8x128xf32>, vector<1x8x8xf32> -> vector<1x8x8xf32>
    "tpu.trace_stop"() : () -> ()
    %cst_13 = arith.constant dense<0xFF800000> : vector<1x8xf32>
    %37 = vector.multi_reduction <maximumf>, %36, %cst_13 [2] : vector<1x8x8xf32> to vector<1x8xf32>
    %38 = vector.shape_cast %37 : vector<1x8xf32> to vector<1x8x1xf32>
    %39 = vector.broadcast %38 : vector<1x8x1xf32> to vector<1x8x8xf32>
    %40 = arith.subf %36, %39 : vector<1x8x8xf32>
    %41 = math.exp %40 : vector<1x8x8xf32>
    %cst_14 = arith.constant dense<0.000000e+00> : vector<1x8xf32>
    %42 = vector.multi_reduction <add>, %41, %cst_14 [2] : vector<1x8x8xf32> to vector<1x8xf32>
    %43 = vector.shape_cast %42 : vector<1x8xf32> to vector<1x8x1xf32>
    "tpu.trace_start"() <{level = 10 : i32, message = "bqk,bke->bqe"}> : () -> ()
    %cst_15 = arith.constant dense<0.000000e+00> : vector<1x8x128xf32>
    %44 = tpu.matmul %41, %35, %cst_15 {dimension_numbers = #tpu.dot_dimension_numbers<[2], [1], [1], [2], [0, 0, 0, 1, 1, 2], [0], [0]>} : vector<1x8x8xf32>, vector<1x8x128xf32>, vector<1x8x128xf32> -> vector<1x8x128xf32>
    "tpu.trace_stop"() : () -> ()
    %45 = tpu.reciprocal %43 : vector<1x8x1xf32> -> vector<1x8x1xf32>
    %46 = vector.broadcast %45 : vector<1x8x1xf32> to vector<1x8x128xf32>
    %47 = arith.mulf %44, %46 : vector<1x8x128xf32>
    %48 = vector.shape_cast %47 : vector<1x8x128xf32> to vector<8x128xf32>
    %49 = vector.extract_strided_slice %6 {offsets = [0, 256], sizes = [8, 128], strides = [1, 1]} : vector<8x1536xf32> to vector<8x128xf32>
    %cst_16 = arith.constant 0.353553385 : f32
    %50 = vector.broadcast %cst_16 : f32 to vector<8x128xf32>
    %51 = arith.mulf %49, %50 : vector<8x128xf32>
    %52 = vector.shape_cast %51 : vector<8x128xf32> to vector<1x8x128xf32>
    %53 = vector.extract_strided_slice %6 {offsets = [0, 768], sizes = [8, 128], strides = [1, 1]} : vector<8x1536xf32> to vector<8x128xf32>
    %54 = vector.shape_cast %53 : vector<8x128xf32> to vector<1x8x128xf32>
    %55 = vector.extract_strided_slice %6 {offsets = [0, 1280], sizes = [8, 128], strides = [1, 1]} : vector<8x1536xf32> to vector<8x128xf32>
    %56 = vector.shape_cast %55 : vector<8x128xf32> to vector<1x8x128xf32>
    "tpu.trace_start"() <{level = 10 : i32, message = "bqe,bke->bqk"}> : () -> ()
    %cst_17 = arith.constant dense<0.000000e+00> : vector<1x8x8xf32>
    %57 = tpu.matmul %52, %54, %cst_17 {dimension_numbers = #tpu.dot_dimension_numbers<[2], [2], [1], [1], [0, 0, 0, 1, 1, 1], [0], [0]>} : vector<1x8x128xf32>, vector<1x8x128xf32>, vector<1x8x8xf32> -> vector<1x8x8xf32>
    "tpu.trace_stop"() : () -> ()
    %cst_18 = arith.constant dense<0xFF800000> : vector<1x8xf32>
    %58 = vector.multi_reduction <maximumf>, %57, %cst_18 [2] : vector<1x8x8xf32> to vector<1x8xf32>
    %59 = vector.shape_cast %58 : vector<1x8xf32> to vector<1x8x1xf32>
    %60 = vector.broadcast %59 : vector<1x8x1xf32> to vector<1x8x8xf32>
    %61 = arith.subf %57, %60 : vector<1x8x8xf32>
    %62 = math.exp %61 : vector<1x8x8xf32>
    %cst_19 = arith.constant dense<0.000000e+00> : vector<1x8xf32>
    %63 = vector.multi_reduction <add>, %62, %cst_19 [2] : vector<1x8x8xf32> to vector<1x8xf32>
    %64 = vector.shape_cast %63 : vector<1x8xf32> to vector<1x8x1xf32>
    "tpu.trace_start"() <{level = 10 : i32, message = "bqk,bke->bqe"}> : () -> ()
    %cst_20 = arith.constant dense<0.000000e+00> : vector<1x8x128xf32>
    %65 = tpu.matmul %62, %56, %cst_20 {dimension_numbers = #tpu.dot_dimension_numbers<[2], [1], [1], [2], [0, 0, 0, 1, 1, 2], [0], [0]>} : vector<1x8x8xf32>, vector<1x8x128xf32>, vector<1x8x128xf32> -> vector<1x8x128xf32>
    "tpu.trace_stop"() : () -> ()
    %66 = tpu.reciprocal %64 : vector<1x8x1xf32> -> vector<1x8x1xf32>
    %67 = vector.broadcast %66 : vector<1x8x1xf32> to vector<1x8x128xf32>
    %68 = arith.mulf %65, %67 : vector<1x8x128xf32>
    %69 = vector.shape_cast %68 : vector<1x8x128xf32> to vector<8x128xf32>
    %70 = vector.extract_strided_slice %6 {offsets = [0, 384], sizes = [8, 128], strides = [1, 1]} : vector<8x1536xf32> to vector<8x128xf32>
    %cst_21 = arith.constant 0.353553385 : f32
    %71 = vector.broadcast %cst_21 : f32 to vector<8x128xf32>
    %72 = arith.mulf %70, %71 : vector<8x128xf32>
    %73 = vector.shape_cast %72 : vector<8x128xf32> to vector<1x8x128xf32>
    %74 = vector.extract_strided_slice %6 {offsets = [0, 896], sizes = [8, 128], strides = [1, 1]} : vector<8x1536xf32> to vector<8x128xf32>
    %75 = vector.shape_cast %74 : vector<8x128xf32> to vector<1x8x128xf32>
    %76 = vector.extract_strided_slice %6 {offsets = [0, 1408], sizes = [8, 128], strides = [1, 1]} : vector<8x1536xf32> to vector<8x128xf32>
    %77 = vector.shape_cast %76 : vector<8x128xf32> to vector<1x8x128xf32>
    "tpu.trace_start"() <{level = 10 : i32, message = "bqe,bke->bqk"}> : () -> ()
    %cst_22 = arith.constant dense<0.000000e+00> : vector<1x8x8xf32>
    %78 = tpu.matmul %73, %75, %cst_22 {dimension_numbers = #tpu.dot_dimension_numbers<[2], [2], [1], [1], [0, 0, 0, 1, 1, 1], [0], [0]>} : vector<1x8x128xf32>, vector<1x8x128xf32>, vector<1x8x8xf32> -> vector<1x8x8xf32>
    "tpu.trace_stop"() : () -> ()
    %cst_23 = arith.constant dense<0xFF800000> : vector<1x8xf32>
    %79 = vector.multi_reduction <maximumf>, %78, %cst_23 [2] : vector<1x8x8xf32> to vector<1x8xf32>
    %80 = vector.shape_cast %79 : vector<1x8xf32> to vector<1x8x1xf32>
    %81 = vector.broadcast %80 : vector<1x8x1xf32> to vector<1x8x8xf32>
    %82 = arith.subf %78, %81 : vector<1x8x8xf32>
    %83 = math.exp %82 : vector<1x8x8xf32>
    %cst_24 = arith.constant dense<0.000000e+00> : vector<1x8xf32>
    %84 = vector.multi_reduction <add>, %83, %cst_24 [2] : vector<1x8x8xf32> to vector<1x8xf32>
    %85 = vector.shape_cast %84 : vector<1x8xf32> to vector<1x8x1xf32>
    "tpu.trace_start"() <{level = 10 : i32, message = "bqk,bke->bqe"}> : () -> ()
    %cst_25 = arith.constant dense<0.000000e+00> : vector<1x8x128xf32>
    %86 = tpu.matmul %83, %77, %cst_25 {dimension_numbers = #tpu.dot_dimension_numbers<[2], [1], [1], [2], [0, 0, 0, 1, 1, 2], [0], [0]>} : vector<1x8x8xf32>, vector<1x8x128xf32>, vector<1x8x128xf32> -> vector<1x8x128xf32>
    "tpu.trace_stop"() : () -> ()
    %87 = tpu.reciprocal %85 : vector<1x8x1xf32> -> vector<1x8x1xf32>
    %88 = vector.broadcast %87 : vector<1x8x1xf32> to vector<1x8x128xf32>
    %89 = arith.mulf %86, %88 : vector<1x8x128xf32>
    %90 = vector.shape_cast %89 : vector<1x8x128xf32> to vector<8x128xf32>
    %91 = tpu.concatenate %27, %48, %69, %90 in 1 : vector<8x128xf32>, vector<8x128xf32>, vector<8x128xf32>, vector<8x128xf32> -> vector<8x512xf32>
    %c0_26 = arith.constant 0 : index
    %c0_27 = arith.constant 0 : index
    %92 = vector.load %arg4[%c0_26, %c0_27] : memref<512x128xf32, #tpu.memory_space<vmem>>, vector<512x128xf32>
    %cst_28 = arith.constant dense<0.000000e+00> : vector<8x128xf32>
    %93 = tpu.matmul %91, %92, %cst_28 {dimension_numbers = #tpu.dot_dimension_numbers<[1], [0], [0], [1], [0, 0, 1, 1], [], []>} : vector<8x512xf32>, vector<512x128xf32>, vector<8x128xf32> -> vector<8x128xf32>
    %c0_29 = arith.constant 0 : index
    %c0_30 = arith.constant 0 : index
    %94 = vector.load %arg5[%c0_29, %c0_30] : memref<1x128xf32, #tpu.memory_space<vmem>>, vector<1x128xf32>
    %95 = vector.broadcast %94 : vector<1x128xf32> to vector<8x128xf32>
    %96 = arith.addf %93, %95 : vector<8x128xf32>
    %97 = arith.addf %1, %96 : vector<8x128xf32>
    %c0_31 = arith.constant 0 : index
    %c0_32 = arith.constant 0 : index
    %98 = vector.load %arg6[%c0_31, %c0_32] : memref<1x128xf32, #tpu.memory_space<vmem>>, vector<1x128xf32>
    %c0_33 = arith.constant 0 : index
    %c0_34 = arith.constant 0 : index
    %99 = vector.load %arg7[%c0_33, %c0_34] : memref<1x128xf32, #tpu.memory_space<vmem>>, vector<1x128xf32>
    %cst_35 = arith.constant dense<0.000000e+00> : vector<8xf32>
    %100 = vector.multi_reduction <add>, %97, %cst_35 [1] : vector<8x128xf32> to vector<8xf32>
    %101 = vector.shape_cast %100 : vector<8xf32> to vector<8x1xf32>
    %cst_36 = arith.constant 3.125000e-02 : f32
    %102 = vector.broadcast %cst_36 : f32 to vector<8x1xf32>
    %103 = arith.mulf %101, %102 : vector<8x1xf32>
    %104 = vector.broadcast %103 : vector<8x1xf32> to vector<8x128xf32>
    %105 = arith.subf %97, %104 : vector<8x128xf32>
    %106 = arith.mulf %105, %105 : vector<8x128xf32>
    %cst_37 = arith.constant dense<0.000000e+00> : vector<8xf32>
    %107 = vector.multi_reduction <add>, %106, %cst_37 [1] : vector<8x128xf32> to vector<8xf32>
    %108 = vector.shape_cast %107 : vector<8xf32> to vector<8x1xf32>
    %cst_38 = arith.constant 9.600000e+01 : f32
    %109 = vector.broadcast %cst_38 : f32 to vector<8x1xf32>
    %110 = arith.mulf %109, %103 : vector<8x1xf32>
    %111 = arith.mulf %110, %103 : vector<8x1xf32>
    %112 = arith.subf %108, %111 : vector<8x1xf32>
    %cst_39 = arith.constant 3.125000e-02 : f32
    %113 = vector.broadcast %cst_39 : f32 to vector<8x1xf32>
    %114 = arith.mulf %112, %113 : vector<8x1xf32>
    %cst_40 = arith.constant 9.99999974E-6 : f32
    %115 = vector.broadcast %cst_40 : f32 to vector<8x1xf32>
    %116 = arith.addf %114, %115 : vector<8x1xf32>
    %117 = math.rsqrt %116 : vector<8x1xf32>
    %118 = vector.broadcast %117 : vector<8x1xf32> to vector<8x128xf32>
    %119 = arith.mulf %105, %118 : vector<8x128xf32>
    %120 = vector.broadcast %98 : vector<1x128xf32> to vector<8x128xf32>
    %121 = arith.mulf %119, %120 : vector<8x128xf32>
    %122 = vector.broadcast %99 : vector<1x128xf32> to vector<8x128xf32>
    %123 = arith.addf %121, %122 : vector<8x128xf32>
    %c0_41 = arith.constant 0 : index
    %c0_42 = arith.constant 0 : index
    %124 = vector.load %arg8[%c0_41, %c0_42] : memref<128x128xf32, #tpu.memory_space<vmem>>, vector<128x128xf32>
    %cst_43 = arith.constant dense<0.000000e+00> : vector<8x128xf32>
    %125 = tpu.matmul %123, %124, %cst_43 {dimension_numbers = #tpu.dot_dimension_numbers<[1], [0], [0], [1], [0, 0, 1, 1], [], []>} : vector<8x128xf32>, vector<128x128xf32>, vector<8x128xf32> -> vector<8x128xf32>
    %c0_44 = arith.constant 0 : index
    %c0_45 = arith.constant 0 : index
    %126 = vector.load %arg9[%c0_44, %c0_45] : memref<1x128xf32, #tpu.memory_space<vmem>>, vector<1x128xf32>
    %127 = vector.broadcast %126 : vector<1x128xf32> to vector<8x128xf32>
    %128 = arith.addf %125, %127 : vector<8x128xf32>
    %cst_46 = arith.constant 0.000000e+00 : f32
    %129 = vector.broadcast %cst_46 : f32 to vector<8x128xf32>
    %130 = arith.maximumf %128, %129 : vector<8x128xf32>
    %c0_47 = arith.constant 0 : index
    %c0_48 = arith.constant 0 : index
    %131 = vector.load %arg10[%c0_47, %c0_48] : memref<128x128xf32, #tpu.memory_space<vmem>>, vector<128x128xf32>
    %cst_49 = arith.constant dense<0.000000e+00> : vector<8x128xf32>
    %132 = tpu.matmul %130, %131, %cst_49 {dimension_numbers = #tpu.dot_dimension_numbers<[1], [0], [0], [1], [0, 0, 1, 1], [], []>} : vector<8x128xf32>, vector<128x128xf32>, vector<8x128xf32> -> vector<8x128xf32>
    %c0_50 = arith.constant 0 : index
    %c0_51 = arith.constant 0 : index
    %133 = vector.load %arg11[%c0_50, %c0_51] : memref<1x128xf32, #tpu.memory_space<vmem>>, vector<1x128xf32>
    %134 = vector.broadcast %133 : vector<1x128xf32> to vector<8x128xf32>
    %135 = arith.addf %132, %134 : vector<8x128xf32>
    %136 = arith.addf %123, %135 : vector<8x128xf32>
    %c0_52 = arith.constant 0 : index
    %c0_53 = arith.constant 0 : index
    %137 = vector.load %arg12[%c0_52, %c0_53] : memref<1x128xf32, #tpu.memory_space<vmem>>, vector<1x128xf32>
    %c0_54 = arith.constant 0 : index
    %c0_55 = arith.constant 0 : index
    %138 = vector.load %arg13[%c0_54, %c0_55] : memref<1x128xf32, #tpu.memory_space<vmem>>, vector<1x128xf32>
    %cst_56 = arith.constant dense<0.000000e+00> : vector<8xf32>
    %139 = vector.multi_reduction <add>, %136, %cst_56 [1] : vector<8x128xf32> to vector<8xf32>
    %140 = vector.shape_cast %139 : vector<8xf32> to vector<8x1xf32>
    %cst_57 = arith.constant 3.125000e-02 : f32
    %141 = vector.broadcast %cst_57 : f32 to vector<8x1xf32>
    %142 = arith.mulf %140, %141 : vector<8x1xf32>
    %143 = vector.broadcast %142 : vector<8x1xf32> to vector<8x128xf32>
    %144 = arith.subf %136, %143 : vector<8x128xf32>
    %145 = arith.mulf %144, %144 : vector<8x128xf32>
    %cst_58 = arith.constant dense<0.000000e+00> : vector<8xf32>
    %146 = vector.multi_reduction <add>, %145, %cst_58 [1] : vector<8x128xf32> to vector<8xf32>
    %147 = vector.shape_cast %146 : vector<8xf32> to vector<8x1xf32>
    %cst_59 = arith.constant 9.600000e+01 : f32
    %148 = vector.broadcast %cst_59 : f32 to vector<8x1xf32>
    %149 = arith.mulf %148, %142 : vector<8x1xf32>
    %150 = arith.mulf %149, %142 : vector<8x1xf32>
    %151 = arith.subf %147, %150 : vector<8x1xf32>
    %cst_60 = arith.constant 3.125000e-02 : f32
    %152 = vector.broadcast %cst_60 : f32 to vector<8x1xf32>
    %153 = arith.mulf %151, %152 : vector<8x1xf32>
    %cst_61 = arith.constant 9.99999974E-6 : f32
    %154 = vector.broadcast %cst_61 : f32 to vector<8x1xf32>
    %155 = arith.addf %153, %154 : vector<8x1xf32>
    %156 = math.rsqrt %155 : vector<8x1xf32>
    %157 = vector.broadcast %156 : vector<8x1xf32> to vector<8x128xf32>
    %158 = arith.mulf %144, %157 : vector<8x128xf32>
    %159 = vector.broadcast %137 : vector<1x128xf32> to vector<8x128xf32>
    %160 = arith.mulf %158, %159 : vector<8x128xf32>
    %161 = vector.broadcast %138 : vector<1x128xf32> to vector<8x128xf32>
    %162 = arith.addf %160, %161 : vector<8x128xf32>
    %163 = vector.shape_cast %162 : vector<8x128xf32> to vector<1x8x128xf32>
    %c0_62 = arith.constant 0 : index
    %c0_63 = arith.constant 0 : index
    %c0_64 = arith.constant 0 : index
    %164 = vector.load %arg14[%c0_62, %c0_63, %c0_64] : memref<1x8x128xf32, #tpu.memory_space<vmem>>, vector<1x8x128xf32>
    tpu.vector_store %arg14[%c0_62, %c0_63, %c0_64], %163 {strides = array<i32>} : memref<1x8x128xf32, #tpu.memory_space<vmem>>, vector<1x8x128xf32>,
    return
  }
  func.func @transform_0(%arg0: i32) -> (i32, i32, i32) {
    %c0_i32 = arith.constant 0 : i32
    %c0_i32_0 = arith.constant 0 : i32
    %c0_i32_1 = arith.constant 0 : i32
    return %arg0, %c0_i32, %c0_i32_0 : i32, i32, i32
  }
  func.func @transform_1(%arg0: i32) -> (i32, i32) {
    %c0_i32 = arith.constant 0 : i32
    %c0_i32_0 = arith.constant 0 : i32
    %c0_i32_1 = arith.constant 0 : i32
    return %c0_i32, %c0_i32_0 : i32, i32
  }
  func.func @transform_2(%arg0: i32) -> (i32, i32) {
    %c0_i32 = arith.constant 0 : i32
    %c0_i32_0 = arith.constant 0 : i32
    %c0_i32_1 = arith.constant 0 : i32
    return %c0_i32, %c0_i32_0 : i32, i32
  }
  func.func @transform_3(%arg0: i32) -> (i32, i32) {
    %c0_i32 = arith.constant 0 : i32
    %c0_i32_0 = arith.constant 0 : i32
    %c0_i32_1 = arith.constant 0 : i32
    return %c0_i32, %c0_i32_0 : i32, i32
  }
  func.func @transform_4(%arg0: i32) -> (i32, i32) {
    %c0_i32 = arith.constant 0 : i32
    %c0_i32_0 = arith.constant 0 : i32
    %c0_i32_1 = arith.constant 0 : i32
    return %c0_i32, %c0_i32_0 : i32, i32
  }
  func.func @transform_5(%arg0: i32) -> (i32, i32) {
    %c0_i32 = arith.constant 0 : i32
    %c0_i32_0 = arith.constant 0 : i32
    %c0_i32_1 = arith.constant 0 : i32
    return %c0_i32, %c0_i32_0 : i32, i32
  }
  func.func @transform_6(%arg0: i32) -> (i32, i32) {
    %c0_i32 = arith.constant 0 : i32
    %c0_i32_0 = arith.constant 0 : i32
    %c0_i32_1 = arith.constant 0 : i32
    return %c0_i32, %c0_i32_0 : i32, i32
  }
  func.func @transform_7(%arg0: i32) -> (i32, i32) {
    %c0_i32 = arith.constant 0 : i32
    %c0_i32_0 = arith.constant 0 : i32
    %c0_i32_1 = arith.constant 0 : i32
    return %c0_i32, %c0_i32_0 : i32, i32
  }
  func.func @transform_8(%arg0: i32) -> (i32, i32) {
    %c0_i32 = arith.constant 0 : i32
    %c0_i32_0 = arith.constant 0 : i32
    %c0_i32_1 = arith.constant 0 : i32
    return %c0_i32, %c0_i32_0 : i32, i32
  }
  func.func @transform_9(%arg0: i32) -> (i32, i32) {
    %c0_i32 = arith.constant 0 : i32
    %c0_i32_0 = arith.constant 0 : i32
    %c0_i32_1 = arith.constant 0 : i32
    return %c0_i32, %c0_i32_0 : i32, i32
  }
  func.func @transform_10(%arg0: i32) -> (i32, i32) {
    %c0_i32 = arith.constant 0 : i32
    %c0_i32_0 = arith.constant 0 : i32
    %c0_i32_1 = arith.constant 0 : i32
    return %c0_i32, %c0_i32_0 : i32, i32
  }
  func.func @transform_11(%arg0: i32) -> (i32, i32) {
    %c0_i32 = arith.constant 0 : i32
    %c0_i32_0 = arith.constant 0 : i32
    %c0_i32_1 = arith.constant 0 : i32
    return %c0_i32, %c0_i32_0 : i32, i32
  }
  func.func @transform_12(%arg0: i32) -> (i32, i32) {
    %c0_i32 = arith.constant 0 : i32
    %c0_i32_0 = arith.constant 0 : i32
    %c0_i32_1 = arith.constant 0 : i32
    return %c0_i32, %c0_i32_0 : i32, i32
  }
  func.func @transform_13(%arg0: i32) -> (i32, i32, i32) {
    %c0_i32 = arith.constant 0 : i32
    %c0_i32_0 = arith.constant 0 : i32
    %c0_i32_1 = arith.constant 0 : i32
    return %arg0, %c0_i32, %c0_i32_0 : i32, i32, i32
  }
}

</mosaic_0001>

<bundles_post_ra>
// kernel: transformer_encoder.2
= control target key start
LH: loop header
LB: loop body
LE: loop exit
PB: predicated region body
PF: predicated region fallthrough
CT: control target
= control target key end

     0   :  { %s4182_s0 = inlined_call_operand.vmem [shape: f32[2,8,128], index: 0, kind: input, shape index: {}]   ;;  %s4183_s1 = inlined_call_operand.hbm [shape: f32[128,1536], index: 1, kind: input, shape index: {}]   ;;  %s4184_s2 = inlined_call_operand.hbm [shape: f32[1,1536], index: 2, kind: input, shape index: {}]   ;;  %s4185_s3 = inlined_call_operand.hbm [shape: f32[512,128], index: 3, kind: input, shape index: {}]   ;;  %s4186_s4 = inlined_call_operand.hbm [shape: f32[1,128], index: 4, kind: input, shape index: {}]   ;;  %s4187_s5 = inlined_call_operand.hbm [shape: f32[1,128], index: 5, kind: input, shape index: {}]   ;;  %s4188_s6 = inlined_call_operand.hbm [shape: f32[1,128], index: 6, kind: input, shape index: {}]   ;;  %s4189_s7 = inlined_call_operand.hbm [shape: f32[128,128], index: 7, kind: input, shape index: {}]   ;;  %s4190_s8 = inlined_call_operand.hbm [shape: f32[1,128], index: 8, kind: input, shape index: {}]   ;;  %s4191_s9 = inlined_call_operand.hbm [shape: f32[128,128], index: 9, kind: input, shape index: {}]   ;;  %s4192_s10 = inlined_call_operand.hbm [shape: f32[1,128], index: 10, kind: input, shape index: {}]   ;;  %s4193_s11 = inlined_call_operand.hbm [shape: f32[1,128], index: 11, kind: input, shape index: {}]   ;;  %s4194_s12 = inlined_call_operand.hbm [shape: f32[1,128], index: 12, kind: input, shape index: {}]   ;;  %s4195_s13 = inlined_call_operand.vmem [shape: f32[2,8,128], index: 13, kind: output, shape index: {}]  }
   0x1   :  { %4199 = sst [smem:[#allocation29_spill]] %s4184_s2 }
   0x2   :  { %18 = vsyncpa [#allocation3], 0 }
   0x3   :  { %19 = vsyncpa [#allocation5], 0 }
   0x4   :  { %20 = vsyncpa [#allocation8], 0 }
   0x5   :  { %21 = vsyncpa [#allocation11], 0 }
   0x6   :  { %22 = vsyncpa [#allocation14], 0 }
   0x7   :  { %23 = vsyncpa [#allocation17], 0 }
   0x8   :  { %24 = vsyncpa [#allocation20], 0  ;;  %s3726_s25 = smov 0  }
   0x9 LB: > { %4200 = sst [smem:[#allocation28_spill]] %s3635_s25  ;;  %s3637_s26 = smov [#allocation4]   ;;  %s3635_s25 = sphi %s3726_s25, %s30_s25  }
   0xa   : > { %s365_s27 = sshll.u32 %s3637_s26, 4  ;;  %s3732_s28 = sadd.s32 4294967295, %s3635_s25   ;;  %s3737_s27 = int_to_ptr.vmem [resolvable:$true] %s365_s27 }
   0xb   : > { %p2532_p0 = scmp.ge.s32.totalorder %s3635_s25, 1  ;;  %p339_p1 = scmp.lt.s32.totalorder %s3635_s25, 3 }
   0xc   : > { %p4197_p2 = scmp.eq.s32.totalorder %s3732_s28, 0  ;;  %s3638_s30 = smov [#allocation7]  }
   0xd   : > { %p3739_p3 = pnand %p2532_p0, %p339_p1  ;;  %s389_s14 = sshll.u32 %s3638_s30, 4  ;;  %s3745_s14 = int_to_ptr.vmem [resolvable:$true] %s389_s14 }
   0xe   : > { %s3639_s15 = smov [#allocation10]   ;;  %s3640_s18 = smov [#allocation13]  }
   0xf   : > { %s4201_s29 = scalar_select %p3739_p3, 1, 0 }
  0x10   : > { %p3156_p4 = pneg %p3739_p3  ;;  %s411_s16 = sshll.u32 %s3639_s15, 4  ;;  %s3753_s16 = int_to_ptr.vmem [resolvable:$true] %s411_s16 }
  0x11   : > { %s435_s19 = sshll.u32 %s3640_s18, 4  ;;  %s4203_s2 = sld [smem:[#allocation29_spill]]  ;;  %s3755_s19 = int_to_ptr.vmem [resolvable:$true] %s435_s19 }
  0x12   : > { %p3749_p5 = pnand %p4197_p2, %p3156_p4 }
  0x14   : > { %p3765_p7 = pneg %p3749_p5 }
  0x17   : > { %s3265_s22 = scalar_lea.hbm %s4203_s2, 192 }
  0x18   : > { %p3266_p6 = scmp.ne.s32.totalorder %s4203_s2, %s3265_s22  ;;  %p3272_p10 = scmp.lt.u32.totalorder %s3265_s22, %s4203_s2 }
  0x1a   : > { %p3268_p8 = pnand %p3765_p7, %p3266_p6 }
  0x1c   : > { %p3269_p9 = pneg %p3268_p8 }
  0x1e   : > { %p3274_p11 = pnand %p3272_p10, %p3269_p9 }
  0x20   : > { %3277 = shalt.err (!%p3274_p11)
}
  0x21   : > { %s3278_s18 = scalar_lea.vmem %s3737_s27, 192  ;;  %p3286_p1 = scmp.lt.s32.totalorder %s3737_s27, %s3737_s27 }
  0x22   : > { %p3279_p12 = scmp.ne.s32.totalorder %s3737_s27, %s3278_s18  ;;  %p3287_p4 = scmp.lt.s32.totalorder %s3278_s18, %s3278_s18 }
  0x24   : > { %p3281_p13 = pnand %p3279_p12, %p3765_p7  ;;  %p3288_p6 = por %p3287_p4, %p3286_p1 }
  0x26   : > { %p3282_p0 = pneg %p3281_p13 }
  0x28   : > { %p3289_p8 = pnand %p3288_p6, %p3282_p0 }
  0x2a   : > { %3292 = shalt.err (!%p3289_p8)
}
  0x2b   : > { %3162 = dma.hbm_to_vmem [thread:$0]  (!%p3749_p5), %s4203_s2, 192, %s3737_s27, [#allocation5]  }
  0x2c   : > { %s3293_s24 = scalar_lea.hbm %s4186_s4, 16 }
  0x2d   : > { %p3294_p9 = scmp.ne.s32.totalorder %s4186_s4, %s3293_s24  ;;  %p3300_p12 = scmp.lt.u32.totalorder %s3293_s24, %s4186_s4 }
  0x2f   : > { %p3296_p10 = pnand %p3294_p9, %p3765_p7 }
  0x31   : > { %p3297_p11 = pneg %p3296_p10 }
  0x33   : > { %p3302_p13 = pnand %p3300_p12, %p3297_p11 }
  0x35   : > { %3305 = shalt.err (!%p3302_p13)
}
  0x36   : > { %s3306_s27 = scalar_lea.vmem %s3745_s14, 16  ;;  %s3313_s20 = scalar_lea.vmem %s3745_s14, 32 }
  0x37   : > { %p3307_p0 = scmp.ne.s32.totalorder %s3745_s14, %s3306_s27  ;;  %p3314_p6 = scmp.lt.s32.totalorder %s3745_s14, %s3745_s14 }
  0x38   : > { %p3315_p8 = scmp.lt.s32.totalorder %s3313_s20, %s3306_s27 }
  0x39   : > { %p3309_p1 = pnand %p3307_p0, %p3765_p7 }
  0x3a   : > { %p3316_p9 = por %p3315_p8, %p3314_p6 }
  0x3b   : > { %p3310_p4 = pneg %p3309_p1 }
  0x3d   : > { %p3317_p10 = pnand %p3316_p9, %p3310_p4 }
  0x3f   : > { %3320 = shalt.err (!%p3317_p10)
}
  0x40   : > { %3168 = dma.hbm_to_vmem [thread:$0]  (!%p3749_p5), %s4186_s4, 16, %s3745_s14, [#allocation8]  }
  0x41   : > { %s3321_s24 = scalar_lea.hbm %s4188_s6, 16 }
  0x42   : > { %p3322_p11 = scmp.ne.s32.totalorder %s4188_s6, %s3321_s24  ;;  %p3328_p0 = scmp.lt.u32.totalorder %s3321_s24, %s4188_s6 }
  0x44   : > { %p3324_p12 = pnand %p3322_p11, %p3765_p7 }
  0x46   : > { %p3325_p13 = pneg %p3324_p12 }
  0x48   : > { %p3330_p1 = pnand %p3328_p0, %p3325_p13 }
  0x4a   : > { %3333 = shalt.err (!%p3330_p1)
}
  0x4b   : > { %s3334_s14 = scalar_lea.vmem %s3753_s16, 16  ;;  %s3341_s20 = scalar_lea.vmem %s3753_s16, 32 }
  0x4c   : > { %p3335_p4 = scmp.ne.s32.totalorder %s3753_s16, %s3334_s14  ;;  %p3342_p9 = scmp.lt.s32.totalorder %s3753_s16, %s3753_s16 }
  0x4d   : > { %p3343_p10 = scmp.lt.s32.totalorder %s3341_s20, %s3334_s14 }
  0x4e   : > { %p3337_p6 = pnand %p3335_p4, %p3765_p7 }
  0x4f   : > { %p3344_p11 = por %p3343_p10, %p3342_p9 }
  0x50   : > { %p3338_p8 = pneg %p3337_p6 }
  0x52   : > { %p3345_p12 = pnand %p3344_p11, %p3338_p8 }
  0x54   : > { %3348 = shalt.err (!%p3345_p12)
}
  0x55   : > { %3174 = dma.hbm_to_vmem [thread:$0]  (!%p3749_p5), %s4188_s6, 16, %s3753_s16, [#allocation11]  }
  0x56   : > { %s3349_s24 = scalar_lea.hbm %s4190_s8, 16 }
  0x57   : > { %p3350_p13 = scmp.ne.s32.totalorder %s4190_s8, %s3349_s24  ;;  %p3356_p4 = scmp.lt.u32.totalorder %s3349_s24, %s4190_s8 }
  0x59   : > { %p3352_p0 = pnand %p3350_p13, %p3765_p7 }
  0x5b   : > { %p3353_p1 = pneg %p3352_p0 }
  0x5d   : > { %p3358_p6 = pnand %p3356_p4, %p3353_p1 }
  0x5f   : > { %3361 = shalt.err (!%p3358_p6)
}
  0x60   : > { %s3362_s16 = scalar_lea.vmem %s3755_s19, 16  ;;  %s3369_s14 = scalar_lea.vmem %s3755_s19, 32 }
  0x61   : > { %p3363_p8 = scmp.ne.s32.totalorder %s3755_s19, %s3362_s16  ;;  %p3370_p11 = scmp.lt.s32.totalorder %s3755_s19, %s3755_s19 }
  0x62   : > { %p3371_p12 = scmp.lt.s32.totalorder %s3369_s14, %s3362_s16 }
  0x63   : > { %p3365_p9 = pnand %p3363_p8, %p3765_p7 }
  0x64   : > { %p3372_p13 = por %p3371_p12, %p3370_p11 }
  0x65   : > { %p3366_p10 = pneg %p3365_p9 }
  0x67   : > { %p3373_p0 = pnand %p3372_p13, %p3366_p10 }
  0x69   : > { %3376 = shalt.err (!%p3373_p0)
}
  0x6a   : > { %3180 = dma.hbm_to_vmem [thread:$0]  (!%p3749_p5), %s4190_s8, 16, %s3755_s19, [#allocation14]  }
  0x6b   : > { %s3641_s21 = smov [#allocation16]   ;;  %s3642_s23 = smov [#allocation2]  }
  0x6c   : > { %s459_s22 = sshll.u32 %s3641_s21, 4  ;;  %s351_s24 = sshll.u32 %s3642_s23, 4  ;;  %s460_s22 = int_to_ptr.vmem [resolvable:$true] %s459_s22  ;;  %s352_s24 = int_to_ptr.vmem [resolvable:$true] %s351_s24 }
  0x6d   : > { %s3377_s18 = scalar_lea.hbm %s4192_s10, 16 }
  0x6e   : > { %p3378_p1 = scmp.ne.s32.totalorder %s4192_s10, %s3377_s18  ;;  %p3384_p8 = scmp.lt.u32.totalorder %s3377_s18, %s4192_s10 }
  0x70   : > { %p3380_p4 = pnand %p3378_p1, %p3765_p7 }
  0x72   : > { %p3381_p6 = pneg %p3380_p4 }
  0x74   : > { %p3386_p9 = pnand %p3384_p8, %p3381_p6 }
  0x76   : > { %3389 = shalt.err (!%p3386_p9)
}
  0x77   : > { %s3390_s19 = scalar_lea.vmem %s460_s22, 16  ;;  %s3397_s25 = scalar_lea.vmem %s460_s22, 32 }
  0x78   : > { %p3391_p10 = scmp.ne.s32.totalorder %s460_s22, %s3390_s19  ;;  %p3398_p13 = scmp.lt.s32.totalorder %s460_s22, %s460_s22 }
  0x79   : > { %p3399_p0 = scmp.lt.s32.totalorder %s3397_s25, %s3390_s19 }
  0x7a   : > { %p3393_p11 = pnand %p3391_p10, %p3765_p7 }
  0x7b   : > { %p3400_p2 = por %p3399_p0, %p3398_p13 }
  0x7c   : > { %p3394_p12 = pneg %p3393_p11 }
  0x7e   : > { %p3401_p3 = pnand %p3400_p2, %p3394_p12 }
  0x80   : > { %3404 = shalt.err (!%p3401_p3)
}
  0x81   : > { %3186 = dma.hbm_to_vmem [thread:$0]  (!%p3749_p5), %s4192_s10, 16, %s460_s22, [#allocation17]  }
  0x82   : > { %s3405_s18 = scalar_lea.hbm %s4183_s1, 24576 }
  0x83   : > { %p3406_p1 = scmp.ne.s32.totalorder %s4183_s1, %s3405_s18  ;;  %p3412_p3 = scmp.lt.u32.totalorder %s3405_s18, %s4183_s1 }
  0x85   : > { %p3408_p4 = pnand %p3406_p1, %p3765_p7 }
  0x87   : > { %p3409_p2 = pneg %p3408_p4 }
  0x89   : > { %p3414_p6 = pnand %p3412_p3, %p3409_p2 }
  0x8b   : > { %3417 = shalt.err (!%p3414_p6)
}
  0x8c   : > { %s3418_s19 = scalar_lea.vmem %s352_s24, 24576  ;;  %p3426_p11 = scmp.lt.s32.totalorder %s352_s24, %s352_s24 }
  0x8d   : > { %p3419_p8 = scmp.ne.s32.totalorder %s352_s24, %s3418_s19  ;;  %p3427_p12 = scmp.lt.s32.totalorder %s3418_s19, %s3418_s19 }
  0x8f   : > { %p3421_p9 = pnand %p3419_p8, %p3765_p7  ;;  %p3428_p13 = por %p3427_p12, %p3426_p11 }
  0x91   : > { %p3422_p10 = pneg %p3421_p9 }
  0x93   : > { %p3429_p0 = pnand %p3428_p13, %p3422_p10 }
  0x95   : > { %3432 = shalt.err (!%p3429_p0)
}
  0x96   : > { %s3643_s22 = smov 1536   ;;  %s3644_s25 = smov 96  }
  0x97   : > { %3159 = dma.hbm_to_vmem [thread:$0]  (!%p3749_p5), %s4183_s1, 24576, %s352_s24, [#allocation3], %s3643_s22, %s3643_s22, %s3644_s25  }
  0x98   : > { %s3645_s30 = smov [#allocation6]   ;;  %s3433_s16 = scalar_lea.hbm %s4185_s3, 8192 }
  0x99   : > { %s375_s15 = sshll.u32 %s3645_s30, 4  ;;  %p3434_p1 = scmp.ne.s32.totalorder %s4185_s3, %s3433_s16  ;;  %s376_s15 = int_to_ptr.vmem [resolvable:$true] %s375_s15 }
  0x9a   : > { %p3440_p3 = scmp.lt.u32.totalorder %s3433_s16, %s4185_s3 }
  0x9b   : > { %p3436_p4 = pnand %p3434_p1, %p3765_p7 }
  0x9d   : > { %p3437_p2 = pneg %p3436_p4 }
  0x9f   : > { %p3442_p6 = pnand %p3440_p3, %p3437_p2 }
  0xa1   : > { %3445 = shalt.err (!%p3442_p6)
}
  0xa2   : > { %s3446_s24 = scalar_lea.vmem %s376_s15, 8192  ;;  %p3454_p11 = scmp.lt.s32.totalorder %s376_s15, %s376_s15 }
  0xa3   : > { %p3447_p8 = scmp.ne.s32.totalorder %s376_s15, %s3446_s24  ;;  %p3455_p12 = scmp.lt.s32.totalorder %s3446_s24, %s3446_s24 }
  0xa5   : > { %p3449_p9 = pnand %p3447_p8, %p3765_p7  ;;  %p3456_p13 = por %p3455_p12, %p3454_p11 }
  0xa7   : > { %p3450_p10 = pneg %p3449_p9 }
  0xa9   : > { %p3457_p0 = pnand %p3456_p13, %p3450_p10 }
  0xab   : > { %3460 = shalt.err (!%p3457_p0)
}
  0xac   : > { %s3646_s22 = smov 128   ;;  %s3647_s25 = smov 8  }
  0xad   : > { %3165 = dma.hbm_to_vmem [thread:$0]  (!%p3749_p5), %s4185_s3, 8192, %s376_s15, [#allocation5], %s3646_s22, %s3646_s22, %s3647_s25  }
  0xae   : > { %s3648_s23 = smov [#allocation9]   ;;  %s3649_s18 = smov [#allocation12]  }
  0xaf   : > { %s400_s30 = sshll.u32 %s3648_s23, 4  ;;  %s421_s27 = sshll.u32 %s3649_s18, 4  ;;  %s401_s30 = int_to_ptr.vmem [resolvable:$true] %s400_s30  ;;  %s3915_s27 = int_to_ptr.vmem [resolvable:$true] %s421_s27 }
  0xb0   : > { %s3461_s20 = scalar_lea.hbm %s4187_s5, 16 }
  0xb1   : > { %p3462_p1 = scmp.ne.s32.totalorder %s4187_s5, %s3461_s20  ;;  %p3468_p3 = scmp.lt.u32.totalorder %s3461_s20, %s4187_s5 }
  0xb3   : > { %p3464_p4 = pnand %p3462_p1, %p3765_p7 }
  0xb5   : > { %p3465_p2 = pneg %p3464_p4 }
  0xb7   : > { %p3470_p6 = pnand %p3468_p3, %p3465_p2 }
  0xb9   : > { %3473 = shalt.err (!%p3470_p6)
}
  0xba   : > { %s3474_s21 = scalar_lea.vmem %s401_s30, 16  ;;  %s3481_s23 = scalar_lea.vmem %s401_s30, 32 }
  0xbb   : > { %p3475_p8 = scmp.ne.s32.totalorder %s401_s30, %s3474_s21  ;;  %p3482_p11 = scmp.lt.s32.totalorder %s401_s30, %s401_s30 }
  0xbc   : > { %p3483_p12 = scmp.lt.s32.totalorder %s3481_s23, %s3474_s21 }
  0xbd   : > { %p3477_p9 = pnand %p3475_p8, %p3765_p7 }
  0xbe   : > { %p3484_p13 = por %p3483_p12, %p3482_p11 }
  0xbf   : > { %p3478_p10 = pneg %p3477_p9 }
  0xc1   : > { %p3485_p0 = pnand %p3484_p13, %p3478_p10 }
  0xc3   : > { %3488 = shalt.err (!%p3485_p0)
}
  0xc4   : > { %3171 = dma.hbm_to_vmem [thread:$0]  (!%p3749_p5), %s4187_s5, 16, %s401_s30, [#allocation8]  }
  0xc5   : > { %s3489_s19 = scalar_lea.hbm %s4189_s7, 2048 }
  0xc6   : > { %p3490_p1 = scmp.ne.s32.totalorder %s4189_s7, %s3489_s19  ;;  %p3496_p3 = scmp.lt.u32.totalorder %s3489_s19, %s4189_s7 }
  0xc8   : > { %p3492_p4 = pnand %p3490_p1, %p3765_p7 }
  0xca   : > { %p3493_p2 = pneg %p3492_p4 }
  0xcc   : > { %p3498_p6 = pnand %p3496_p3, %p3493_p2 }
  0xce   : > { %3501 = shalt.err (!%p3498_p6)
}
  0xcf   : > { %s3502_s30 = scalar_lea.vmem %s3915_s27, 2048  ;;  %p3510_p11 = scmp.lt.s32.totalorder %s3915_s27, %s3915_s27 }
  0xd0   : > { %p3503_p8 = scmp.ne.s32.totalorder %s3915_s27, %s3502_s30  ;;  %p3511_p12 = scmp.lt.s32.totalorder %s3502_s30, %s3502_s30 }
  0xd2   : > { %p3505_p9 = pnand %p3503_p8, %p3765_p7  ;;  %p3512_p13 = por %p3511_p12, %p3510_p11 }
  0xd4   : > { %p3506_p10 = pneg %p3505_p9 }
  0xd6   : > { %p3513_p0 = pnand %p3512_p13, %p3506_p10 }
  0xd8   : > { %3516 = shalt.err (!%p3513_p0)
}
  0xd9   : > { %3177 = dma.hbm_to_vmem [thread:$0]  (!%p3749_p5), %s4189_s7, 2048, %s3915_s27, [#allocation11], %s3646_s22, %s3646_s22, %s3647_s25  }
  0xda   : > { %s3650_s16 = smov [#allocation15]   ;;  %s3651_s20 = smov [#allocation18]  }
  0xdb   : > { %s445_s14 = sshll.u32 %s3650_s16, 4  ;;  %s470_s19 = sshll.u32 %s3651_s20, 4  ;;  %s446_s14 = int_to_ptr.vmem [resolvable:$true] %s445_s14  ;;  %s3961_s19 = int_to_ptr.vmem [resolvable:$true] %s470_s19 }
  0xdc   : > { %s3517_s15 = scalar_lea.hbm %s4191_s9, 2048 }
  0xdd   : > { %p3518_p1 = scmp.ne.s32.totalorder %s4191_s9, %s3517_s15  ;;  %p3524_p3 = scmp.lt.u32.totalorder %s3517_s15, %s4191_s9 }
  0xdf   : > { %p3520_p4 = pnand %p3518_p1, %p3765_p7 }
  0xe1   : > { %p3521_p2 = pneg %p3520_p4 }
  0xe3   : > { %p3526_p6 = pnand %p3524_p3, %p3521_p2 }
  0xe5   : > { %3529 = shalt.err (!%p3526_p6)
}
  0xe6   : > { %s3530_s18 = scalar_lea.vmem %s446_s14, 2048  ;;  %p3538_p11 = scmp.lt.s32.totalorder %s446_s14, %s446_s14 }
  0xe7   : > { %p3531_p8 = scmp.ne.s32.totalorder %s446_s14, %s3530_s18  ;;  %p3539_p12 = scmp.lt.s32.totalorder %s3530_s18, %s3530_s18 }
  0xe9   : > { %p3533_p9 = pnand %p3531_p8, %p3765_p7  ;;  %p3540_p13 = por %p3539_p12, %p3538_p11 }
  0xeb   : > { %p3534_p10 = pneg %p3533_p9 }
  0xed   : > { %p3541_p0 = pnand %p3540_p13, %p3534_p10 }
  0xef   : > { %3544 = shalt.err (!%p3541_p0)
}
  0xf0   : > { %3183 = dma.hbm_to_vmem [thread:$0]  (!%p3749_p5), %s4191_s9, 2048, %s446_s14, [#allocation14], %s3646_s22, %s3646_s22, %s3647_s25  }
  0xf1   : > { %s3545_s15 = scalar_lea.hbm %s4193_s11, 16 }
  0xf2   : > { %p3546_p1 = scmp.ne.s32.totalorder %s4193_s11, %s3545_s15  ;;  %p3552_p3 = scmp.lt.u32.totalorder %s3545_s15, %s4193_s11 }
  0xf4   : > { %p3548_p4 = pnand %p3546_p1, %p3765_p7 }
  0xf6   : > { %p3549_p2 = pneg %p3548_p4 }
  0xf8   : > { %p3554_p6 = pnand %p3552_p3, %p3549_p2 }
  0xfa   : > { %3557 = shalt.err (!%p3554_p6)
}
  0xfb   : > { %s3558_s22 = scalar_lea.vmem %s3961_s19, 16  ;;  %s3565_s25 = scalar_lea.vmem %s3961_s19, 32 }
  0xfc   : > { %p3559_p8 = scmp.ne.s32.totalorder %s3961_s19, %s3558_s22  ;;  %p3566_p11 = scmp.lt.s32.totalorder %s3961_s19, %s3961_s19 }
  0xfd   : > { %p3567_p12 = scmp.lt.s32.totalorder %s3565_s25, %s3558_s22 }
  0xfe   : > { %p3561_p9 = pnand %p3559_p8, %p3765_p7 }
  0xff   : > { %p3568_p13 = por %p3567_p12, %p3566_p11 }
 0x100   : > { %p3562_p10 = pneg %p3561_p9 }
 0x102   : > { %p3569_p0 = pnand %p3568_p13, %p3562_p10 }
 0x104   : > { %3572 = shalt.err (!%p3569_p0)
}
 0x105   : > { %3189 = dma.hbm_to_vmem [thread:$0]  (!%p3749_p5), %s4193_s11, 16, %s3961_s19, [#allocation17]  }
 0x106   : > { %s3652_s16 = smov [#allocation19]   ;;  %s3573_s15 = scalar_lea.hbm %s4194_s12, 16 }
 0x107   : > { %s481_s20 = sshll.u32 %s3652_s16, 4  ;;  %p3574_p1 = scmp.ne.s32.totalorder %s4194_s12, %s3573_s15  ;;  %s482_s20 = int_to_ptr.vmem [resolvable:$true] %s481_s20 }
 0x108   : > { %p3580_p3 = scmp.lt.u32.totalorder %s3573_s15, %s4194_s12 }
 0x109   : > { %p3576_p4 = pnand %p3574_p1, %p3765_p7 }
 0x10b   : > { %p3577_p2 = pneg %p3576_p4 }
 0x10d   : > { %p3582_p6 = pnand %p3580_p3, %p3577_p2 }
 0x10f   : > { %3585 = shalt.err (!%p3582_p6)
}
 0x110   : > { %s3586_s19 = scalar_lea.vmem %s482_s20, 16  ;;  %s3593_s22 = scalar_lea.vmem %s482_s20, 32 }
 0x111   : > { %p3587_p8 = scmp.ne.s32.totalorder %s482_s20, %s3586_s19  ;;  %p3594_p11 = scmp.lt.s32.totalorder %s482_s20, %s482_s20 }
 0x112   : > { %p3595_p12 = scmp.lt.s32.totalorder %s3593_s22, %s3586_s19 }
 0x113   : > { %p3589_p9 = pnand %p3587_p8, %p3765_p7 }
 0x114   : > { %p3596_p13 = por %p3595_p12, %p3594_p11 }
 0x115   : > { %p3590_p10 = pneg %p3589_p9 }
 0x117   : > { %p3597_p0 = pnand %p3596_p13, %p3590_p10 }
 0x119   : > { %3600 = shalt.err (!%p3597_p0)
}
 0x11a   : > { %3192 = dma.hbm_to_vmem [thread:$0]  (!%p3749_p5), %s4194_s12, 16, %s482_s20, [#allocation20]  }
 0x11b   : > { %p4205_p1 = scmp.ne.s32.totalorder %s4201_s29, 0 }
 0x11c   : > { %p4206_p4 = scmp.eq.s32.totalorder (!%p4205_p1), %s3732_s28, 0 }
 0x11d   : > { %501 = sbr.rel (%p4205_p1) target bundleno = 2471 (0x9a7), region = 72 }
 0x124   : > { %3606 = dma.done.wait (%p4206_p4), [#allocation3], 24576   ;;  %p4207_p7 = pmov %p4206_p4 }
 0x125   : > { %p4208_p2 = pmov %p4206_p4 }
 0x126   : > { %3608 = vsyncadd (%p4207_p7), [#allocation3], 4294942720 }
 0x127   : > { %3610 = dma.done.wait (%p4208_p2), [#allocation5], 8384   ;;  %p4209_p3 = pmov %p4208_p2 }
 0x128   : > { %p4210_p6 = pmov %p4208_p2 }
 0x129   : > { %3612 = vsyncadd (%p4209_p3), [#allocation5], 4294958912 }
 0x12a   : > { %3614 = dma.done.wait (%p4210_p6), [#allocation8], 32   ;;  %p4211_p5 = pmov %p4208_p2 }
 0x12b   : > { %p4212_p8 = pmov %p4208_p2 }
 0x12c   : > { %3616 = vsyncadd (%p4211_p5), [#allocation8], 4294967264 }
 0x12d   : > { %3618 = dma.done.wait (%p4212_p8), [#allocation11], 2064   ;;  %p4213_p9 = pmov %p4208_p2 }
 0x12e   : > { %p4214_p10 = pmov %p4208_p2 }
 0x12f   : > { %3620 = vsyncadd (%p4213_p9), [#allocation11], 4294965232 }
 0x130   : > { %3622 = dma.done.wait (%p4214_p10), [#allocation14], 2064   ;;  %p4215_p11 = pmov %p4208_p2 }
 0x131   : > { %p4216_p12 = pmov %p4208_p2 }
 0x132   : > { %3624 = vsyncadd (%p4215_p11), [#allocation14], 4294965232 }
 0x133   : > { %3626 = dma.done.wait (%p4216_p12), [#allocation17], 32   ;;  %p4217_p13 = pmov %p4208_p2 }
 0x134   : > { %p4218_p0 = pmov %p4208_p2 }
 0x135   : > { %3628 = vsyncadd (%p4217_p13), [#allocation17], 4294967264 }
 0x136   : > { %3630 = dma.done.wait (%p4218_p0), [#allocation20], 16   ;;  %p4219_p1 = pmov %p4218_p0 }
 0x137   : > { %v3653_v0 = vmov 0.0   ;;  %v597_v1 = vld [vmem:[#allocation2 + $0x8] sm:$0xff]  ;;  %v596_v3 = vld [vmem:[#allocation2] sm:$0xff]  ;;  %v599_v12 = vld [vmem:[#allocation2 + $0x18] sm:$0xff]  ;;  %p587_p4 = scmp.lt.s32.totalorder %s3732_s28, 1  ;;  %vm3654_vm0 = vmmov 0  }
 0x138   : > { %3632 = vsyncadd (%p4219_p1), [#allocation20], 4294967280  ;;  %916 = vmatprep.mubr.f32.mxu0 %v3653_v0  ;;  %987 = vmatprep.mubr.f32.mxu1 %v3653_v0  ;;  %v609_v2 = vld [vmem:[#allocation2 + $0x68] sm:$0xff]  ;;  %v608_v5 = vld [vmem:[#allocation2 + $0x60] sm:$0xff]  ;;  %vm1349_vm1 = vcmask 64512  }
 0x139   : > { %v2804_v4 = vpack.c.bf16 %v609_v2, %v597_v1  ;;  %v621_v6 = vld [vmem:[#allocation2 + $0xc8] sm:$0xff]  ;;  %v2806_v8 = vpack.c.bf16 %v608_v5, %v596_v3  ;;  %v620_v10 = vld [vmem:[#allocation2 + $0xc0] sm:$0xff]  ;;  %v611_v13 = vld [vmem:[#allocation2 + $0x78] sm:$0xff]  ;;  %s4222_s28 = smov (!%p587_p4, %s3732_s28), 1 }
 0x13a   : > { %v633_v7 = vld [vmem:[#allocation2 + $0x128] sm:$0xff]  ;;  %v632_v11 = vld [vmem:[#allocation2 + $0x120] sm:$0xff]  ;;  %v2836_v17 = vpack.c.bf16 %v611_v13, %v599_v12  ;;  %v598_v18 = vld [vmem:[#allocation2 + $0x10] sm:$0xff]  ;;  %s2559_s29 = sshll.u32 %s4222_s28, 3 }
 0x13b   : > { %v2808_v9 = vpack.c.bf16 %v633_v7, %v621_v6  ;;  %2805 = vmatprep.subr.bf16.mxu0 %v2804_v4  ;;  %v645_v14 = vld [vmem:[#allocation2 + $0x188] sm:$0xff]  ;;  %v2810_v16 = vpack.c.bf16 %v632_v11, %v620_v10  ;;  %v610_v19 = vld [vmem:[#allocation2 + $0x70] sm:$0xff]  ;;  %v644_v20 = vld [vmem:[#allocation2 + $0x180] sm:$0xff]  ;;  %s4070_s18 = scalar_lea.vmem %s4182_s0, %s2559_s29  ;;  %s594_s24 = scalar_lea.vmem %s4195_s13, %s2559_s29 }
 0x13c   : > { %v657_v15 = vld [vmem:[#allocation2 + $0x1e8] sm:$0xff]  ;;  %2807 = vmatpush1.bf16.msra.mxu0 %v2806_v8  ;;  %v2838_v22 = vpack.c.bf16 %v610_v19, %v598_v18  ;;  %v656_v23 = vld [vmem:[#allocation2 + $0x1e0] sm:$0xff]  ;;  %v623_v24 = vld [vmem:[#allocation2 + $0xd8] sm:$0xff]  ;;  %2837 = vmatprep.subr.bf16.mxu1 %v2836_v17 }
 0x13d   : > { %2809 = vmatprep.subr.bf16.mxu0 %v2808_v9  ;;  %v2812_v21 = vpack.c.bf16 %v657_v15, %v645_v14  ;;  %v635_v25 = vld [vmem:[#allocation2 + $0x138] sm:$0xff]  ;;  %v669_v27 = vld [vmem:[#allocation2 + $0x248] sm:$0xff]  ;;  %v622_v29 = vld [vmem:[#allocation2 + $0xd0] sm:$0xff]  ;;  %v2814_v31 = vpack.c.bf16 %v656_v23, %v644_v20 }
 0x13e   : > { %v2840_v26 = vpack.c.bf16 %v635_v25, %v623_v24  ;;  %v681_v28 = vld [vmem:[#allocation2 + $0x2a8] sm:$0xff]  ;;  %2839 = vmatpush1.bf16.msra.mxu1 %v2838_v22  ;;  %v634_v30 = vld [vmem:[#allocation2 + $0x130] sm:$0xff]  ;;  %v668_v33 = vld [vmem:[#allocation2 + $0x240] sm:$0xff] }
 0x13f   : > { %v2842_v32 = vpack.c.bf16 %v634_v30, %v622_v29  ;;  %v647_v34 = vld [vmem:[#allocation2 + $0x198] sm:$0xff]  ;;  %v2816_v36 = vpack.c.bf16 %v681_v28, %v669_v27  ;;  %v680_v37 = vld [vmem:[#allocation2 + $0x2a0] sm:$0xff]  ;;  %v646_v39 = vld [vmem:[#allocation2 + $0x190] sm:$0xff] }
 0x140   : > { %2811 = vmatpush1.bf16.msra.mxu0 %v2810_v16  ;;  %2841 = vmatprep.subr.bf16.mxu1 %v2840_v26  ;;  %v659_v35 = vld [vmem:[#allocation2 + $0x1f8] sm:$0xff]  ;;  %v658_v40 = vld [vmem:[#allocation2 + $0x1f0] sm:$0xff]  ;;  %v693_v41 = vld [vmem:[#allocation2 + $0x308] sm:$0xff]  ;;  %v2818_v46 = vpack.c.bf16 %v680_v37, %v668_v33 }
 0x141   : > { %2813 = vmatprep.subr.bf16.mxu0 %v2812_v21  ;;  %v2844_v38 = vpack.c.bf16 %v659_v35, %v647_v34  ;;  %v705_v42 = vld [vmem:[#allocation2 + $0x368] sm:$0xff]  ;;  %v671_v43 = vld [vmem:[#allocation2 + $0x258] sm:$0xff]  ;;  %v2846_v44 = vpack.c.bf16 %v658_v40, %v646_v39  ;;  %v692_v47 = vld [vmem:[#allocation2 + $0x300] sm:$0xff] }
 0x142   : > { %2843 = vmatpush1.bf16.msra.mxu1 %v2842_v32  ;;  %v683_v45 = vld [vmem:[#allocation2 + $0x2b8] sm:$0xff]  ;;  %v670_v49 = vld [vmem:[#allocation2 + $0x250] sm:$0xff]  ;;  %v2820_v51 = vpack.c.bf16 %v705_v42, %v693_v41  ;;  %v704_v52 = vld [vmem:[#allocation2 + $0x360] sm:$0xff] }
 0x143   : > { %2845 = vmatprep.subr.bf16.mxu1 %v2844_v38  ;;  %v2848_v48 = vpack.c.bf16 %v683_v45, %v671_v43  ;;  %v682_v50 = vld [vmem:[#allocation2 + $0x2b0] sm:$0xff]  ;;  %v695_v53 = vld [vmem:[#allocation2 + $0x318] sm:$0xff]  ;;  %v717_v55 = vld [vmem:[#allocation2 + $0x3c8] sm:$0xff]  ;;  %v2822_v58 = vpack.c.bf16 %v704_v52, %v692_v47 }
 0x144   : > { %2815 = vmatpush1.bf16.msra.mxu0 %v2814_v31  ;;  %v707_v54 = vld [vmem:[#allocation2 + $0x378] sm:$0xff]  ;;  %v729_v56 = vld [vmem:[#allocation2 + $0x428] sm:$0xff]  ;;  %v2850_v57 = vpack.c.bf16 %v682_v50, %v670_v49  ;;  %v716_v59 = vld [vmem:[#allocation2 + $0x3c0] sm:$0xff] }
 0x145   : > { %2817 = vmatprep.subr.bf16.mxu0 %v2816_v36  ;;  %v2852_v60 = vpack.c.bf16 %v707_v54, %v695_v53  ;;  %v694_v61 = vld [vmem:[#allocation2 + $0x310] sm:$0xff]  ;;  %v2824_v63 = vpack.c.bf16 %v729_v56, %v717_v55  ;;  %v728_v1 = vld [vmem:[#allocation2 + $0x420] sm:$0xff]  ;;  %v719_v2 = vld [vmem:[#allocation2 + $0x3d8] sm:$0xff] }
 0x146   : > { %2847 = vmatpush1.bf16.msra.mxu1 %v2846_v44  ;;  %v706_v62 = vld [vmem:[#allocation2 + $0x370] sm:$0xff]  ;;  %v731_v3 = vld [vmem:[#allocation2 + $0x438] sm:$0xff]  ;;  %v741_v4 = vld [vmem:[#allocation2 + $0x488] sm:$0xff]  ;;  %v2826_v7 = vpack.c.bf16 %v728_v1, %v716_v59 }
 0x147   : > { %2849 = vmatprep.subr.bf16.mxu1 %v2848_v48  ;;  %v753_v5 = vld [vmem:[#allocation2 + $0x4e8] sm:$0xff]  ;;  %v2854_v6 = vpack.c.bf16 %v706_v62, %v694_v61  ;;  %v740_v8 = vld [vmem:[#allocation2 + $0x480] sm:$0xff]  ;;  %v2856_v9 = vpack.c.bf16 %v731_v3, %v719_v2  ;;  %v718_v10 = vld [vmem:[#allocation2 + $0x3d0] sm:$0xff] }
 0x148   : > { %2819 = vmatpush1.bf16.msra.mxu0 %v2818_v46  ;;  %v730_v11 = vld [vmem:[#allocation2 + $0x430] sm:$0xff]  ;;  %v2828_v12 = vpack.c.bf16 %v753_v5, %v741_v4  ;;  %v752_v13 = vld [vmem:[#allocation2 + $0x4e0] sm:$0xff]  ;;  %v743_v14 = vld [vmem:[#allocation2 + $0x498] sm:$0xff] }
 0x149   : > { %2821 = vmatprep.subr.bf16.mxu0 %v2820_v51  ;;  %v755_v15 = vld [vmem:[#allocation2 + $0x4f8] sm:$0xff]  ;;  %v765_v16 = vld [vmem:[#allocation2 + $0x548] sm:$0xff]  ;;  %v2858_v18 = vpack.c.bf16 %v730_v11, %v718_v10  ;;  %v2830_v19 = vpack.c.bf16 %v752_v13, %v740_v8  ;;  %v764_v20 = vld [vmem:[#allocation2 + $0x540] sm:$0xff] }
 0x14a   : > { %2851 = vmatpush1.bf16.msra.mxu1 %v2850_v57  ;;  %v777_v17 = vld [vmem:[#allocation2 + $0x5a8] sm:$0xff]  ;;  %v2860_v21 = vpack.c.bf16 %v755_v15, %v743_v14  ;;  %v742_v22 = vld [vmem:[#allocation2 + $0x490] sm:$0xff]  ;;  %v776_v25 = vld [vmem:[#allocation2 + $0x5a0] sm:$0xff] }
 0x14b   : > { %2853 = vmatprep.subr.bf16.mxu1 %v2852_v60  ;;  %v754_v23 = vld [vmem:[#allocation2 + $0x4f0] sm:$0xff]  ;;  %v2832_v24 = vpack.c.bf16 %v777_v17, %v765_v16  ;;  %v767_v26 = vld [vmem:[#allocation2 + $0x558] sm:$0xff]  ;;  %v601_v28 = vld [vmem:[#allocation2 + $0x28] sm:$0xff]  ;;  %v2834_v31 = vpack.c.bf16 %v776_v25, %v764_v20 }
 0x14c   : > { %2823 = vmatpush1.bf16.msra.mxu0 %v2822_v58  ;;  %v779_v27 = vld [vmem:[#allocation2 + $0x5b8] sm:$0xff]  ;;  %v613_v29 = vld [vmem:[#allocation2 + $0x88] sm:$0xff]  ;;  %v2862_v30 = vpack.c.bf16 %v754_v23, %v742_v22  ;;  %v600_v32 = vld [vmem:[#allocation2 + $0x20] sm:$0xff] }
 0x14d   : > { %2825 = vmatprep.subr.bf16.mxu0 %v2824_v63  ;;  %v2864_v33 = vpack.c.bf16 %v779_v27, %v767_v26  ;;  %v766_v34 = vld [vmem:[#allocation2 + $0x550] sm:$0xff]  ;;  %v2868_v36 = vpack.c.bf16 %v613_v29, %v601_v28  ;;  %v612_v37 = vld [vmem:[#allocation2 + $0x80] sm:$0xff]  ;;  %v603_v38 = vld [vmem:[#allocation2 + $0x38] sm:$0xff] }
 0x14e   : > { %2855 = vmatpush1.bf16.msra.mxu1 %v2854_v6  ;;  %v778_v35 = vld [vmem:[#allocation2 + $0x5b0] sm:$0xff]  ;;  %v615_v39 = vld [vmem:[#allocation2 + $0x98] sm:$0xff]  ;;  %v625_v40 = vld [vmem:[#allocation2 + $0xe8] sm:$0xff]  ;;  %v2870_v44 = vpack.c.bf16 %v612_v37, %v600_v32 }
 0x14f   : > { %2857 = vmatprep.subr.bf16.mxu1 %v2856_v9  ;;  %v637_v41 = vld [vmem:[#allocation2 + $0x148] sm:$0xff]  ;;  %v4073_v42 = vld [vmem:[%s4070_s18] sm:$0xff]  ;;  %v2866_v43 = vpack.c.bf16 %v778_v35, %v766_v34  ;;  %v2900_v46 = vpack.c.bf16 %v615_v39, %v603_v38  ;;  %v602_v47 = vld [vmem:[#allocation2 + $0x30] sm:$0xff] }
 0x150   : > { %2827 = vmatpush1.bf16.msra.mxu0 %v2826_v7  ;;  %v624_v45 = vld [vmem:[#allocation2 + $0xe0] sm:$0xff]  ;;  %v614_v48 = vld [vmem:[#allocation2 + $0x90] sm:$0xff]  ;;  %v2872_v49 = vpack.c.bf16 %v637_v41, %v625_v40  ;;  %v627_v51 = vld [vmem:[#allocation2 + $0xf8] sm:$0xff] }
 0x151   : > { %2829 = vmatprep.subr.bf16.mxu0 %v2828_v12  ;;  %v636_v50 = vld [vmem:[#allocation2 + $0x140] sm:$0xff]  ;;  %v639_v52 = vld [vmem:[#allocation2 + $0x158] sm:$0xff]  ;;  %v649_v53 = vld [vmem:[#allocation2 + $0x1a8] sm:$0xff]  ;;  %v2902_v55 = vpack.c.bf16 %v614_v48, %v602_v47 }
 0x152   : > { %2859 = vmatpush1.bf16.msra.mxu1 %v2858_v18  ;;  %v661_v54 = vld [vmem:[#allocation2 + $0x208] sm:$0xff]  ;;  %v2874_v56 = vpack.c.bf16 %v636_v50, %v624_v45  ;;  %v648_v57 = vld [vmem:[#allocation2 + $0x1a0] sm:$0xff]  ;;  %v2904_v58 = vpack.c.bf16 %v639_v52, %v627_v51  ;;  %v626_v59 = vld [vmem:[#allocation2 + $0xf0] sm:$0xff] }
 0x153   : > { %2861 = vmatprep.subr.bf16.mxu1 %v2860_v21  ;;  %v638_v60 = vld [vmem:[#allocation2 + $0x150] sm:$0xff]  ;;  %v2876_v61 = vpack.c.bf16 %v661_v54, %v649_v53  ;;  %v660_v62 = vld [vmem:[#allocation2 + $0x200] sm:$0xff]  ;;  %v651_v63 = vld [vmem:[#allocation2 + $0x1b8] sm:$0xff] }
 0x154   : > { %2831 = vmatpush1.bf16.msra.mxu0 %v2830_v19  ;;  %v663_v1 = vld [vmem:[#allocation2 + $0x218] sm:$0xff]  ;;  %v673_v2 = vld [vmem:[#allocation2 + $0x268] sm:$0xff]  ;;  %v2906_v4 = vpack.c.bf16 %v638_v60, %v626_v59  ;;  %v2878_v5 = vpack.c.bf16 %v660_v62, %v648_v57  ;;  %v672_v6 = vld [vmem:[#allocation2 + $0x260] sm:$0xff] }
 0x155   : > { %2833 = vmatprep.subr.bf16.mxu0 %v2832_v24  ;;  %v685_v3 = vld [vmem:[#allocation2 + $0x2c8] sm:$0xff]  ;;  %v2908_v7 = vpack.c.bf16 %v663_v1, %v651_v63  ;;  %v650_v8 = vld [vmem:[#allocation2 + $0x1b0] sm:$0xff]  ;;  %v684_v11 = vld [vmem:[#allocation2 + $0x2c0] sm:$0xff] }
 0x156   : > { %2863 = vmatpush1.bf16.msra.mxu1 %v2862_v30  ;;  %v662_v9 = vld [vmem:[#allocation2 + $0x210] sm:$0xff]  ;;  %v2880_v10 = vpack.c.bf16 %v685_v3, %v673_v2  ;;  %v675_v12 = vld [vmem:[#allocation2 + $0x278] sm:$0xff]  ;;  %v697_v14 = vld [vmem:[#allocation2 + $0x328] sm:$0xff]  ;;  %v2882_v17 = vpack.c.bf16 %v684_v11, %v672_v6 }
 0x157   : > { %2865 = vmatprep.subr.bf16.mxu1 %v2864_v33  ;;  %v687_v13 = vld [vmem:[#allocation2 + $0x2d8] sm:$0xff]  ;;  %v709_v15 = vld [vmem:[#allocation2 + $0x388] sm:$0xff]  ;;  %v2910_v16 = vpack.c.bf16 %v662_v9, %v650_v8  ;;  %v696_v18 = vld [vmem:[#allocation2 + $0x320] sm:$0xff] }
 0x158   : > { %2835 = vmatpush1.bf16.msra.mxu0 %v2834_v31  ;;  %v2912_v19 = vpack.c.bf16 %v687_v13, %v675_v12  ;;  %v674_v20 = vld [vmem:[#allocation2 + $0x270] sm:$0xff]  ;;  %v2884_v22 = vpack.c.bf16 %v709_v15, %v697_v14  ;;  %v708_v23 = vld [vmem:[#allocation2 + $0x380] sm:$0xff]  ;;  %v699_v24 = vld [vmem:[#allocation2 + $0x338] sm:$0xff] }
 0x159   : > { %2869 = vmatprep.subr.bf16.mxu0 %v2868_v36  ;;  %v686_v21 = vld [vmem:[#allocation2 + $0x2d0] sm:$0xff]  ;;  %v711_v25 = vld [vmem:[#allocation2 + $0x398] sm:$0xff]  ;;  %v721_v26 = vld [vmem:[#allocation2 + $0x3e8] sm:$0xff]  ;;  %v2886_v29 = vpack.c.bf16 %v708_v23, %v696_v18 }
 0x15a   : > { %2867 = vmatpush1.bf16.msra.mxu1 %v2866_v43  ;;  %v733_v27 = vld [vmem:[#allocation2 + $0x448] sm:$0xff]  ;;  %v2914_v28 = vpack.c.bf16 %v686_v21, %v674_v20  ;;  %v720_v30 = vld [vmem:[#allocation2 + $0x3e0] sm:$0xff]  ;;  %v2916_v31 = vpack.c.bf16 %v711_v25, %v699_v24  ;;  %v698_v32 = vld [vmem:[#allocation2 + $0x330] sm:$0xff] }
 0x15b   : > { %917 = vmatmul.mubr.f32.vlgmr.msra.gmra.mrb[0].mxu0 %v4073_v42  ;;  %2901 = vmatprep.subr.bf16.mxu1 %v2900_v46  ;;  %v710_v33 = vld [vmem:[#allocation2 + $0x390] sm:$0xff]  ;;  %v2888_v34 = vpack.c.bf16 %v733_v27, %v721_v26  ;;  %v732_v35 = vld [vmem:[#allocation2 + $0x440] sm:$0xff]  ;;  %v723_v36 = vld [vmem:[#allocation2 + $0x3f8] sm:$0xff] }
 0x15c   : > { %2871 = vmatpush1.bf16.msra.mxu0 %v2870_v44  ;;  %1058 = vmatprep.mubr.f32.mxu0 %v3653_v0  ;;  %v735_v37 = vld [vmem:[#allocation2 + $0x458] sm:$0xff]  ;;  %v745_v38 = vld [vmem:[#allocation2 + $0x4a8] sm:$0xff]  ;;  %v2918_v40 = vpack.c.bf16 %v710_v33, %v698_v32  ;;  %v2890_v41 = vpack.c.bf16 %v732_v35, %v720_v30  ;;  %v744_v43 = vld [vmem:[#allocation2 + $0x4a0] sm:$0xff] }
 0x15d   : > { %2873 = vmatprep.subr.bf16.mxu0 %v2872_v49  ;;  %988 = vmatmul.mubr.f32.vlgmr.msra.gmra.mrb[0].mxu1 %v4073_v42  ;;  %v757_v39 = vld [vmem:[#allocation2 + $0x508] sm:$0xff]  ;;  %v2920_v44 = vpack.c.bf16 %v735_v37, %v723_v36  ;;  %v722_v45 = vld [vmem:[#allocation2 + $0x3f0] sm:$0xff]  ;;  %v756_v48 = vld [vmem:[#allocation2 + $0x500] sm:$0xff] }
 0x15e   : > { %2903 = vmatpush1.bf16.msra.mxu1 %v2902_v55  ;;  %1129 = vmatprep.mubr.f32.mxu1 %v3653_v0  ;;  %v734_v46 = vld [vmem:[#allocation2 + $0x450] sm:$0xff]  ;;  %v2892_v47 = vpack.c.bf16 %v757_v39, %v745_v38  ;;  %v747_v49 = vld [vmem:[#allocation2 + $0x4b8] sm:$0xff]  ;;  %v769_v51 = vld [vmem:[#allocation2 + $0x568] sm:$0xff]  ;;  %v2894_v54 = vpack.c.bf16 %v756_v48, %v744_v43 }
 0x15f   : > { %2905 = vmatprep.subr.bf16.mxu1 %v2904_v58  ;;  %v759_v50 = vld [vmem:[#allocation2 + $0x518] sm:$0xff]  ;;  %v781_v52 = vld [vmem:[#allocation2 + $0x5c8] sm:$0xff]  ;;  %v2922_v53 = vpack.c.bf16 %v734_v46, %v722_v45  ;;  %v768_v55 = vld [vmem:[#allocation2 + $0x560] sm:$0xff] }
 0x160   : > { %2875 = vmatpush1.bf16.msra.mxu0 %v2874_v56  ;;  %v2924_v56 = vpack.c.bf16 %v759_v50, %v747_v49  ;;  %v746_v57 = vld [vmem:[#allocation2 + $0x4b0] sm:$0xff]  ;;  %v2896_v59 = vpack.c.bf16 %v781_v52, %v769_v51  ;;  %v780_v60 = vld [vmem:[#allocation2 + $0x5c0] sm:$0xff]  ;;  %v783_v62 = vld [vmem:[#allocation2 + $0x5d8] sm:$0xff] }
 0x161   : > { %2877 = vmatprep.subr.bf16.mxu0 %v2876_v61  ;;  %v758_v58 = vld [vmem:[#allocation2 + $0x510] sm:$0xff]  ;;  %v771_v61 = vld [vmem:[#allocation2 + $0x578] sm:$0xff]  ;;  %v605_v63 = vld [vmem:[#allocation2 + $0x48] sm:$0xff]  ;;  %v2898_v3 = vpack.c.bf16 %v780_v60, %v768_v55 }
 0x162   : > { %2907 = vmatpush1.bf16.msra.mxu1 %v2906_v4  ;;  %v617_v1 = vld [vmem:[#allocation2 + $0xa8] sm:$0xff]  ;;  %v2926_v2 = vpack.c.bf16 %v758_v58, %v746_v57  ;;  %v2928_v4 = vpack.c.bf16 %v783_v62, %v771_v61  ;;  %v782_v6 = vld [vmem:[#allocation2 + $0x5d0] sm:$0xff]  ;;  %v604_v8 = vld [vmem:[#allocation2 + $0x40] sm:$0xff] }
 0x163   : > { %2909 = vmatprep.subr.bf16.mxu1 %v2908_v7  ;;  %v2932_v7 = vpack.c.bf16 %v617_v1, %v605_v63  ;;  %v616_v9 = vld [vmem:[#allocation2 + $0xa0] sm:$0xff]  ;;  %v629_v12 = vld [vmem:[#allocation2 + $0x108] sm:$0xff]  ;;  %v607_v55 = vld [vmem:[#allocation2 + $0x58] sm:$0xff] }
 0x164   : > { %2879 = vmatpush1.bf16.msra.mxu0 %v2878_v5  ;;  %v770_v5 = vld [vmem:[#allocation2 + $0x570] sm:$0xff]  ;;  %v2934_v11 = vpack.c.bf16 %v616_v9, %v604_v8  ;;  %v641_v13 = vld [vmem:[#allocation2 + $0x168] sm:$0xff]  ;;  %v628_v15 = vld [vmem:[#allocation2 + $0x100] sm:$0xff] }
 0x165   : > { %2881 = vmatprep.subr.bf16.mxu0 %v2880_v10  ;;  %v2930_v10 = vpack.c.bf16 %v782_v6, %v770_v5  ;;  %v2936_v14 = vpack.c.bf16 %v641_v13, %v629_v12  ;;  %v653_v18 = vld [vmem:[#allocation2 + $0x1c8] sm:$0xff]  ;;  %v652_v21 = vld [vmem:[#allocation2 + $0x1c0] sm:$0xff]  ;;  %v606_v57 = vld [vmem:[#allocation2 + $0x50] sm:$0xff] }
 0x166   : > { %2911 = vmatpush1.bf16.msra.mxu1 %v2910_v16  ;;  %v640_v16 = vld [vmem:[#allocation2 + $0x160] sm:$0xff]  ;;  %v677_v24 = vld [vmem:[#allocation2 + $0x288] sm:$0xff]  ;;  %v631_v60 = vld [vmem:[#allocation2 + $0x118] sm:$0xff] }
 0x167   : > { %2913 = vmatprep.subr.bf16.mxu1 %v2912_v19  ;;  %v665_v19 = vld [vmem:[#allocation2 + $0x228] sm:$0xff]  ;;  %v676_v27 = vld [vmem:[#allocation2 + $0x280] sm:$0xff]  ;;  %v643_v61 = vld [vmem:[#allocation2 + $0x178] sm:$0xff] }
 0x168   : > { %2883 = vmatpush1.bf16.msra.mxu0 %v2882_v17  ;;  %v2938_v17 = vpack.c.bf16 %v640_v16, %v628_v15  ;;  %v2940_v20 = vpack.c.bf16 %v665_v19, %v653_v18  ;;  %v689_v25 = vld [vmem:[#allocation2 + $0x2e8] sm:$0xff]  ;;  %v700_v32 = vld [vmem:[#allocation2 + $0x340] sm:$0xff]  ;;  %v2968_v63 = vpack.c.bf16 %v643_v61, %v631_v60  ;;  %v630_v1 = vld [vmem:[#allocation2 + $0x110] sm:$0xff] }
 0x169   : > { %2885 = vmatprep.subr.bf16.mxu0 %v2884_v22  ;;  %v664_v22 = vld [vmem:[#allocation2 + $0x220] sm:$0xff]  ;;  %v2944_v26 = vpack.c.bf16 %v689_v25, %v677_v24  ;;  %v725_v35 = vld [vmem:[#allocation2 + $0x408] sm:$0xff]  ;;  %v666_v8 = vld [vmem:[#allocation2 + $0x230] sm:$0xff] }
 0x16a   : > { %2915 = vmatpush1.bf16.msra.mxu1 %v2914_v28  ;;  %v2942_v23 = vpack.c.bf16 %v664_v22, %v652_v21  ;;  %v688_v28 = vld [vmem:[#allocation2 + $0x2e0] sm:$0xff]  ;;  %v737_v36 = vld [vmem:[#allocation2 + $0x468] sm:$0xff]  ;;  %v679_v9 = vld [vmem:[#allocation2 + $0x298] sm:$0xff] }
 0x16b   : > { %2917 = vmatprep.subr.bf16.mxu1 %v2916_v31  ;;  %v2946_v30 = vpack.c.bf16 %v688_v28, %v676_v27  ;;  %v713_v31 = vld [vmem:[#allocation2 + $0x3a8] sm:$0xff]  ;;  %v712_v33 = vld [vmem:[#allocation2 + $0x3a0] sm:$0xff]  ;;  %v2952_v38 = vpack.c.bf16 %v737_v36, %v725_v35  ;;  %v678_v13 = vld [vmem:[#allocation2 + $0x290] sm:$0xff] }
 0x16c   : > { %2887 = vmatpush1.bf16.msra.mxu0 %v2886_v29  ;;  %v701_v29 = vld [vmem:[#allocation2 + $0x348] sm:$0xff]  ;;  %v2950_v37 = vpack.c.bf16 %v712_v33, %v700_v32  ;;  %v724_v39 = vld [vmem:[#allocation2 + $0x400] sm:$0xff]  ;;  %v703_v15 = vld [vmem:[#allocation2 + $0x358] sm:$0xff] }
 0x16d   : > { %2889 = vmatprep.subr.bf16.mxu0 %v2888_v34  ;;  %v2948_v34 = vpack.c.bf16 %v713_v31, %v701_v29  ;;  %v761_v43 = vld [vmem:[#allocation2 + $0x528] sm:$0xff]  ;;  %v748_v46 = vld [vmem:[#allocation2 + $0x4c0] sm:$0xff]  ;;  %v715_v16 = vld [vmem:[#allocation2 + $0x3b8] sm:$0xff] }
 0x16e   : > { %2919 = vmatpush1.bf16.msra.mxu1 %v2918_v40  ;;  %v736_v40 = vld [vmem:[#allocation2 + $0x460] sm:$0xff]  ;;  %v773_v48 = vld [vmem:[#allocation2 + $0x588] sm:$0xff]  ;;  %v2980_v18 = vpack.c.bf16 %v715_v16, %v703_v15  ;;  %v702_v19 = vld [vmem:[#allocation2 + $0x350] sm:$0xff] }
 0x16f   : > { %2921 = vmatprep.subr.bf16.mxu1 %v2920_v44  ;;  %v2954_v44 = vpack.c.bf16 %v736_v40, %v724_v39  ;;  %v785_v49 = vld [vmem:[#allocation2 + $0x5e8] sm:$0xff]  ;;  %v772_v52 = vld [vmem:[#allocation2 + $0x580] sm:$0xff]  ;;  %v727_v21 = vld [vmem:[#allocation2 + $0x418] sm:$0xff] }
 0x170   : > { %2891 = vmatpush1.bf16.msra.mxu0 %v2890_v41  ;;  %v749_v41 = vld [vmem:[#allocation2 + $0x4c8] sm:$0xff]  ;;  %v2960_v51 = vpack.c.bf16 %v785_v49, %v773_v48  ;;  %v739_v22 = vld [vmem:[#allocation2 + $0x478] sm:$0xff]  ;;  %v726_v25 = vld [vmem:[#allocation2 + $0x410] sm:$0xff] }
 0x171   : > { %2893 = vmatprep.subr.bf16.mxu0 %v2892_v47  ;;  %v2956_v45 = vpack.c.bf16 %v761_v43, %v749_v41  ;;  %v760_v47 = vld [vmem:[#allocation2 + $0x520] sm:$0xff]  ;;  %v2984_v24 = vpack.c.bf16 %v739_v22, %v727_v21  ;;  %v751_v27 = vld [vmem:[#allocation2 + $0x4d8] sm:$0xff]  ;;  %v750_v31 = vld [vmem:[#allocation2 + $0x4d0] sm:$0xff] }
 0x172   : > { %2923 = vmatpush1.bf16.msra.mxu1 %v2922_v53  ;;  %v2958_v50 = vpack.c.bf16 %v760_v47, %v748_v46  ;;  %v784_v53 = vld [vmem:[#allocation2 + $0x5e0] sm:$0xff]  ;;  %v763_v28 = vld [vmem:[#allocation2 + $0x538] sm:$0xff]  ;;  %v762_v32 = vld [vmem:[#allocation2 + $0x530] sm:$0xff] }
 0x173   : > { %2925 = vmatprep.subr.bf16.mxu1 %v2924_v56  ;;  %v619_v56 = vld [vmem:[#allocation2 + $0xb8] sm:$0xff]  ;;  %v2990_v35 = vpack.c.bf16 %v762_v32, %v750_v31  ;;  %v788_v48 = vld [vmem:[#allocation4] sm:$0xff]  ;;  %v789_v16 = vld [vmem:[#allocation4 + $0x8] sm:$0xf] }
 0x174   : > { %2895 = vmatpush1.bf16.msra.mxu0 %v2894_v54  ;;  %v2962_v54 = vpack.c.bf16 %v784_v53, %v772_v52  ;;  %v2964_v58 = vpack.c.bf16 %v619_v56, %v607_v55  ;;  %v775_v33 = vld [vmem:[#allocation2 + $0x598] sm:$0xff] }
 0x175   : > { %2897 = vmatprep.subr.bf16.mxu0 %v2896_v59  ;;  %v618_v59 = vld [vmem:[#allocation2 + $0xb0] sm:$0xff] }
 0x176   : > { %2927 = vmatpush1.bf16.msra.mxu1 %v2926_v2  ;;  %v2966_v62 = vpack.c.bf16 %v618_v59, %v606_v57  ;;  %v642_v2 = vld [vmem:[#allocation2 + $0x170] sm:$0xff] }
 0x177   : > { %2929 = vmatprep.subr.bf16.mxu1 %v2928_v4  ;;  %v667_v4 = vld [vmem:[#allocation2 + $0x238] sm:$0xff]  ;;  %v2970_v5 = vpack.c.bf16 %v642_v2, %v630_v1 }
 0x178   : > { %2899 = vmatpush1.bf16.msra.mxu0 %v2898_v3  ;;  %v655_v3 = vld [vmem:[#allocation2 + $0x1d8] sm:$0xff] }
 0x179   : > { %2933 = vmatprep.subr.bf16.mxu0 %v2932_v7  ;;  %v2972_v6 = vpack.c.bf16 %v667_v4, %v655_v3  ;;  %v654_v7 = vld [vmem:[#allocation2 + $0x1d0] sm:$0xff] }
 0x17a   : > { %2931 = vmatpush1.bf16.msra.mxu1 %v2930_v10  ;;  %v691_v10 = vld [vmem:[#allocation2 + $0x2f8] sm:$0xff] }
 0x17b   : > { %1059 = vmatmul.mubr.f32.vlgmr.msra.gmra.mrb[2].mxu0 %v4073_v42  ;;  %2965 = vmatprep.subr.bf16.mxu1 %v2964_v58  ;;  %v2976_v12 = vpack.c.bf16 %v691_v10, %v679_v9 }
 0x17c   : > { %2935 = vmatpush1.bf16.msra.mxu0 %v2934_v11  ;;  %1200 = vmatprep.mubr.f32.mxu0 %v3653_v0  ;;  %v2974_v11 = vpack.c.bf16 %v666_v8, %v654_v7 }
 0x17d   : > { %1130 = vmatmul.mubr.f32.vlgmr.msra.gmra.mrb[2].mxu1 %v4073_v42  ;;  %2937 = vmatprep.subr.bf16.mxu0 %v2936_v14  ;;  %v690_v14 = vld [vmem:[#allocation2 + $0x2f0] sm:$0xff] }
 0x17e   : > { %1271 = vmatprep.mubr.f32.mxu1 %v3653_v0  ;;  %2967 = vmatpush1.bf16.msra.mxu1 %v2966_v62 }
 0x17f   : > { %2969 = vmatprep.subr.bf16.mxu1 %v2968_v63 }
 0x180   : > { %2939 = vmatpush1.bf16.msra.mxu0 %v2938_v17  ;;  %v2978_v17 = vpack.c.bf16 %v690_v14, %v678_v13 }
 0x181   : > { %2941 = vmatprep.subr.bf16.mxu0 %v2940_v20  ;;  %v714_v20 = vld [vmem:[#allocation2 + $0x3b0] sm:$0xff] }
 0x182   : > { %2971 = vmatpush1.bf16.msra.mxu1 %v2970_v5 }
 0x183   : > { %2973 = vmatprep.subr.bf16.mxu1 %v2972_v6 }
 0x184   : > { %2943 = vmatpush1.bf16.msra.mxu0 %v2942_v23  ;;  %v2982_v23 = vpack.c.bf16 %v714_v20, %v702_v19 }
 0x185   : > { %2945 = vmatprep.subr.bf16.mxu0 %v2944_v26  ;;  %v738_v26 = vld [vmem:[#allocation2 + $0x470] sm:$0xff] }
 0x186   : > { %2975 = vmatpush1.bf16.msra.mxu1 %v2974_v11  ;;  %v2986_v29 = vpack.c.bf16 %v738_v26, %v726_v25 }
 0x187   : > { %2977 = vmatprep.subr.bf16.mxu1 %v2976_v12 }
 0x188   : > { %2947 = vmatpush1.bf16.msra.mxu0 %v2946_v30  ;;  %v2988_v30 = vpack.c.bf16 %v763_v28, %v751_v27 }
 0x189   : > { %2949 = vmatprep.subr.bf16.mxu0 %v2948_v34  ;;  %v787_v34 = vld [vmem:[#allocation2 + $0x5f8] sm:$0xff] }
 0x18a   : > { %2979 = vmatpush1.bf16.msra.mxu1 %v2978_v17  ;;  %v2992_v36 = vpack.c.bf16 %v787_v34, %v775_v33 }
 0x18b   : > { %2981 = vmatprep.subr.bf16.mxu1 %v2980_v18 }
 0x18c   : > { %2951 = vmatpush1.bf16.msra.mxu0 %v2950_v37  ;;  %v774_v37 = vld [vmem:[#allocation2 + $0x590] sm:$0xff] }
 0x18d   : > { %2953 = vmatprep.subr.bf16.mxu0 %v2952_v38  ;;  %v786_v38 = vld [vmem:[#allocation2 + $0x5f0] sm:$0xff] }
 0x18e   : > { %2983 = vmatpush1.bf16.msra.mxu1 %v2982_v23  ;;  %v2994_v39 = vpack.c.bf16 %v786_v38, %v774_v37 }
 0x18f   : > { %2985 = vmatprep.subr.bf16.mxu1 %v2984_v24 }
 0x190   : > { %2955 = vmatpush1.bf16.msra.mxu0 %v2954_v44 }
 0x191   : > { %2957 = vmatprep.subr.bf16.mxu0 %v2956_v45  ;;  %v792_v45 = vlaneseq }
 0x192   : > { %2987 = vmatpush1.bf16.msra.mxu1 %v2986_v29 }
 0x193   : > { %2989 = vmatprep.subr.bf16.mxu1 %v2988_v30  ;;  %v4091_v46 = vshrl.u32 %v792_v45, 7 }
 0x194   : > { %2959 = vmatpush1.bf16.msra.mxu0 %v2958_v50 }
 0x195   : > { %2961 = vmatprep.subr.bf16.mxu0 %v2960_v51  ;;  %v794_v47 = vsub.s32 0, %v4091_v46  ;;  %v810_v49 = vsub.s32 4, %v4091_v46  ;;  %v798_v51 = vsub.s32 1, %v4091_v46  ;;  %v818_v53 = vsub.s32 6, %v4091_v46 }
 0x196   : > { %2991 = vmatpush1.bf16.msra.mxu1 %v2990_v35  ;;  %v802_v56 = vsub.s32 2, %v4091_v46  ;;  %v806_v3 = vsub.s32 3, %v4091_v46  ;;  %v822_v6 = vsub.s32 7, %v4091_v46 }
 0x197   : > { %2993 = vmatprep.subr.bf16.mxu1 %v2992_v36  ;;  %v795_v50 = vrot.slane %v788_v48, %v794_v47  ;;  %v811_v52 = vrot.slane %v788_v48, %v810_v49  ;;  %v799_v55 = vrot.slane %v788_v48, %v798_v51  ;;  %v819_v61 = vrot.slane %v788_v48, %v818_v53 }
 0x198   : > { %2963 = vmatpush1.bf16.msra.mxu0 %v2962_v54  ;;  %v803_v2 = vrot.slane %v788_v48, %v802_v56  ;;  %v807_v10 = vrot.slane %v788_v48, %v806_v3  ;;  %v823_v11 = vrot.slane %v788_v48, %v822_v6  ;;  %v827_v17 = vrot.slane %v789_v16, %v794_v47 }
 0x199   : > { %2694 = vmatprep.subr.mxu0 %v3653_v0  ;;  %v835_v49 = vrot.slane %v789_v16, %v802_v56 }
 0x19a   : > { %2995 = vmatpush1.bf16.msra.mxu1 %v2994_v39 }
 0x19b   : > { %1201 = vmatmul.mubr.f32.vlgmr.msra.gmra.mrb[4].mxu0 %v4073_v42  ;;  %2699 = vmatprep.subr.mxu1 %v3653_v0 }
 0x19c   : > { %2696 = vmatprep.mubr.msk.f32.mxu0 %vm3654_vm0, %v3653_v0 }
 0x19d   : > { %1272 = vmatmul.mubr.f32.vlgmr.msra.gmra.mrb[4].mxu1 %v4073_v42  ;;  %v814_v42 = vsub.s32 5, %v4091_v46 }
 0x19e   : > { %2701 = vmatprep.mubr.msk.f32.mxu1 %vm3654_vm0, %v3653_v0 }
 0x19f   : > { %v815_v59 = vrot.slane %v788_v48, %v814_v42 }
 0x22e   : > { %v918_v40 = vpop.f32.mrb[0].mxu0 }
 0x22f   : > { %v920_v41 = vpop.f32.mrb[1].mxu0  ;;  %v919_v54 = vadd.f32 %v918_v40, %v795_v50 }
 0x230   : > { %v989_v43 = vpop.f32.mrb[0].mxu1  ;;  %v921_v1 = vadd.f32 %v920_v41, %v799_v55 }
 0x231   : > { %v991_v44 = vpop.f32.mrb[1].mxu1  ;;  %v1278_v63 = vmul.f32 0.35355338, %v919_v54  ;;  %v990_v9 = vadd.f32 %v989_v43, %v803_v2  ;;  %v1900_v2 = vld [vmem:[#allocation6 + $0x8] sm:$0xff] }
 0x232   : > { %v1434_v8 = vmul.f32 0.35355338, %v921_v1  ;;  %v992_v13 = vadd.f32 %v991_v44, %v807_v10  ;;  %v831_v44 = vrot.slane %v789_v16, %v798_v51  ;;  %v839_v51 = vrot.slane %v789_v16, %v806_v3  ;;  %v1917_v3 = vld [vmem:[#allocation6 + $0x90] sm:$0xff]  ;;  %v1920_v10 = vld [vmem:[#allocation6 + $0xa8] sm:$0xff]  ;;  %v1931_v16 = vld [vmem:[#allocation6 + $0x100] sm:$0xff] }
 0x233   : > { %v1589_v12 = vmul.f32 0.35355338, %v990_v9  ;;  %v1919_v9 = vld [vmem:[#allocation6 + $0xa0] sm:$0xff] }
 0x234   : > { %v1744_v15 = vmul.f32 0.35355338, %v992_v13 }
 0x24e   : > { %v1060_v57 = vpop.f32.mrb[2].mxu0 }
 0x24f   : > { %v1061_v58 = vadd.f32 %v1060_v57, %v811_v52  ;;  %v1062_v60 = vpop.f32.mrb[3].mxu0 }
 0x250   : > { %v1131_v62 = vpop.f32.mrb[2].mxu1  ;;  %v1063_v5 = vadd.f32 %v1062_v60, %v815_v59 }
 0x251   : > { %2695 = vmatpush3.xpose.msra.mxu0 %v1061_v58  ;;  %v1133_v4 = vpop.f32.mrb[3].mxu1  ;;  %v1132_v7 = vadd.f32 %v1131_v62, %v819_v61  ;;  %v1915_v61 = vld [vmem:[#allocation6 + $0x80] sm:$0xff]  ;;  %v1916_v62 = vld [vmem:[#allocation6 + $0x88] sm:$0xff] }
 0x252   : > { %2704 = vmatprep.subr.mxu0 %v3653_v0  ;;  %v1134_v14 = vadd.f32 %v1133_v4, %v823_v11  ;;  %v2996_v1 = vpack.c.bf16 %v1916_v62, %v1915_v61  ;;  %v1918_v4 = vld [vmem:[#allocation6 + $0x98] sm:$0xff]  ;;  %v1947_v11 = vld [vmem:[#allocation6 + $0x180] sm:$0xff]  ;;  %v1956_v62 = vld [vmem:[#allocation6 + $0x1c8] sm:$0xff] }
 0x253   : > { %v3000_v6 = vpack.c.bf16 %v1918_v4, %v1917_v3  ;;  %v1939_v4 = vld [vmem:[#allocation6 + $0x140] sm:$0xff] }
 0x254   : > { %2697 = vmatmul.mubr.f32.vlgmr.msra.gmra.mrb[6].mxu0 %v1278_v63  ;;  %v1899_v63 = vld [vmem:[#allocation6] sm:$0xff] }
 0x255   : > { %2705 = vmatpush3.xpose.msra.mxu0 %v1063_v5  ;;  %2706 = vmatprep.mubr.msk.f32.mxu0 %vm3654_vm0, %v3653_v0  ;;  %v2998_v5 = vpack.c.bf16 %v1900_v2, %v1899_v63  ;;  %v1911_v63 = vld [vmem:[#allocation6 + $0x60] sm:$0xff] }
 0x256   : > { %2714 = vmatprep.subr.mxu0 %v3653_v0 }
 0x258   : > { %2707 = vmatmul.mubr.f32.vlgmr.msra.gmra.mrb[8].mxu0 %v1434_v8  ;;  %v1902_v8 = vld [vmem:[#allocation6 + $0x18] sm:$0xff] }
 0x259   : > { %2715 = vmatpush3.xpose.msra.mxu0 %v1132_v7  ;;  %2716 = vmatprep.mubr.msk.f32.mxu0 %vm3654_vm0, %v3653_v0  ;;  %v1901_v7 = vld [vmem:[#allocation6 + $0x10] sm:$0xff] }
 0x25a   : > { %2724 = vmatprep.subr.mxu0 %v3653_v0  ;;  %v3002_v13 = vpack.c.bf16 %v1902_v8, %v1901_v7  ;;  %v1929_v7 = vld [vmem:[#allocation6 + $0xf0] sm:$0xff]  ;;  %v1930_v8 = vld [vmem:[#allocation6 + $0xf8] sm:$0xff] }
 0x25c   : > { %2717 = vmatmul.mubr.f32.vlgmr.msra.gmra.mrb[10].mxu0 %v1589_v12  ;;  %v1948_v12 = vld [vmem:[#allocation6 + $0x188] sm:$0xff] }
 0x25d   : > { %2725 = vmatpush3.xpose.msra.mxu0 %v1134_v14  ;;  %2726 = vmatprep.mubr.msk.f32.mxu0 %vm3654_vm0, %v3653_v0  ;;  %v3028_v14 = vpack.c.bf16 %v1948_v12, %v1947_v11  ;;  %v1958_v11 = vld [vmem:[#allocation6 + $0x1d8] sm:$0xff]  ;;  %v1913_v12 = vld [vmem:[#allocation6 + $0x70] sm:$0xff] }
 0x25e   : > { %2997 = vmatprep.subr.bf16.mxu0 %v2996_v1  ;;  %v1912_v1 = vld [vmem:[#allocation6 + $0x68] sm:$0xff] }
 0x25f   : > { %v3022_v3 = vpack.c.bf16 %v1912_v1, %v1911_v63  ;;  %v2142_v63 = vld [vmem:[#allocation12 + $0x8] sm:$0xff]  ;;  %v2143_v1 = vld [vmem:[#allocation12 + $0x10] sm:$0xff] }
 0x260   : > { %2727 = vmatmul.mubr.f32.vlgmr.msra.gmra.mrb[12].mxu0 %v1744_v15  ;;  %v1903_v15 = vld [vmem:[#allocation6 + $0x20] sm:$0xff] }
 0x261   : > { %2999 = vmatpush3.bf16.msra.mxu0 %v2998_v5  ;;  %v1940_v5 = vld [vmem:[#allocation6 + $0x148] sm:$0xff] }
 0x262   : > { %3001 = vmatprep.subr.bf16.mxu0 %v3000_v6  ;;  %v3046_v6 = vpack.c.bf16 %v1940_v5, %v1939_v4 }
 0x265   : > { %3003 = vmatpush3.bf16.msra.mxu0 %v3002_v13  ;;  %v1914_v13 = vld [vmem:[#allocation6 + $0x78] sm:$0xff] }
 0x26e   : > { %v1202_v18 = vpop.f32.mrb[4].mxu0 }
 0x26f   : > { %v1203_v19 = vadd.f32 %v1202_v18, %v827_v17  ;;  %v1204_v20 = vpop.f32.mrb[5].mxu0  ;;  %v3004_v17 = vpack.c.bf16 %v1920_v10, %v1919_v9  ;;  %v1904_v18 = vld [vmem:[#allocation6 + $0x28] sm:$0xff]  ;;  %v1957_v9 = vld [vmem:[#allocation6 + $0x1d0] sm:$0xff]  ;;  %v3024_v10 = vpack.c.bf16 %v1930_v8, %v1929_v7 }
 0x270   : > { %v1273_v33 = vpop.f32.mrb[4].mxu1  ;;  %v1205_v52 = vadd.f32 %v1204_v20, %v831_v44  ;;  %v1921_v20 = vld [vmem:[#allocation6 + $0xb0] sm:$0xff]  ;;  %v1907_v44 = vld [vmem:[#allocation6 + $0x40] sm:$0xff] }
 0x271   : > { %2700 = vmatpush3.msra.mxu1 %v1203_v19  ;;  %v1275_v34 = vpop.f32.mrb[5].mxu1  ;;  %v1274_v54 = vadd.f32 %v1273_v33, %v835_v49  ;;  %v1932_v19 = vld [vmem:[#allocation6 + $0x108] sm:$0xff]  ;;  %3005 = vmatprep.subr.bf16.mxu0 %v3004_v17  ;;  %v1906_v33 = vld [vmem:[#allocation6 + $0x38] sm:$0xff] }
 0x272   : > { %2709 = vmatprep.subr.mxu1 %v3653_v0  ;;  %v1276_v57 = vadd.f32 %v1275_v34, %v839_v51  ;;  %v1923_v34 = vld [vmem:[#allocation6 + $0xc0] sm:$0xff]  ;;  %v1942_v17 = vld [vmem:[#allocation6 + $0x158] sm:$0xff] }
 0x327   : > { %v1345_v21 = vpop.f32.mrb[6].mxu0 }
 0x328   : > { %v2698_v22 = vpop.f32.mrb[7].mxu0  ;;  %v1350_v23 = vsel %vm1349_vm1, %v1345_v21, -inf }
 0x329   : > { %1351 = vmax.xlane.f32.xlu0 %v1350_v23  ;;  %v1922_v22 = vld [vmem:[#allocation6 + $0xb8] sm:$0xff]  ;;  %v1949_v23 = vld [vmem:[#allocation6 + $0x190] sm:$0xff] }
 0x32b   : > { %v1501_v24 = vpop.f32.mrb[8].mxu0 }
 0x32c   : > { %v2708_v25 = vpop.f32.mrb[9].mxu0  ;;  %v1505_v26 = vsel %vm1349_vm1, %v1501_v24, -inf }
 0x32d   : > { %1506 = vmax.xlane.f32.xlu0 %v1505_v26  ;;  %v1933_v26 = vld [vmem:[#allocation6 + $0x110] sm:$0xff] }
 0x32f   : > { %v1656_v27 = vpop.f32.mrb[10].mxu0 }
 0x330   : > { %v2718_v28 = vpop.f32.mrb[11].mxu0  ;;  %v1660_v29 = vsel %vm1349_vm1, %v1656_v27, -inf }
 0x331   : > { %1661 = vmax.xlane.f32.xlu1 %v1660_v29  ;;  %v3006_v28 = vpack.c.bf16 %v1904_v18, %v1903_v15  ;;  %v1905_v29 = vld [vmem:[#allocation6 + $0x30] sm:$0xff]  ;;  %v3026_v15 = vpack.c.bf16 %v1914_v13, %v1913_v12  ;;  %v2148_v13 = vld [vmem:[#allocation12 + $0x38] sm:$0xff] }
 0x332   : > { %v2147_v12 = vld [vmem:[#allocation12 + $0x30] sm:$0xff] }
 0x333   : > { %v1811_v30 = vpop.f32.mrb[12].mxu0  ;;  %3007 = vmatpush3.bf16.msra.mxu0 %v3006_v28  ;;  %v1945_v28 = vld [vmem:[#allocation6 + $0x170] sm:$0xff] }
 0x334   : > { %v2728_v31 = vpop.f32.mrb[13].mxu0  ;;  %v1815_v32 = vsel %vm1349_vm1, %v1811_v30, -inf }
 0x335   : > { %1816 = vmax.xlane.f32.xlu1 %v1815_v32  ;;  %v1951_v31 = vld [vmem:[#allocation6 + $0x1a0] sm:$0xff]  ;;  %v3008_v32 = vpack.c.bf16 %v1922_v22, %v1921_v20  ;;  %v1960_v20 = vld [vmem:[#allocation6 + $0x1e8] sm:$0xff] }
 0x336   : > { %v1943_v22 = vld [vmem:[#allocation6 + $0x160] sm:$0xff] }
 0x337   : > { %3009 = vmatprep.subr.bf16.mxu0 %v3008_v32 }
 0x3b6   : > { %v1352_v35 = vpop.xlane.xlu0 %1351 }
 0x3b7   : > { %v1353_v36 = vsub.f32 %v1345_v21, %v1352_v35  ;;  %v3030_v21 = vpack.c.bf16 %v1932_v19, %v1931_v16  ;;  %v1952_v35 = vld [vmem:[#allocation6 + $0x1a8] sm:$0xff]  ;;  %v1941_v16 = vld [vmem:[#allocation6 + $0x150] sm:$0xff]  ;;  %v1959_v19 = vld [vmem:[#allocation6 + $0x1e0] sm:$0xff] }
 0x3b8   : > { %v3050_v18 = vpack.c.bf16 %v1942_v17, %v1941_v16  ;;  %v2150_v16 = vld [vmem:[#allocation12 + $0x48] sm:$0xff]  ;;  %v2151_v17 = vld [vmem:[#allocation12 + $0x50] sm:$0xff] }
 0x3b9   : > { %v1354_v37 = vmul.f32 1.442695, %v1353_v36  ;;  %v1924_v36 = vld [vmem:[#allocation6 + $0xc8] sm:$0xff] }
 0x3ba   : > { %v1507_v38 = vpop.xlane.xlu0 %1506 }
 0x3bb   : > { %3244 = vpow2.f32 %v1354_v37  ;;  %v1508_v39 = vsub.f32 %v1501_v24, %v1507_v38  ;;  %v1950_v24 = vld [vmem:[#allocation6 + $0x198] sm:$0xff]  ;;  %v3036_v37 = vpack.c.bf16 %v1952_v35, %v1951_v31  ;;  %v1935_v38 = vld [vmem:[#allocation6 + $0x120] sm:$0xff] }
 0x3bc   : > { %v3032_v25 = vpack.c.bf16 %v1950_v24, %v1949_v23  ;;  %v1944_v23 = vld [vmem:[#allocation6 + $0x168] sm:$0xff] }
 0x3bd   : > { %v1509_v40 = vmul.f32 1.442695, %v1508_v39  ;;  %v1936_v39 = vld [vmem:[#allocation6 + $0x128] sm:$0xff]  ;;  %v3054_v24 = vpack.c.bf16 %v1944_v23, %v1943_v22 }
 0x3be   : > { %v1662_v41 = vpop.xlane.xlu1 %1661  ;;  %v2154_v22 = vld [vmem:[#allocation12 + $0x68] sm:$0xff] }
 0x3bf   : > { %3246 = vpow2.f32 %v1509_v40  ;;  %v1663_v43 = vsub.f32 %v1656_v27, %v1662_v41  ;;  %v1934_v27 = vld [vmem:[#allocation6 + $0x118] sm:$0xff]  ;;  %v1953_v40 = vld [vmem:[#allocation6 + $0x1b0] sm:$0xff] }
 0x3c0   : > { %v1954_v41 = vld [vmem:[#allocation6 + $0x1b8] sm:$0xff] }
 0x3c1   : > { %v1664_v45 = vmul.f32 1.442695, %v1663_v43  ;;  %v3010_v43 = vpack.c.bf16 %v1906_v33, %v1905_v29  ;;  %v3040_v49 = vpack.c.bf16 %v1954_v41, %v1953_v40  ;;  %v1946_v29 = vld [vmem:[#allocation6 + $0x178] sm:$0xff] }
 0x3c2   : > { %v1817_v47 = vpop.xlane.xlu1 %1816 }
 0x3c3   : > { %3248 = vpow2.f32 %v1664_v45  ;;  %v1818_v48 = vsub.f32 %v1811_v30, %v1817_v47  ;;  %v3034_v30 = vpack.c.bf16 %v1934_v27, %v1933_v26  ;;  %v3038_v45 = vpack.c.bf16 %v1936_v39, %v1935_v38  ;;  %3011 = vmatpush3.bf16.msra.mxu0 %v3010_v43  ;;  %v1962_v26 = vld [vmem:[#allocation6 + $0x1f8] sm:$0xff] }
 0x3c4   : > { %v3012_v47 = vpack.c.bf16 %v1924_v36, %v1923_v34 }
 0x3c5   : > { %v3245_v50 = vpop.eup %3244  ;;  %v1819_v42 = vmul.f32 1.442695, %v1818_v48  ;;  %v1908_v48 = vld [vmem:[#allocation6 + $0x48] sm:$0xff] }
 0x3c6   : > { %2702 = vmatmul.mubr.msk.f32.vlgmr.msra.gmra.mrb[6].mxu1 %vm1349_vm1, %v3245_v50  ;;  %v1356_v53 = vsel %vm1349_vm1, %v3245_v50, 0.0  ;;  %v1937_v50 = vld [vmem:[#allocation6 + $0x130] sm:$0xff]  ;;  %3013 = vmatprep.subr.bf16.mxu0 %v3012_v47 }
 0x3c7   : > { %3250 = vpow2.f32 %v1819_v42  ;;  %2710 = vmatpush3.msra.mxu1 %v1205_v52  ;;  %1357 = vadd.xlane.f32.xlu1 %v1356_v53  ;;  %v1938_v52 = vld [vmem:[#allocation6 + $0x138] sm:$0xff]  ;;  %v1925_v42 = vld [vmem:[#allocation6 + $0xd0] sm:$0xff] }
 0x3c8   : > { %2711 = vmatprep.mubr.msk.f32.mxu1 %vm3654_vm0, %v3653_v0  ;;  %2719 = vmatprep.subr.mxu1 %v3653_v0  ;;  %v1926_v53 = vld [vmem:[#allocation6 + $0xd8] sm:$0xff]  ;;  %v3042_v51 = vpack.c.bf16 %v1938_v52, %v1937_v50 }
 0x3c9   : > { %v3247_v55 = vpop.eup %3246 }
 0x3ca   : > { %2712 = vmatmul.mubr.msk.f32.vlgmr.msra.gmra.mrb[8].mxu1 %vm1349_vm1, %v3247_v55  ;;  %v1511_v56 = vsel %vm1349_vm1, %v3247_v55, 0.0  ;;  %v3016_v55 = vpack.c.bf16 %v1926_v53, %v1925_v42 }
 0x3cb   : > { %2720 = vmatpush3.msra.mxu1 %v1274_v54  ;;  %1512 = vadd.xlane.f32.xlu0 %v1511_v56  ;;  %v3014_v54 = vpack.c.bf16 %v1908_v48, %v1907_v44  ;;  %v1909_v56 = vld [vmem:[#allocation6 + $0x50] sm:$0xff] }
 0x3cc   : > { %2721 = vmatprep.mubr.msk.f32.mxu1 %vm3654_vm0, %v3653_v0  ;;  %2729 = vmatprep.subr.mxu1 %v3653_v0 }
 0x3cd   : > { %v3249_v46 = vpop.eup %3248  ;;  %3015 = vmatpush3.bf16.msra.mxu0 %v3014_v54 }
 0x3ce   : > { %2722 = vmatmul.mubr.msk.f32.vlgmr.msra.gmra.mrb[10].mxu1 %vm1349_vm1, %v3249_v46  ;;  %v1666_v58 = vsel %vm1349_vm1, %v3249_v46, 0.0  ;;  %3017 = vmatprep.subr.bf16.mxu0 %v3016_v55  ;;  %v2565_v55 = vld [vmem:[#allocation7] ss:$0 sm:$0xff] }
 0x3cf   : > { %2730 = vmatpush3.msra.mxu1 %v1276_v57  ;;  %1667 = vadd.xlane.f32.xlu1 %v1666_v58  ;;  %v1910_v57 = vld [vmem:[#allocation6 + $0x58] sm:$0xff]  ;;  %v1927_v58 = vld [vmem:[#allocation6 + $0xe0] sm:$0xff] }
 0x3d0   : > { %2731 = vmatprep.mubr.msk.f32.mxu1 %vm3654_vm0, %v3653_v0  ;;  %3029 = vmatprep.subr.bf16.mxu1 %v3028_v14  ;;  %v3018_v46 = vpack.c.bf16 %v1910_v57, %v1909_v56  ;;  %v3048_v14 = vpack.c.bf16 %v1958_v11, %v1957_v9  ;;  %v2145_v9 = vld [vmem:[#allocation12 + $0x20] sm:$0xff] }
 0x3d1   : > { %v3251_v59 = vpop.eup %3250 }
 0x3d2   : > { %2732 = vmatmul.mubr.msk.f32.vlgmr.msra.gmra.mrb[12].mxu1 %vm1349_vm1, %v3251_v59  ;;  %v1821_v60 = vsel %vm1349_vm1, %v3251_v59, 0.0  ;;  %3019 = vmatpush3.bf16.msra.mxu0 %v3018_v46  ;;  %v1928_v59 = vld [vmem:[#allocation6 + $0xe8] sm:$0xff] }
 0x3d3   : > { %1822 = vadd.xlane.f32.xlu0 %v1821_v60  ;;  %3031 = vmatpush3.bf16.msra.mxu1 %v3030_v21  ;;  %v1955_v60 = vld [vmem:[#allocation6 + $0x1c0] sm:$0xff]  ;;  %v3020_v61 = vpack.c.bf16 %v1928_v59, %v1927_v58  ;;  %v3052_v21 = vpack.c.bf16 %v1960_v20, %v1959_v19 }
 0x3d4   : > { %3033 = vmatprep.subr.bf16.mxu1 %v3032_v25  ;;  %v3044_v2 = vpack.c.bf16 %v1956_v62, %v1955_v60  ;;  %v1961_v25 = vld [vmem:[#allocation6 + $0x1f0] sm:$0xff]  ;;  %v2141_v62 = vld [vmem:[#allocation12] sm:$0xff]  ;;  %v2152_v19 = vld [vmem:[#allocation12 + $0x58] sm:$0xff] }
 0x3d5   : > { %3021 = vmatprep.subr.bf16.mxu0 %v3020_v61  ;;  %v3056_v27 = vpack.c.bf16 %v1962_v26, %v1961_v25  ;;  %v3264_v60 = vld [vmem:[%s4070_s18] sm:$0xff]  ;;  %v3076_v20 = vpack.c.bf16 %v2152_v19, %v2151_v17  ;;  %v2156_v25 = vld [vmem:[#allocation12 + $0x78] sm:$0xff] }
 0x3d6   : > { %3023 = vmatpush3.bf16.msra.mxu0 %v3022_v3  ;;  %v3061_v3 = vpack.c.bf16 %v2142_v63, %v2141_v62  ;;  %v2568_v63 = vld [vmem:[#allocation13] ss:$0 sm:$0xff] }
 0x3d7   : > { %3035 = vmatpush3.bf16.msra.mxu1 %v3034_v30  ;;  %3025 = vmatprep.subr.bf16.mxu0 %v3024_v10  ;;  %v3058_v30 = vpack.c.bf16 %v1946_v29, %v1945_v28  ;;  %v2146_v10 = vld [vmem:[#allocation12 + $0x28] sm:$0xff]  ;;  %v2237_v29 = vld [vmem:[#allocation15 + $0x10] sm:$0xff] }
 0x3d8   : > { %3037 = vmatprep.subr.bf16.mxu1 %v3036_v37  ;;  %v3067_v11 = vpack.c.bf16 %v2146_v10, %v2145_v9  ;;  %v2236_v28 = vld [vmem:[#allocation15 + $0x8] sm:$0xff] }
 0x3da   : > { %3027 = vmatpush3.bf16.msra.mxu0 %v3026_v15  ;;  %v2149_v15 = vld [vmem:[#allocation12 + $0x40] sm:$0xff] }
 0x3db   : > { %3039 = vmatpush3.bf16.msra.mxu1 %v3038_v45 }
 0x3dc   : > { %3041 = vmatprep.subr.bf16.mxu1 %v3040_v49 }
 0x3df   : > { %3043 = vmatpush3.bf16.msra.mxu1 %v3042_v51 }
 0x3e0   : > { %3045 = vmatprep.subr.bf16.mxu1 %v3044_v2  ;;  %v3655_v2 = vmov 0.0|0.0  }
 0x3e1   : > { %3060 = vmatprep.subr.bf16.mxu0 %v3655_v2 }
 0x3e3   : > { %3047 = vmatpush3.bf16.msra.mxu1 %v3046_v6 }
 0x3e4   : > { %3049 = vmatprep.subr.bf16.mxu1 %v3048_v14  ;;  %v3070_v14 = vpack.c.bf16 %v2148_v13, %v2147_v12 }
 0x3e7   : > { %3051 = vmatpush3.bf16.msra.mxu1 %v3050_v18  ;;  %v3073_v18 = vpack.c.bf16 %v2150_v16, %v2149_v15 }
 0x3e8   : > { %3053 = vmatprep.subr.bf16.mxu1 %v3052_v21  ;;  %v2153_v21 = vld [vmem:[#allocation12 + $0x60] sm:$0xff] }
 0x3e9   : > { %v3079_v23 = vpack.c.bf16 %v2154_v22, %v2153_v21  ;;  %v2571_v22 = vld [vmem:[#allocation19] ss:$0 sm:$0xff] }
 0x3eb   : > { %3055 = vmatpush3.bf16.msra.mxu1 %v3054_v24  ;;  %v2155_v24 = vld [vmem:[#allocation12 + $0x70] sm:$0xff] }
 0x3ec   : > { %3057 = vmatprep.subr.bf16.mxu1 %v3056_v27  ;;  %v3082_v26 = vpack.c.bf16 %v2156_v25, %v2155_v24  ;;  %v2235_v27 = vld [vmem:[#allocation15] sm:$0xff] }
 0x3ef   : > { %3059 = vmatpush3.bf16.msra.mxu1 %v3058_v30  ;;  %v3085_v30 = vpack.c.bf16 %v2236_v28, %v2235_v27 }
 0x3f0   : > { %3084 = vmatprep.subr.bf16.mxu1 %v3655_v2 }
 0x454   : > { %v1358_v32 = vpop.xlane.xlu1 %1357 }
 0x458   : > { %v1513_v31 = vpop.xlane.xlu0 %1512 }
 0x459   : > { %3252 = vrcp.f32 %v1513_v31  ;;  %v2238_v31 = vld [vmem:[#allocation15 + $0x18] sm:$0xff] }
 0x45a   : > { %3254 = vrcp.f32 %v1358_v32  ;;  %v3088_v32 = vpack.c.bf16 %v2238_v31, %v2237_v29 }
 0x45c   : > { %v1668_v34 = vpop.xlane.xlu1 %1667 }
 0x460   : > { %v1823_v33 = vpop.xlane.xlu0 %1822 }
 0x461   : > { %3256 = vrcp.f32 %v1823_v33  ;;  %v2239_v33 = vld [vmem:[#allocation15 + $0x20] sm:$0xff] }
 0x462   : > { %3258 = vrcp.f32 %v1668_v34  ;;  %v2240_v34 = vld [vmem:[#allocation15 + $0x28] sm:$0xff] }
 0x463   : > { %v3253_v37 = vpop.eup %3252 }
 0x464   : > { %v3255_v39 = vpop.eup %3254 }
 0x46b   : > { %v3257_v47 = vpop.eup %3256 }
 0x46c   : > { %v3259_v49 = vpop.eup %3258 }
 0x499   : > { %v1428_v35 = vpop.f32.mrb[6].mxu1 }
 0x49a   : > { %v2703_v36 = vpop.f32.mrb[7].mxu1  ;;  %v1433_v43 = vmul.f32 %v3255_v39, %v1428_v35  ;;  %v3091_v35 = vpack.c.bf16 %v2240_v34, %v2239_v33  ;;  %v2243_v39 = vld [vmem:[#allocation15 + $0x40] sm:$0xff] }
 0x49b   : > { %v2241_v36 = vld [vmem:[#allocation15 + $0x30] sm:$0xff] }
 0x49d   : > { %v1583_v38 = vpop.f32.mrb[8].mxu1 }
 0x49e   : > { %v1588_v40 = vmul.f32 %v3253_v37, %v1583_v38  ;;  %v2713_v41 = vpop.f32.mrb[9].mxu1  ;;  %v2242_v37 = vld [vmem:[#allocation15 + $0x38] sm:$0xff] }
 0x49f   : > { %v3094_v38 = vpack.c.bf16 %v2242_v37, %v2241_v36 }
 0x4a0   : > { %2034 = vmatprep.mubr.f32.mxu0 %v1588_v40  ;;  %v2244_v40 = vld [vmem:[#allocation15 + $0x48] sm:$0xff] }
 0x4a1   : > { %v1738_v44 = vpop.f32.mrb[10].mxu1  ;;  %2035 = vmatmul.mubr.f32.vlgmr.msra.gmra.mrb[14].mxu0 %v1433_v43  ;;  %v3097_v41 = vpack.c.bf16 %v2244_v40, %v2243_v39  ;;  %v2245_v43 = vld [vmem:[#allocation15 + $0x50] sm:$0xff] }
 0x4a2   : > { %v2723_v45 = vpop.f32.mrb[11].mxu1  ;;  %2766 = vmatprep.mubr.msk.f32.mxu0 %vm3654_vm0, %v3653_v0  ;;  %v1743_v42 = vmul.f32 %v3259_v49, %v1738_v44  ;;  %3062 = vmatpush3.bf16.msra.mxu0 %v3061_v3  ;;  %v2246_v44 = vld [vmem:[#allocation15 + $0x58] sm:$0xff] }
 0x4a3   : > { %3063 = vmatprep.subr.bf16.mxu0 %v3655_v2  ;;  %v3100_v45 = vpack.c.bf16 %v2246_v44, %v2245_v43 }
 0x4a5   : > { %v1893_v48 = vpop.f32.mrb[12].mxu1 }
 0x4a6   : > { %v1898_v50 = vmul.f32 %v3257_v47, %v1893_v48  ;;  %v2733_v52 = vpop.f32.mrb[13].mxu1  ;;  %v2247_v47 = vld [vmem:[#allocation15 + $0x60] sm:$0xff]  ;;  %v2248_v48 = vld [vmem:[#allocation15 + $0x68] sm:$0xff] }
 0x4a7   : > { %v3103_v49 = vpack.c.bf16 %v2248_v48, %v2247_v47 }
 0x4a8   : > { %2104 = vmatprep.mubr.f32.mxu1 %v1898_v50 }
 0x4a9   : > { %2105 = vmatmul.mubr.f32.vlgmr.msra.gmra.mrb[14].mxu1 %v1743_v42 }
 0x4aa   : > { %2801 = vmatprep.mubr.msk.f32.mxu1 %vm3654_vm0, %v3653_v0  ;;  %v2144_v0 = vld [vmem:[#allocation12 + $0x18] sm:$0xff]  ;;  %3086 = vmatpush3.bf16.msra.mxu1 %v3085_v30 }
 0x4ab   : > { %v3064_v4 = vpack.c.bf16 %v2144_v0, %v2143_v1  ;;  %3087 = vmatprep.subr.bf16.mxu1 %v3655_v2 }
 0x4ad   : > { %3065 = vmatpush3.bf16.msra.mxu0 %v3064_v4  ;;  %v2569_v4 = vld [vmem:[#allocation16] ss:$0 sm:$0xff] }
 0x4ae   : > { %3066 = vmatprep.subr.bf16.mxu0 %v3655_v2  ;;  %3089 = vmatpush3.bf16.msra.mxu1 %v3088_v32 }
 0x4af   : > { %3090 = vmatprep.subr.bf16.mxu1 %v3655_v2 }
 0x4b1   : > { %3068 = vmatpush3.bf16.msra.mxu0 %v3067_v11 }
 0x4b2   : > { %3069 = vmatprep.subr.bf16.mxu0 %v3655_v2  ;;  %3092 = vmatpush3.bf16.msra.mxu1 %v3091_v35 }
 0x4b3   : > { %3093 = vmatprep.subr.bf16.mxu1 %v3655_v2 }
 0x4b5   : > { %3071 = vmatpush3.bf16.msra.mxu0 %v3070_v14 }
 0x4b6   : > { %3072 = vmatprep.subr.bf16.mxu0 %v3655_v2  ;;  %3095 = vmatpush3.bf16.msra.mxu1 %v3094_v38 }
 0x4b7   : > { %3096 = vmatprep.subr.bf16.mxu1 %v3655_v2 }
 0x4b9   : > { %3074 = vmatpush3.bf16.msra.mxu0 %v3073_v18 }
 0x4ba   : > { %3075 = vmatprep.subr.bf16.mxu0 %v3655_v2  ;;  %3098 = vmatpush3.bf16.msra.mxu1 %v3097_v41 }
 0x4bb   : > { %3099 = vmatprep.subr.bf16.mxu1 %v3655_v2 }
 0x4bd   : > { %3077 = vmatpush3.bf16.msra.mxu0 %v3076_v20  ;;  %v2570_v20 = vld [vmem:[#allocation18] ss:$0 sm:$0xff] }
 0x4be   : > { %3078 = vmatprep.subr.bf16.mxu0 %v3655_v2  ;;  %3101 = vmatpush3.bf16.msra.mxu1 %v3100_v45 }
 0x4bf   : > { %3102 = vmatprep.subr.bf16.mxu1 %v3655_v2 }
 0x4c1   : > { %3080 = vmatpush3.bf16.msra.mxu0 %v3079_v23 }
 0x4c2   : > { %3081 = vmatprep.subr.bf16.mxu0 %v3655_v2  ;;  %3104 = vmatpush3.bf16.msra.mxu1 %v3103_v49 }
 0x4c3   : > { %3105 = vmatprep.subr.bf16.mxu1 %v3655_v2 }
 0x4c5   : > { %3083 = vmatpush3.bf16.msra.mxu0 %v3082_v26 }
 0x574   : > { %v2622_v53 = vpop.f32.mrb[14].mxu0 }
 0x575   : > { %v2623_v54 = vpop.f32.mrb[15].mxu0 }
 0x576   : > { %v2624_v51 = vadd.f32 %v2623_v54, %v2622_v53 }
 0x578   : > { %v2037_v46 = vadd.f32 %v2624_v51, %v2565_v55 }
 0x57c   : > { %v2657_v56 = vpop.f32.mrb[14].mxu1 }
 0x57d   : > { %v2658_v57 = vpop.f32.mrb[15].mxu1 }
 0x57e   : > { %v2659_v58 = vadd.f32 %v2658_v57, %v2657_v56  ;;  %v2566_v56 = vld [vmem:[#allocation9] ss:$0 sm:$0xff] }
 0x580   : > { %v2107_v59 = vadd.f32 %v2659_v58, %v2037_v46  ;;  %v2567_v46 = vld [vmem:[#allocation10] ss:$0 sm:$0xff] }
 0x582   : > { %v2110_v61 = vadd.f32 %v3264_v60, %v2107_v59  ;;  %v2249_v60 = vld [vmem:[#allocation15 + $0x70] sm:$0xff] }
 0x584   : > { %2113 = vadd.xlane.f32.xlu0 %v2110_v61 }
 0x611   : > { %v2114_v5 = vpop.xlane.xlu0 %2113 }
 0x612   : > { %v4152_v6 = vmul.f32 0.03125, %v2114_v5 }
 0x614   : > { %v4155_v7 = vsub.f32 %v2110_v61, %v4152_v6  ;;  %v2120_v50 = vmul.f32 96.0, %v4152_v6  ;;  %v2250_v61 = vld [vmem:[#allocation15 + $0x78] sm:$0xff] }
 0x615   : > { %v3106_v62 = vpack.c.bf16 %v2250_v61, %v2249_v60 }
 0x616   : > { %v2117_v8 = vmul.f32 %v4155_v7, %v4155_v7  ;;  %v2121_v52 = vmul.f32 %v2120_v50, %v4152_v6 }
 0x617   : > { %3107 = vmatpush3.bf16.msra.mxu1 %v3106_v62 }
 0x618   : > { %2118 = vadd.xlane.f32.xlu1 %v2117_v8 }
 0x6a5   : > { %v2119_v42 = vpop.xlane.xlu1 %2118 }
 0x6a6   : > { %v2122_v53 = vsub.f32 %v2119_v42, %v2121_v52 }
 0x6a8   : > { %v2123_v54 = vmul.f32 0.03125, %v2122_v53 }
 0x6aa   : > { %v2124_v51 = vadd.f32 1e-05, %v2123_v54 }
 0x6ac   : > { %3260 = vrsqrt.f32 %v2124_v51 }
 0x6b6   : > { %v3261_v55 = vpop.eup %3260 }
 0x6b7   : > { %v2126_v57 = vmul.f32 %v3261_v55, %v4155_v7 }
 0x6b9   : > { %v2133_v58 = vmul.f32 %v2566_v56, %v2126_v57 }
 0x6bb   : > { %v2140_v59 = vadd.f32 %v2567_v46, %v2133_v58 }
 0x6bd   : > { %2767 = vmatmul.mubr.f32.vlgmr.msra.gmra.mrb[16].mxu0 %v2140_v59 }
 0x790   : > { %v2230_v1 = vpop.f32.mrb[16].mxu0 }
 0x791   : > { %v2231_v2 = vadd.f32 %v2568_v63, %v2230_v1  ;;  %v2768_v3 = vpop.f32.mrb[17].mxu0 }
 0x793   : > { %v2234_v0 = vmax.f32 %v2231_v2, 0.0 }
 0x795   : > { %2802 = vmatmul.mubr.f32.vlgmr.msra.gmra.mrb[16].mxu1 %v2234_v0 }
 0x868   : > { %v2324_v5 = vpop.f32.mrb[16].mxu1 }
 0x869   : > { %v2325_v6 = vadd.f32 %v2569_v4, %v2324_v5  ;;  %v2803_v8 = vpop.f32.mrb[17].mxu1 }
 0x86b   : > { %v2328_v9 = vadd.f32 %v2325_v6, %v2140_v59 }
 0x86d   : > { %2331 = vadd.xlane.f32.xlu0 %v2328_v9 }
 0x8fa   : > { %v2332_v7 = vpop.xlane.xlu0 %2331 }
 0x8fb   : > { %v2333_v10 = vmul.f32 0.03125, %v2332_v7 }
 0x8fd   : > { %v2334_v11 = vsub.f32 %v2328_v9, %v2333_v10  ;;  %v2338_v13 = vmul.f32 96.0, %v2333_v10 }
 0x8ff   : > { %v2335_v12 = vmul.f32 %v2334_v11, %v2334_v11  ;;  %v2339_v14 = vmul.f32 %v2338_v13, %v2333_v10 }
 0x901   : > { %2336 = vadd.xlane.f32.xlu1 %v2335_v12 }
 0x98e   : > { %v2337_v15 = vpop.xlane.xlu1 %2336 }
 0x98f   : > { %v2340_v16 = vsub.f32 %v2337_v15, %v2339_v14 }
 0x991   : > { %v2341_v17 = vmul.f32 0.03125, %v2340_v16 }
 0x993   : > { %v2342_v18 = vadd.f32 1e-05, %v2341_v17 }
 0x995   : > { %3262 = vrsqrt.f32 %v2342_v18 }
 0x99f   : > { %v3263_v19 = vpop.eup %3262 }
 0x9a0   : > { %v2344_v21 = vmul.f32 %v3263_v19, %v2334_v11 }
 0x9a2   : > { %v2351_v23 = vmul.f32 %v2570_v20, %v2344_v21 }
 0x9a4   : > { %v2358_v24 = vadd.f32 %v2571_v22, %v2351_v23 }
 0x9a6   : > { %2359 = vst [vmem:[%s594_s24] sm:$0xff] %v2358_v24 }
 0x9a7 PF: > { %s4220_s2 = sld [smem:[#allocation28_spill]] }
 0x9ad   : > { %s30_s25 = sadd.s32 1, %s4220_s2  }
 0x9ae   : > { %p27_p7 = scmp.ge.s32.totalorder %s30_s25, 4  }
 0x9b0   :  { %29 = sbr.rel (!%p27_p7) target bundleno = 9 (0x9), region = 151 }
 0x9b7   :  { %2379 = vsyncpa [#allocation3], 1 }
 0x9b8   :  { %2381 = vsyncpa [#allocation3 + $0x1], 1 }
 0x9b9   :  { %2382 = vsyncpa [#allocation5], 1 }
 0x9ba   :  { %2383 = vsyncpa [#allocation8], 1 }
 0x9bb   :  { %2384 = vsyncpa [#allocation11], 1 }
 0x9bc   :  { %2385 = vsyncpa [#allocation14], 1 }
 0x9bd   :  { %2386 = vsyncpa [#allocation17], 1 }
 0x9be   :  { %2387 = vsyncpa [#allocation20], 1 }

// kernel: transformer_encoder.3
= control target key start
LH: loop header
LB: loop body
LE: loop exit
PB: predicated region body
PF: predicated region fallthrough
CT: control target
= control target key end

     0   :  { %18 = vsyncpa [#allocation3], 0  ;;  %s4129_s0 = inlined_call_operand.vmem [shape: f32[2,8,128], index: 0, kind: input, shape index: {}]   ;;  %s4130_s1 = inlined_call_operand.vmem [shape: f32[128,1536], index: 1, kind: input, shape index: {}]   ;;  %s4131_s2 = inlined_call_operand.vmem [shape: f32[1,1536], index: 2, kind: input, shape index: {}]   ;;  %s4132_s3 = inlined_call_operand.vmem [shape: f32[512,128], index: 3, kind: input, shape index: {}]   ;;  %s4133_s4 = inlined_call_operand.vmem [shape: f32[1,128], index: 4, kind: input, shape index: {}]   ;;  %s4134_s5 = inlined_call_operand.vmem [shape: f32[1,128], index: 5, kind: input, shape index: {}]   ;;  %s4135_s6 = inlined_call_operand.vmem [shape: f32[1,128], index: 6, kind: input, shape index: {}]   ;;  %s4136_s7 = inlined_call_operand.vmem [shape: f32[128,128], index: 7, kind: input, shape index: {}]   ;;  %s4137_s8 = inlined_call_operand.vmem [shape: f32[1,128], index: 8, kind: input, shape index: {}]   ;;  %s4138_s9 = inlined_call_operand.vmem [shape: f32[128,128], index: 9, kind: input, shape index: {}]   ;;  %s4139_s10 = inlined_call_operand.vmem [shape: f32[1,128], index: 10, kind: input, shape index: {}]   ;;  %s4140_s11 = inlined_call_operand.vmem [shape: f32[1,128], index: 11, kind: input, shape index: {}]   ;;  %s4141_s12 = inlined_call_operand.vmem [shape: f32[1,128], index: 12, kind: input, shape index: {}]   ;;  %s4142_s13 = inlined_call_operand.hbm [shape: f32[2,8,128], index: 13, kind: output, shape index: {}]  }
   0x1   :  { %20 = vsyncpa [#allocation3 + $0x1], 0  ;;  %s3030_s25 = smov 0   ;;  %s3032_s26 = smov 0  }
   0x2   :  { %s3034_s27 = smov 0   ;;  %s3036_s28 = smov 0  }
   0x3 LB: > { %4147 = sst [smem:[#allocation5_spill]] %s2950_s27  ;;  %s3051_s29 = sadd.s32 4294967295, %s2954_s28   ;;  %s2954_s28 = sphi %s3036_s28, %s4154_s28   ;;  %s2950_s27 = sphi %s3034_s27, %s4156_s27   ;;  %s2946_s26 = sphi %s3032_s26, %s4158_s26   ;;  %s2942_s25 = sphi %s3030_s25, %s4157_s25  }
   0x4   : > { %s2274_s30 = sadd.s32 4294967294, %s2954_s28   ;;  %s3055_s14 = sadd.s32 1, %s2954_s28  }
   0x5   : > { %4148 = sst [smem:[#allocation6_spill]] %s3055_s14  ;;  %s311_s15 = sadd.s32 1, %s2950_s27 }
   0x6   : > { %s308_s16 = ssub.s32 %s2954_s28, %s3055_s14  ;;  %p321_p0 = scmp.ne.s32.totalorder %s2950_s27, %s2946_s26 }
   0x7   : > { %p309_p1 = scmp.eq.s32.totalorder %s308_s16, 0  ;;  %p322_p2 = scmp.eq.s32.totalorder %s3051_s29, 1 }
   0x8   : > { %p327_p3 = scmp.ne.s32.totalorder %s2946_s26, %s2942_s25  ;;  %p328_p4 = scmp.eq.s32.totalorder %s2274_s30, 1 }
   0x9   : > { %s3066_s17 = scalar_select %p309_p1, %s2950_s27, %s311_s15  }
   0xa   : > { %p3068_p5 = por %p322_p2, %p321_p0  ;;  %p3072_p6 = por %p328_p4, %p327_p3 }
   0xb   : > { %4149 = sst [smem:[#allocation7_spill]] %s3066_s17  ;;  %p2277_p7 = scmp.ge.s32.totalorder %s2954_s28, 1 }
   0xc   : > { %s4151_s19 = scalar_select %p3072_p6, 1, 0 }
   0xd   : > { %p389_p8 = scmp.lt.s32.totalorder %s2954_s28, 3 }
   0xe   : > { %4152 = sst [smem:[#allocation8_spill]] %s4151_s19 }
   0xf   : > { %p390_p9 = pnand %p2277_p7, %p389_p8 }
  0x10   : > { %v438_v0 = vld [vmem:[%s4130_s1 + $0x8] sm:$0xff] (!%p390_p9)  ;;  %v437_v2 = vld [vmem:[%s4130_s1] sm:$0xff] (!%p390_p9)  ;;  %v2956_v7 = vmov (!%p390_p9), 0.0   ;;  %v440_v12 = vld [vmem:[%s4130_s1 + $0x18] sm:$0xff] (!%p390_p9)  ;;  %p432_p10 = scmp.lt.s32.totalorder (!%p390_p9), %s3051_s29, 1  ;;  %vm2957_vm0 = vmmov (!%p390_p9), 0  }
  0x11   : > { %393 = sbr.rel (%p390_p9) target bundleno = 2189 (0x88d), region = 72  ;;  %v450_v1 = vld [vmem:[%s4130_s1 + $0x68] sm:$0xff] (!%p390_p9)  ;;  %v449_v4 = vld [vmem:[%s4130_s1 + $0x60] sm:$0xff] (!%p390_p9)  ;;  %757 = vmatprep.mubr.f32.mxu0 (!%p390_p9), %v2956_v7  ;;  %828 = vmatprep.mubr.f32.mxu1 (!%p390_p9), %v2956_v7  ;;  %v452_v13 = vld [vmem:[%s4130_s1 + $0x78] sm:$0xff] (!%p390_p9)  ;;  %vm1190_vm1 = vcmask (!%p390_p9), 64512   ;;  %s429_s17 = sand.u32 (!%p390_p9), 1, %s2946_s26  }
  0x12   : > { %v2525_v3 = vpack.c.bf16 (!%p390_p9), %v450_v1, %v438_v0  ;;  %v462_v5 = vld [vmem:[%s4130_s1 + $0xc8] sm:$0xff] (!%p390_p9)  ;;  %v2527_v8 = vpack.c.bf16 (!%p390_p9), %v449_v4, %v437_v2  ;;  %v461_v10 = vld [vmem:[%s4130_s1 + $0xc0] sm:$0xff] (!%p390_p9)  ;;  %v2557_v17 = vpack.c.bf16 (!%p390_p9), %v452_v13, %v440_v12  ;;  %v439_v18 = vld [vmem:[%s4130_s1 + $0x10] sm:$0xff] (!%p390_p9)  ;;  %s2278_s14 = sshll.u32 (!%p390_p9), %s429_s17, 3  ;;  %s2292_s20 = sshll.u32 (!%p390_p9), %s3051_s29, 7 }
  0x13   : > { %v474_v6 = vld [vmem:[%s4130_s1 + $0x128] sm:$0xff] (!%p390_p9)  ;;  %v473_v11 = vld [vmem:[%s4130_s1 + $0x120] sm:$0xff] (!%p390_p9)  ;;  %v451_v19 = vld [vmem:[%s4130_s1 + $0x70] sm:$0xff] (!%p390_p9)  ;;  %s4087_s27 = scalar_lea.hbm (!%p390_p9), %s4142_s13, %s2292_s20  ;;  %s2202_s30 = scalar_lea.sflag (!%p390_p9), [#allocation3], %s429_s17 }
  0x14   : > { %v2529_v9 = vpack.c.bf16 (!%p390_p9), %v474_v6, %v462_v5  ;;  %2526 = vmatprep.subr.bf16.mxu0 (!%p390_p9), %v2525_v3  ;;  %v486_v14 = vld [vmem:[%s4130_s1 + $0x188] sm:$0xff] (!%p390_p9)  ;;  %v2531_v16 = vpack.c.bf16 (!%p390_p9), %v473_v11, %v461_v10  ;;  %v485_v20 = vld [vmem:[%s4130_s1 + $0x180] sm:$0xff] (!%p390_p9)  ;;  %v2559_v22 = vpack.c.bf16 (!%p390_p9), %v451_v19, %v439_v18  ;;  %v464_v24 = vld [vmem:[%s4130_s1 + $0xd8] sm:$0xff] (!%p390_p9)  ;;  %2558 = vmatprep.subr.bf16.mxu1 (!%p390_p9), %v2557_v17 }
  0x15   : > { %v498_v15 = vld [vmem:[%s4130_s1 + $0x1e8] sm:$0xff] (!%p390_p9)  ;;  %2528 = vmatpush1.bf16.msra.mxu0 (!%p390_p9), %v2527_v8  ;;  %v497_v23 = vld [vmem:[%s4130_s1 + $0x1e0] sm:$0xff] (!%p390_p9)  ;;  %v476_v25 = vld [vmem:[%s4130_s1 + $0x138] sm:$0xff] (!%p390_p9) }
  0x16   : > { %2530 = vmatprep.subr.bf16.mxu0 (!%p390_p9), %v2529_v9  ;;  %v2533_v21 = vpack.c.bf16 (!%p390_p9), %v498_v15, %v486_v14  ;;  %v2561_v26 = vpack.c.bf16 (!%p390_p9), %v476_v25, %v464_v24  ;;  %v510_v27 = vld [vmem:[%s4130_s1 + $0x248] sm:$0xff] (!%p390_p9)  ;;  %v463_v29 = vld [vmem:[%s4130_s1 + $0xd0] sm:$0xff] (!%p390_p9)  ;;  %2560 = vmatpush1.bf16.msra.mxu1 (!%p390_p9), %v2559_v22  ;;  %v2535_v31 = vpack.c.bf16 (!%p390_p9), %v497_v23, %v485_v20  ;;  %v509_v33 = vld [vmem:[%s4130_s1 + $0x240] sm:$0xff] (!%p390_p9) }
  0x17   : > { %v522_v28 = vld [vmem:[%s4130_s1 + $0x2a8] sm:$0xff] (!%p390_p9)  ;;  %v475_v30 = vld [vmem:[%s4130_s1 + $0x130] sm:$0xff] (!%p390_p9)  ;;  %v488_v34 = vld [vmem:[%s4130_s1 + $0x198] sm:$0xff] (!%p390_p9) }
  0x18   : > { %2562 = vmatprep.subr.bf16.mxu1 %v2561_v26  ;;  %v2563_v32 = vpack.c.bf16 %v475_v30, %v463_v29  ;;  %v500_v35 = vld [vmem:[%s4130_s1 + $0x1f8] sm:$0xff]  ;;  %v2537_v36 = vpack.c.bf16 %v522_v28, %v510_v27  ;;  %v521_v37 = vld [vmem:[%s4130_s1 + $0x2a0] sm:$0xff]  ;;  %v487_v39 = vld [vmem:[%s4130_s1 + $0x190] sm:$0xff]  ;;  %s433_s15 = scalar_select %p432_p10, %s3051_s29, 1 }
  0x19   : > { %2532 = vmatpush1.bf16.msra.mxu0 %v2531_v16  ;;  %v2565_v38 = vpack.c.bf16 %v500_v35, %v488_v34  ;;  %v499_v40 = vld [vmem:[%s4130_s1 + $0x1f0] sm:$0xff]  ;;  %v534_v41 = vld [vmem:[%s4130_s1 + $0x308] sm:$0xff]  ;;  %v512_v43 = vld [vmem:[%s4130_s1 + $0x258] sm:$0xff]  ;;  %v2539_v46 = vpack.c.bf16 %v521_v37, %v509_v33  ;;  %s2959_s29 = smov [#allocation2]  }
  0x1a   : > { %2534 = vmatprep.subr.bf16.mxu0 %v2533_v21  ;;  %v546_v42 = vld [vmem:[%s4130_s1 + $0x368] sm:$0xff]  ;;  %2564 = vmatpush1.bf16.msra.mxu1 %v2563_v32  ;;  %v2567_v44 = vpack.c.bf16 %v499_v40, %v487_v39  ;;  %v524_v45 = vld [vmem:[%s4130_s1 + $0x2b8] sm:$0xff]  ;;  %v533_v47 = vld [vmem:[%s4130_s1 + $0x300] sm:$0xff]  ;;  %s2279_s21 = sshll.u32 %s433_s15, 3 }
  0x1b   : > { %2566 = vmatprep.subr.bf16.mxu1 %v2565_v38  ;;  %v2569_v48 = vpack.c.bf16 %v524_v45, %v512_v43  ;;  %v511_v49 = vld [vmem:[%s4130_s1 + $0x250] sm:$0xff]  ;;  %v2541_v51 = vpack.c.bf16 %v546_v42, %v534_v41  ;;  %v545_v52 = vld [vmem:[%s4130_s1 + $0x360] sm:$0xff]  ;;  %v536_v53 = vld [vmem:[%s4130_s1 + $0x318] sm:$0xff]  ;;  %s3279_s16 = scalar_lea.vmem %s4129_s0, %s2279_s21 }
  0x1c   : > { %v523_v50 = vld [vmem:[%s4130_s1 + $0x2b0] sm:$0xff]  ;;  %v548_v54 = vld [vmem:[%s4130_s1 + $0x378] sm:$0xff]  ;;  %v558_v55 = vld [vmem:[%s4130_s1 + $0x3c8] sm:$0xff]  ;;  %v2543_v58 = vpack.c.bf16 %v545_v52, %v533_v47 }
  0x1d   : > { %2536 = vmatpush1.bf16.msra.mxu0 %v2535_v31  ;;  %v570_v56 = vld [vmem:[%s4130_s1 + $0x428] sm:$0xff]  ;;  %v2571_v57 = vpack.c.bf16 %v523_v50, %v511_v49  ;;  %v557_v59 = vld [vmem:[%s4130_s1 + $0x3c0] sm:$0xff]  ;;  %v2573_v60 = vpack.c.bf16 %v548_v54, %v536_v53  ;;  %v535_v61 = vld [vmem:[%s4130_s1 + $0x310] sm:$0xff] }
  0x1e   : > { %2538 = vmatprep.subr.bf16.mxu0 %v2537_v36  ;;  %2568 = vmatpush1.bf16.msra.mxu1 %v2567_v44  ;;  %v547_v62 = vld [vmem:[%s4130_s1 + $0x370] sm:$0xff]  ;;  %v2545_v63 = vpack.c.bf16 %v570_v56, %v558_v55  ;;  %v569_v0 = vld [vmem:[%s4130_s1 + $0x420] sm:$0xff]  ;;  %v560_v1 = vld [vmem:[%s4130_s1 + $0x3d8] sm:$0xff] }
  0x1f   : > { %2570 = vmatprep.subr.bf16.mxu1 %v2569_v48  ;;  %v572_v2 = vld [vmem:[%s4130_s1 + $0x438] sm:$0xff]  ;;  %v582_v3 = vld [vmem:[%s4130_s1 + $0x488] sm:$0xff]  ;;  %v2575_v5 = vpack.c.bf16 %v547_v62, %v535_v61  ;;  %v2547_v6 = vpack.c.bf16 %v569_v0, %v557_v59  ;;  %v581_v8 = vld [vmem:[%s4130_s1 + $0x480] sm:$0xff] }
  0x20   : > { %v594_v4 = vld [vmem:[%s4130_s1 + $0x4e8] sm:$0xff]  ;;  %v2577_v9 = vpack.c.bf16 %v572_v2, %v560_v1  ;;  %v559_v10 = vld [vmem:[%s4130_s1 + $0x3d0] sm:$0xff]  ;;  %v593_v13 = vld [vmem:[%s4130_s1 + $0x4e0] sm:$0xff] }
  0x21   : > { %2540 = vmatpush1.bf16.msra.mxu0 %v2539_v46  ;;  %v571_v11 = vld [vmem:[%s4130_s1 + $0x430] sm:$0xff]  ;;  %v2549_v12 = vpack.c.bf16 %v594_v4, %v582_v3  ;;  %v584_v14 = vld [vmem:[%s4130_s1 + $0x498] sm:$0xff]  ;;  %v606_v16 = vld [vmem:[%s4130_s1 + $0x548] sm:$0xff]  ;;  %v2551_v19 = vpack.c.bf16 %v593_v13, %v581_v8 }
  0x22   : > { %2542 = vmatprep.subr.bf16.mxu0 %v2541_v51  ;;  %2572 = vmatpush1.bf16.msra.mxu1 %v2571_v57  ;;  %v596_v15 = vld [vmem:[%s4130_s1 + $0x4f8] sm:$0xff]  ;;  %v618_v17 = vld [vmem:[%s4130_s1 + $0x5a8] sm:$0xff]  ;;  %v2579_v18 = vpack.c.bf16 %v571_v11, %v559_v10  ;;  %v605_v20 = vld [vmem:[%s4130_s1 + $0x540] sm:$0xff] }
  0x23   : > { %2574 = vmatprep.subr.bf16.mxu1 %v2573_v60  ;;  %v2581_v21 = vpack.c.bf16 %v596_v15, %v584_v14  ;;  %v583_v22 = vld [vmem:[%s4130_s1 + $0x490] sm:$0xff]  ;;  %v2553_v24 = vpack.c.bf16 %v618_v17, %v606_v16  ;;  %v617_v25 = vld [vmem:[%s4130_s1 + $0x5a0] sm:$0xff]  ;;  %v608_v26 = vld [vmem:[%s4130_s1 + $0x558] sm:$0xff] }
  0x24   : > { %v595_v23 = vld [vmem:[%s4130_s1 + $0x4f0] sm:$0xff]  ;;  %v620_v27 = vld [vmem:[%s4130_s1 + $0x5b8] sm:$0xff]  ;;  %v442_v28 = vld [vmem:[%s4130_s1 + $0x28] sm:$0xff]  ;;  %v2555_v31 = vpack.c.bf16 %v617_v25, %v605_v20 }
  0x25   : > { %2544 = vmatpush1.bf16.msra.mxu0 %v2543_v58  ;;  %v454_v29 = vld [vmem:[%s4130_s1 + $0x88] sm:$0xff]  ;;  %v2583_v30 = vpack.c.bf16 %v595_v23, %v583_v22  ;;  %v441_v32 = vld [vmem:[%s4130_s1 + $0x20] sm:$0xff]  ;;  %v2585_v33 = vpack.c.bf16 %v620_v27, %v608_v26  ;;  %v607_v34 = vld [vmem:[%s4130_s1 + $0x550] sm:$0xff] }
  0x26   : > { %2546 = vmatprep.subr.bf16.mxu0 %v2545_v63  ;;  %2576 = vmatpush1.bf16.msra.mxu1 %v2575_v5  ;;  %v619_v35 = vld [vmem:[%s4130_s1 + $0x5b0] sm:$0xff]  ;;  %v2589_v36 = vpack.c.bf16 %v454_v29, %v442_v28  ;;  %v453_v37 = vld [vmem:[%s4130_s1 + $0x80] sm:$0xff]  ;;  %v444_v38 = vld [vmem:[%s4130_s1 + $0x38] sm:$0xff] }
  0x27   : > { %2578 = vmatprep.subr.bf16.mxu1 %v2577_v9  ;;  %v456_v39 = vld [vmem:[%s4130_s1 + $0x98] sm:$0xff]  ;;  %v466_v40 = vld [vmem:[%s4130_s1 + $0xe8] sm:$0xff]  ;;  %v3306_v42 = vld [vmem:[%s3279_s16] sm:$0xff]  ;;  %v2587_v43 = vpack.c.bf16 %v619_v35, %v607_v34  ;;  %v2591_v44 = vpack.c.bf16 %v453_v37, %v441_v32 }
  0x28   : > { %v478_v41 = vld [vmem:[%s4130_s1 + $0x148] sm:$0xff]  ;;  %v465_v45 = vld [vmem:[%s4130_s1 + $0xe0] sm:$0xff]  ;;  %v2621_v46 = vpack.c.bf16 %v456_v39, %v444_v38  ;;  %v443_v47 = vld [vmem:[%s4130_s1 + $0x30] sm:$0xff] }
  0x29   : > { %2548 = vmatpush1.bf16.msra.mxu0 %v2547_v6  ;;  %v455_v48 = vld [vmem:[%s4130_s1 + $0x90] sm:$0xff]  ;;  %v2593_v49 = vpack.c.bf16 %v478_v41, %v466_v40  ;;  %v477_v50 = vld [vmem:[%s4130_s1 + $0x140] sm:$0xff]  ;;  %v468_v51 = vld [vmem:[%s4130_s1 + $0xf8] sm:$0xff] }
  0x2a   : > { %2550 = vmatprep.subr.bf16.mxu0 %v2549_v12  ;;  %2580 = vmatpush1.bf16.msra.mxu1 %v2579_v18  ;;  %v480_v52 = vld [vmem:[%s4130_s1 + $0x158] sm:$0xff]  ;;  %v490_v53 = vld [vmem:[%s4130_s1 + $0x1a8] sm:$0xff]  ;;  %v2623_v55 = vpack.c.bf16 %v455_v48, %v443_v47  ;;  %v2595_v56 = vpack.c.bf16 %v477_v50, %v465_v45  ;;  %v489_v57 = vld [vmem:[%s4130_s1 + $0x1a0] sm:$0xff] }
  0x2b   : > { %2582 = vmatprep.subr.bf16.mxu1 %v2581_v21  ;;  %v502_v54 = vld [vmem:[%s4130_s1 + $0x208] sm:$0xff]  ;;  %v2625_v58 = vpack.c.bf16 %v480_v52, %v468_v51  ;;  %v467_v59 = vld [vmem:[%s4130_s1 + $0xf0] sm:$0xff]  ;;  %v501_v62 = vld [vmem:[%s4130_s1 + $0x200] sm:$0xff] }
  0x2c   : > { %v479_v60 = vld [vmem:[%s4130_s1 + $0x150] sm:$0xff]  ;;  %v2597_v61 = vpack.c.bf16 %v502_v54, %v490_v53  ;;  %v492_v63 = vld [vmem:[%s4130_s1 + $0x1b8] sm:$0xff]  ;;  %v514_v1 = vld [vmem:[%s4130_s1 + $0x268] sm:$0xff]  ;;  %v2599_v4 = vpack.c.bf16 %v501_v62, %v489_v57 }
  0x2d   : > { %2552 = vmatpush1.bf16.msra.mxu0 %v2551_v19  ;;  %v504_v0 = vld [vmem:[%s4130_s1 + $0x218] sm:$0xff]  ;;  %v526_v2 = vld [vmem:[%s4130_s1 + $0x2c8] sm:$0xff]  ;;  %v2627_v3 = vpack.c.bf16 %v479_v60, %v467_v59  ;;  %v513_v5 = vld [vmem:[%s4130_s1 + $0x260] sm:$0xff] }
  0x2e   : > { %2554 = vmatprep.subr.bf16.mxu0 %v2553_v24  ;;  %2584 = vmatpush1.bf16.msra.mxu1 %v2583_v30  ;;  %v2629_v6 = vpack.c.bf16 %v504_v0, %v492_v63  ;;  %v491_v8 = vld [vmem:[%s4130_s1 + $0x1b0] sm:$0xff]  ;;  %v2601_v10 = vpack.c.bf16 %v526_v2, %v514_v1  ;;  %v525_v11 = vld [vmem:[%s4130_s1 + $0x2c0] sm:$0xff]  ;;  %v516_v12 = vld [vmem:[%s4130_s1 + $0x278] sm:$0xff] }
  0x2f   : > { %2586 = vmatprep.subr.bf16.mxu1 %v2585_v33  ;;  %v503_v9 = vld [vmem:[%s4130_s1 + $0x210] sm:$0xff]  ;;  %v528_v13 = vld [vmem:[%s4130_s1 + $0x2d8] sm:$0xff]  ;;  %v538_v14 = vld [vmem:[%s4130_s1 + $0x328] sm:$0xff]  ;;  %v2603_v17 = vpack.c.bf16 %v525_v11, %v513_v5 }
  0x30   : > { %v550_v15 = vld [vmem:[%s4130_s1 + $0x388] sm:$0xff]  ;;  %v2631_v16 = vpack.c.bf16 %v503_v9, %v491_v8  ;;  %v537_v18 = vld [vmem:[%s4130_s1 + $0x320] sm:$0xff]  ;;  %v2633_v19 = vpack.c.bf16 %v528_v13, %v516_v12  ;;  %v515_v20 = vld [vmem:[%s4130_s1 + $0x270] sm:$0xff] }
  0x31   : > { %2556 = vmatpush1.bf16.msra.mxu0 %v2555_v31  ;;  %v527_v21 = vld [vmem:[%s4130_s1 + $0x2d0] sm:$0xff]  ;;  %v2605_v22 = vpack.c.bf16 %v550_v15, %v538_v14  ;;  %v549_v23 = vld [vmem:[%s4130_s1 + $0x380] sm:$0xff]  ;;  %v540_v24 = vld [vmem:[%s4130_s1 + $0x338] sm:$0xff] }
  0x32   : > { %2590 = vmatprep.subr.bf16.mxu0 %v2589_v36  ;;  %2588 = vmatpush1.bf16.msra.mxu1 %v2587_v43  ;;  %v552_v25 = vld [vmem:[%s4130_s1 + $0x398] sm:$0xff]  ;;  %v562_v26 = vld [vmem:[%s4130_s1 + $0x3e8] sm:$0xff]  ;;  %v2635_v28 = vpack.c.bf16 %v527_v21, %v515_v20  ;;  %v2607_v29 = vpack.c.bf16 %v549_v23, %v537_v18  ;;  %v561_v30 = vld [vmem:[%s4130_s1 + $0x3e0] sm:$0xff] }
  0x33   : > { %2622 = vmatprep.subr.bf16.mxu1 %v2621_v46  ;;  %v574_v27 = vld [vmem:[%s4130_s1 + $0x448] sm:$0xff]  ;;  %v2637_v31 = vpack.c.bf16 %v552_v25, %v540_v24  ;;  %v539_v32 = vld [vmem:[%s4130_s1 + $0x330] sm:$0xff]  ;;  %v573_v35 = vld [vmem:[%s4130_s1 + $0x440] sm:$0xff] }
  0x34   : > { %758 = vmatmul.mubr.f32.vlgmr.msra.gmra.mrb[0].mxu0 %v3306_v42  ;;  %v551_v33 = vld [vmem:[%s4130_s1 + $0x390] sm:$0xff]  ;;  %v2609_v34 = vpack.c.bf16 %v574_v27, %v562_v26  ;;  %v564_v36 = vld [vmem:[%s4130_s1 + $0x3f8] sm:$0xff]  ;;  %v586_v38 = vld [vmem:[%s4130_s1 + $0x4a8] sm:$0xff]  ;;  %v2611_v41 = vpack.c.bf16 %v573_v35, %v561_v30 }
  0x35   : > { %2592 = vmatpush1.bf16.msra.mxu0 %v2591_v44  ;;  %899 = vmatprep.mubr.f32.mxu0 %v2956_v7  ;;  %v576_v37 = vld [vmem:[%s4130_s1 + $0x458] sm:$0xff]  ;;  %v598_v39 = vld [vmem:[%s4130_s1 + $0x508] sm:$0xff]  ;;  %v2639_v40 = vpack.c.bf16 %v551_v33, %v539_v32  ;;  %v585_v43 = vld [vmem:[%s4130_s1 + $0x4a0] sm:$0xff] }
  0x36   : > { %2594 = vmatprep.subr.bf16.mxu0 %v2593_v49  ;;  %829 = vmatmul.mubr.f32.vlgmr.msra.gmra.mrb[0].mxu1 %v3306_v42  ;;  %v2641_v44 = vpack.c.bf16 %v576_v37, %v564_v36  ;;  %v563_v45 = vld [vmem:[%s4130_s1 + $0x3f0] sm:$0xff]  ;;  %v2613_v47 = vpack.c.bf16 %v598_v39, %v586_v38  ;;  %v597_v48 = vld [vmem:[%s4130_s1 + $0x500] sm:$0xff]  ;;  %v588_v49 = vld [vmem:[%s4130_s1 + $0x4b8] sm:$0xff] }
  0x37   : > { %2624 = vmatpush1.bf16.msra.mxu1 %v2623_v55  ;;  %970 = vmatprep.mubr.f32.mxu1 %v2956_v7  ;;  %v575_v46 = vld [vmem:[%s4130_s1 + $0x450] sm:$0xff]  ;;  %v600_v50 = vld [vmem:[%s4130_s1 + $0x518] sm:$0xff]  ;;  %v610_v51 = vld [vmem:[%s4130_s1 + $0x568] sm:$0xff]  ;;  %v2615_v54 = vpack.c.bf16 %v597_v48, %v585_v43 }
  0x38   : > { %2626 = vmatprep.subr.bf16.mxu1 %v2625_v58  ;;  %v622_v52 = vld [vmem:[%s4130_s1 + $0x5c8] sm:$0xff]  ;;  %v2643_v53 = vpack.c.bf16 %v575_v46, %v563_v45  ;;  %v609_v55 = vld [vmem:[%s4130_s1 + $0x560] sm:$0xff]  ;;  %v587_v57 = vld [vmem:[%s4130_s1 + $0x4b0] sm:$0xff] }
  0x39   : > { %2596 = vmatpush1.bf16.msra.mxu0 %v2595_v56  ;;  %v2645_v56 = vpack.c.bf16 %v600_v50, %v588_v49  ;;  %v599_v58 = vld [vmem:[%s4130_s1 + $0x510] sm:$0xff]  ;;  %v2617_v59 = vpack.c.bf16 %v622_v52, %v610_v51  ;;  %v621_v60 = vld [vmem:[%s4130_s1 + $0x5c0] sm:$0xff]  ;;  %v624_v62 = vld [vmem:[%s4130_s1 + $0x5d8] sm:$0xff] }
  0x3a   : > { %2598 = vmatprep.subr.bf16.mxu0 %v2597_v61  ;;  %v612_v61 = vld [vmem:[%s4130_s1 + $0x578] sm:$0xff]  ;;  %v446_v63 = vld [vmem:[%s4130_s1 + $0x48] sm:$0xff]  ;;  %v2647_v1 = vpack.c.bf16 %v599_v58, %v587_v57  ;;  %v2619_v2 = vpack.c.bf16 %v621_v60, %v609_v55  ;;  %v623_v5 = vld [vmem:[%s4130_s1 + $0x5d0] sm:$0xff] }
  0x3b   : > { %2628 = vmatpush1.bf16.msra.mxu1 %v2627_v3  ;;  %v458_v0 = vld [vmem:[%s4130_s1 + $0xa8] sm:$0xff]  ;;  %v2649_v3 = vpack.c.bf16 %v624_v62, %v612_v61  ;;  %v445_v8 = vld [vmem:[%s4130_s1 + $0x40] sm:$0xff]  ;;  %v448_v55 = vld [vmem:[%s4130_s1 + $0x58] sm:$0xff] }
  0x3c   : > { %2630 = vmatprep.subr.bf16.mxu1 %v2629_v6  ;;  %v2653_v6 = vpack.c.bf16 %v458_v0, %v446_v63  ;;  %v457_v9 = vld [vmem:[%s4130_s1 + $0xa0] sm:$0xff]  ;;  %v470_v12 = vld [vmem:[%s4130_s1 + $0x108] sm:$0xff]  ;;  %v447_v57 = vld [vmem:[%s4130_s1 + $0x50] sm:$0xff] }
  0x3d   : > { %2600 = vmatpush1.bf16.msra.mxu0 %v2599_v4  ;;  %v611_v4 = vld [vmem:[%s4130_s1 + $0x570] sm:$0xff]  ;;  %v2655_v11 = vpack.c.bf16 %v457_v9, %v445_v8  ;;  %v482_v13 = vld [vmem:[%s4130_s1 + $0x168] sm:$0xff]  ;;  %v469_v15 = vld [vmem:[%s4130_s1 + $0x100] sm:$0xff] }
  0x3e   : > { %2602 = vmatprep.subr.bf16.mxu0 %v2601_v10  ;;  %v2651_v10 = vpack.c.bf16 %v623_v5, %v611_v4  ;;  %v2657_v14 = vpack.c.bf16 %v482_v13, %v470_v12  ;;  %v494_v18 = vld [vmem:[%s4130_s1 + $0x1c8] sm:$0xff]  ;;  %v493_v21 = vld [vmem:[%s4130_s1 + $0x1c0] sm:$0xff]  ;;  %v472_v60 = vld [vmem:[%s4130_s1 + $0x118] sm:$0xff] }
  0x3f   : > { %2632 = vmatpush1.bf16.msra.mxu1 %v2631_v16  ;;  %v481_v16 = vld [vmem:[%s4130_s1 + $0x160] sm:$0xff]  ;;  %v518_v24 = vld [vmem:[%s4130_s1 + $0x288] sm:$0xff]  ;;  %v484_v61 = vld [vmem:[%s4130_s1 + $0x178] sm:$0xff] }
  0x40   : > { %2634 = vmatprep.subr.bf16.mxu1 %v2633_v19  ;;  %v506_v19 = vld [vmem:[%s4130_s1 + $0x228] sm:$0xff]  ;;  %v517_v27 = vld [vmem:[%s4130_s1 + $0x280] sm:$0xff]  ;;  %v2689_v63 = vpack.c.bf16 %v484_v61, %v472_v60  ;;  %v471_v0 = vld [vmem:[%s4130_s1 + $0x110] sm:$0xff] }
  0x41   : > { %2604 = vmatpush1.bf16.msra.mxu0 %v2603_v17  ;;  %v2659_v17 = vpack.c.bf16 %v481_v16, %v469_v15  ;;  %v2661_v20 = vpack.c.bf16 %v506_v19, %v494_v18  ;;  %v530_v25 = vld [vmem:[%s4130_s1 + $0x2e8] sm:$0xff]  ;;  %v541_v32 = vld [vmem:[%s4130_s1 + $0x340] sm:$0xff]  ;;  %v507_v8 = vld [vmem:[%s4130_s1 + $0x230] sm:$0xff] }
  0x42   : > { %2606 = vmatprep.subr.bf16.mxu0 %v2605_v22  ;;  %v505_v22 = vld [vmem:[%s4130_s1 + $0x220] sm:$0xff]  ;;  %v2665_v26 = vpack.c.bf16 %v530_v25, %v518_v24  ;;  %v566_v35 = vld [vmem:[%s4130_s1 + $0x408] sm:$0xff]  ;;  %v520_v9 = vld [vmem:[%s4130_s1 + $0x298] sm:$0xff] }
  0x43   : > { %2636 = vmatpush1.bf16.msra.mxu1 %v2635_v28  ;;  %v2663_v23 = vpack.c.bf16 %v505_v22, %v493_v21  ;;  %v529_v28 = vld [vmem:[%s4130_s1 + $0x2e0] sm:$0xff]  ;;  %v578_v36 = vld [vmem:[%s4130_s1 + $0x468] sm:$0xff]  ;;  %v519_v13 = vld [vmem:[%s4130_s1 + $0x290] sm:$0xff] }
  0x44   : > { %2638 = vmatprep.subr.bf16.mxu1 %v2637_v31  ;;  %v2667_v30 = vpack.c.bf16 %v529_v28, %v517_v27  ;;  %v554_v31 = vld [vmem:[%s4130_s1 + $0x3a8] sm:$0xff]  ;;  %v553_v33 = vld [vmem:[%s4130_s1 + $0x3a0] sm:$0xff]  ;;  %v2673_v38 = vpack.c.bf16 %v578_v36, %v566_v35  ;;  %v544_v15 = vld [vmem:[%s4130_s1 + $0x358] sm:$0xff] }
  0x45   : > { %2608 = vmatpush1.bf16.msra.mxu0 %v2607_v29  ;;  %v542_v29 = vld [vmem:[%s4130_s1 + $0x348] sm:$0xff]  ;;  %v2671_v37 = vpack.c.bf16 %v553_v33, %v541_v32  ;;  %v565_v39 = vld [vmem:[%s4130_s1 + $0x400] sm:$0xff]  ;;  %v556_v16 = vld [vmem:[%s4130_s1 + $0x3b8] sm:$0xff] }
  0x46   : > { %2610 = vmatprep.subr.bf16.mxu0 %v2609_v34  ;;  %v2669_v34 = vpack.c.bf16 %v554_v31, %v542_v29  ;;  %v602_v43 = vld [vmem:[%s4130_s1 + $0x528] sm:$0xff]  ;;  %v589_v46 = vld [vmem:[%s4130_s1 + $0x4c0] sm:$0xff]  ;;  %v2701_v18 = vpack.c.bf16 %v556_v16, %v544_v15  ;;  %v543_v19 = vld [vmem:[%s4130_s1 + $0x350] sm:$0xff] }
  0x47   : > { %2640 = vmatpush1.bf16.msra.mxu1 %v2639_v40  ;;  %v577_v40 = vld [vmem:[%s4130_s1 + $0x460] sm:$0xff]  ;;  %v614_v48 = vld [vmem:[%s4130_s1 + $0x588] sm:$0xff]  ;;  %v568_v21 = vld [vmem:[%s4130_s1 + $0x418] sm:$0xff] }
  0x48   : > { %2642 = vmatprep.subr.bf16.mxu1 %v2641_v44  ;;  %v2675_v44 = vpack.c.bf16 %v577_v40, %v565_v39  ;;  %v626_v49 = vld [vmem:[%s4130_s1 + $0x5e8] sm:$0xff]  ;;  %v613_v52 = vld [vmem:[%s4130_s1 + $0x580] sm:$0xff]  ;;  %v580_v22 = vld [vmem:[%s4130_s1 + $0x478] sm:$0xff] }
  0x49   : > { %2612 = vmatpush1.bf16.msra.mxu0 %v2611_v41  ;;  %v590_v41 = vld [vmem:[%s4130_s1 + $0x4c8] sm:$0xff]  ;;  %v2681_v51 = vpack.c.bf16 %v626_v49, %v614_v48  ;;  %v2705_v24 = vpack.c.bf16 %v580_v22, %v568_v21  ;;  %v567_v25 = vld [vmem:[%s4130_s1 + $0x410] sm:$0xff]  ;;  %v592_v27 = vld [vmem:[%s4130_s1 + $0x4d8] sm:$0xff] }
  0x4a   : > { %2614 = vmatprep.subr.bf16.mxu0 %v2613_v47  ;;  %v2677_v45 = vpack.c.bf16 %v602_v43, %v590_v41  ;;  %v601_v47 = vld [vmem:[%s4130_s1 + $0x520] sm:$0xff]  ;;  %v604_v28 = vld [vmem:[%s4130_s1 + $0x538] sm:$0xff]  ;;  %v591_v31 = vld [vmem:[%s4130_s1 + $0x4d0] sm:$0xff] }
  0x4b   : > { %2644 = vmatpush1.bf16.msra.mxu1 %v2643_v53  ;;  %v2679_v50 = vpack.c.bf16 %v601_v47, %v589_v46  ;;  %v625_v53 = vld [vmem:[%s4130_s1 + $0x5e0] sm:$0xff]  ;;  %v603_v32 = vld [vmem:[%s4130_s1 + $0x530] sm:$0xff]  ;;  %v616_v33 = vld [vmem:[%s4130_s1 + $0x598] sm:$0xff] }
  0x4c   : > { %2646 = vmatprep.subr.bf16.mxu1 %v2645_v56  ;;  %v460_v56 = vld [vmem:[%s4130_s1 + $0xb8] sm:$0xff]  ;;  %v2711_v35 = vpack.c.bf16 %v603_v32, %v591_v31  ;;  %v629_v48 = vld [vmem:[%s4131_s2] sm:$0xff]  ;;  %v630_v16 = vld [vmem:[%s4131_s2 + $0x8] sm:$0xf] }
  0x4d   : > { %2616 = vmatpush1.bf16.msra.mxu0 %v2615_v54  ;;  %v2683_v54 = vpack.c.bf16 %v625_v53, %v613_v52  ;;  %v2685_v58 = vpack.c.bf16 %v460_v56, %v448_v55 }
  0x4e   : > { %2618 = vmatprep.subr.bf16.mxu0 %v2617_v59  ;;  %v459_v59 = vld [vmem:[%s4130_s1 + $0xb0] sm:$0xff] }
  0x4f   : > { %2648 = vmatpush1.bf16.msra.mxu1 %v2647_v1  ;;  %v2687_v62 = vpack.c.bf16 %v459_v59, %v447_v57  ;;  %v483_v1 = vld [vmem:[%s4130_s1 + $0x170] sm:$0xff] }
  0x50   : > { %2650 = vmatprep.subr.bf16.mxu1 %v2649_v3  ;;  %v508_v3 = vld [vmem:[%s4130_s1 + $0x238] sm:$0xff]  ;;  %v2691_v4 = vpack.c.bf16 %v483_v1, %v471_v0 }
  0x51   : > { %2620 = vmatpush1.bf16.msra.mxu0 %v2619_v2  ;;  %v496_v2 = vld [vmem:[%s4130_s1 + $0x1d8] sm:$0xff] }
  0x52   : > { %2654 = vmatprep.subr.bf16.mxu0 %v2653_v6  ;;  %v2693_v5 = vpack.c.bf16 %v508_v3, %v496_v2  ;;  %v495_v6 = vld [vmem:[%s4130_s1 + $0x1d0] sm:$0xff] }
  0x53   : > { %2652 = vmatpush1.bf16.msra.mxu1 %v2651_v10  ;;  %v532_v10 = vld [vmem:[%s4130_s1 + $0x2f8] sm:$0xff] }
  0x54   : > { %900 = vmatmul.mubr.f32.vlgmr.msra.gmra.mrb[2].mxu0 %v3306_v42  ;;  %2686 = vmatprep.subr.bf16.mxu1 %v2685_v58  ;;  %v2697_v12 = vpack.c.bf16 %v532_v10, %v520_v9 }
  0x55   : > { %2656 = vmatpush1.bf16.msra.mxu0 %v2655_v11  ;;  %1041 = vmatprep.mubr.f32.mxu0 %v2956_v7  ;;  %v2695_v11 = vpack.c.bf16 %v507_v8, %v495_v6 }
  0x56   : > { %971 = vmatmul.mubr.f32.vlgmr.msra.gmra.mrb[2].mxu1 %v3306_v42  ;;  %2658 = vmatprep.subr.bf16.mxu0 %v2657_v14  ;;  %v531_v14 = vld [vmem:[%s4130_s1 + $0x2f0] sm:$0xff] }
  0x57   : > { %1112 = vmatprep.mubr.f32.mxu1 %v2956_v7  ;;  %2688 = vmatpush1.bf16.msra.mxu1 %v2687_v62 }
  0x58   : > { %2690 = vmatprep.subr.bf16.mxu1 %v2689_v63 }
  0x59   : > { %2660 = vmatpush1.bf16.msra.mxu0 %v2659_v17  ;;  %v2699_v17 = vpack.c.bf16 %v531_v14, %v519_v13 }
  0x5a   : > { %2662 = vmatprep.subr.bf16.mxu0 %v2661_v20  ;;  %v555_v20 = vld [vmem:[%s4130_s1 + $0x3b0] sm:$0xff] }
  0x5b   : > { %2692 = vmatpush1.bf16.msra.mxu1 %v2691_v4 }
  0x5c   : > { %2694 = vmatprep.subr.bf16.mxu1 %v2693_v5 }
  0x5d   : > { %2664 = vmatpush1.bf16.msra.mxu0 %v2663_v23  ;;  %v2703_v23 = vpack.c.bf16 %v555_v20, %v543_v19 }
  0x5e   : > { %2666 = vmatprep.subr.bf16.mxu0 %v2665_v26  ;;  %v579_v26 = vld [vmem:[%s4130_s1 + $0x470] sm:$0xff] }
  0x5f   : > { %2696 = vmatpush1.bf16.msra.mxu1 %v2695_v11  ;;  %v2707_v29 = vpack.c.bf16 %v579_v26, %v567_v25 }
  0x60   : > { %2698 = vmatprep.subr.bf16.mxu1 %v2697_v12 }
  0x61   : > { %2668 = vmatpush1.bf16.msra.mxu0 %v2667_v30  ;;  %v2709_v30 = vpack.c.bf16 %v604_v28, %v592_v27 }
  0x62   : > { %2670 = vmatprep.subr.bf16.mxu0 %v2669_v34  ;;  %v628_v34 = vld [vmem:[%s4130_s1 + $0x5f8] sm:$0xff] }
  0x63   : > { %2700 = vmatpush1.bf16.msra.mxu1 %v2699_v17  ;;  %v2713_v36 = vpack.c.bf16 %v628_v34, %v616_v33 }
  0x64   : > { %2702 = vmatprep.subr.bf16.mxu1 %v2701_v18 }
  0x65   : > { %2672 = vmatpush1.bf16.msra.mxu0 %v2671_v37  ;;  %v615_v37 = vld [vmem:[%s4130_s1 + $0x590] sm:$0xff] }
  0x66   : > { %2674 = vmatprep.subr.bf16.mxu0 %v2673_v38  ;;  %v627_v38 = vld [vmem:[%s4130_s1 + $0x5f0] sm:$0xff] }
  0x67   : > { %2704 = vmatpush1.bf16.msra.mxu1 %v2703_v23  ;;  %v2715_v39 = vpack.c.bf16 %v627_v38, %v615_v37 }
  0x68   : > { %2706 = vmatprep.subr.bf16.mxu1 %v2705_v24 }
  0x69   : > { %2676 = vmatpush1.bf16.msra.mxu0 %v2675_v44 }
  0x6a   : > { %2678 = vmatprep.subr.bf16.mxu0 %v2677_v45  ;;  %v633_v45 = vlaneseq }
  0x6b   : > { %2708 = vmatpush1.bf16.msra.mxu1 %v2707_v29 }
  0x6c   : > { %2710 = vmatprep.subr.bf16.mxu1 %v2709_v30  ;;  %v3684_v46 = vshrl.u32 %v633_v45, 7 }
  0x6d   : > { %2680 = vmatpush1.bf16.msra.mxu0 %v2679_v50 }
  0x6e   : > { %2682 = vmatprep.subr.bf16.mxu0 %v2681_v51  ;;  %v635_v47 = vsub.s32 0, %v3684_v46  ;;  %v651_v49 = vsub.s32 4, %v3684_v46  ;;  %v655_v52 = vsub.s32 5, %v3684_v46  ;;  %v659_v53 = vsub.s32 6, %v3684_v46 }
  0x6f   : > { %2712 = vmatpush1.bf16.msra.mxu1 %v2711_v35  ;;  %v643_v56 = vsub.s32 2, %v3684_v46  ;;  %v647_v2 = vsub.s32 3, %v3684_v46  ;;  %v663_v5 = vsub.s32 7, %v3684_v46 }
  0x70   : > { %2714 = vmatprep.subr.bf16.mxu1 %v2713_v36  ;;  %v636_v50 = vrot.slane %v629_v48, %v635_v47  ;;  %v652_v51 = vrot.slane %v629_v48, %v651_v49  ;;  %v656_v59 = vrot.slane %v629_v48, %v655_v52  ;;  %v660_v61 = vrot.slane %v629_v48, %v659_v53 }
  0x71   : > { %2684 = vmatpush1.bf16.msra.mxu0 %v2683_v54  ;;  %v644_v1 = vrot.slane %v629_v48, %v643_v56  ;;  %v648_v10 = vrot.slane %v629_v48, %v647_v2  ;;  %v664_v11 = vrot.slane %v629_v48, %v663_v5  ;;  %v668_v17 = vrot.slane %v630_v16, %v635_v47 }
  0x72   : > { %2415 = vmatprep.subr.mxu0 %v2956_v7  ;;  %v676_v49 = vrot.slane %v630_v16, %v643_v56 }
  0x73   : > { %2716 = vmatpush1.bf16.msra.mxu1 %v2715_v39 }
  0x74   : > { %1042 = vmatmul.mubr.f32.vlgmr.msra.gmra.mrb[4].mxu0 %v3306_v42  ;;  %2420 = vmatprep.subr.mxu1 %v2956_v7 }
  0x75   : > { %2417 = vmatprep.mubr.msk.f32.mxu0 %vm2957_vm0, %v2956_v7 }
  0x76   : > { %1113 = vmatmul.mubr.f32.vlgmr.msra.gmra.mrb[4].mxu1 %v3306_v42  ;;  %v639_v42 = vsub.s32 1, %v3684_v46 }
  0x77   : > { %2422 = vmatprep.mubr.msk.f32.mxu1 %vm2957_vm0, %v2956_v7 }
  0x78   : > { %v640_v55 = vrot.slane %v629_v48, %v639_v42 }
 0x107   : > { %v759_v40 = vpop.f32.mrb[0].mxu0 }
 0x108   : > { %v761_v41 = vpop.f32.mrb[1].mxu0  ;;  %v760_v54 = vadd.f32 %v759_v40, %v636_v50 }
 0x109   : > { %v830_v43 = vpop.f32.mrb[0].mxu1  ;;  %v762_v0 = vadd.f32 %v761_v41, %v640_v55 }
 0x10a   : > { %v832_v44 = vpop.f32.mrb[1].mxu1  ;;  %v1119_v63 = vmul.f32 0.35355338, %v760_v54  ;;  %v831_v9 = vadd.f32 %v830_v43, %v644_v1  ;;  %v1741_v1 = vld [vmem:[%s4132_s3 + $0x8] sm:$0xff] }
 0x10b   : > { %v1275_v8 = vmul.f32 0.35355338, %v762_v0  ;;  %v833_v13 = vadd.f32 %v832_v44, %v648_v10  ;;  %v672_v44 = vrot.slane %v630_v16, %v639_v42  ;;  %v680_v42 = vrot.slane %v630_v16, %v647_v2  ;;  %v1758_v2 = vld [vmem:[%s4132_s3 + $0x90] sm:$0xff]  ;;  %v1761_v10 = vld [vmem:[%s4132_s3 + $0xa8] sm:$0xff]  ;;  %v1772_v16 = vld [vmem:[%s4132_s3 + $0x100] sm:$0xff] }
 0x10c   : > { %v1430_v12 = vmul.f32 0.35355338, %v831_v9  ;;  %v1760_v9 = vld [vmem:[%s4132_s3 + $0xa0] sm:$0xff] }
 0x10d   : > { %v1585_v15 = vmul.f32 0.35355338, %v833_v13 }
 0x127   : > { %v901_v57 = vpop.f32.mrb[2].mxu0 }
 0x128   : > { %v902_v58 = vadd.f32 %v901_v57, %v652_v51  ;;  %v903_v60 = vpop.f32.mrb[3].mxu0 }
 0x129   : > { %v972_v62 = vpop.f32.mrb[2].mxu1  ;;  %v904_v4 = vadd.f32 %v903_v60, %v656_v59 }
 0x12a   : > { %2416 = vmatpush3.xpose.msra.mxu0 %v902_v58  ;;  %v974_v3 = vpop.f32.mrb[3].mxu1  ;;  %v973_v6 = vadd.f32 %v972_v62, %v660_v61  ;;  %v1756_v61 = vld [vmem:[%s4132_s3 + $0x80] sm:$0xff]  ;;  %v1757_v62 = vld [vmem:[%s4132_s3 + $0x88] sm:$0xff] }
 0x12b   : > { %2425 = vmatprep.subr.mxu0 %v2956_v7  ;;  %v975_v14 = vadd.f32 %v974_v3, %v664_v11  ;;  %v2717_v0 = vpack.c.bf16 %v1757_v62, %v1756_v61  ;;  %v1759_v3 = vld [vmem:[%s4132_s3 + $0x98] sm:$0xff]  ;;  %v1788_v11 = vld [vmem:[%s4132_s3 + $0x180] sm:$0xff]  ;;  %v1797_v62 = vld [vmem:[%s4132_s3 + $0x1c8] sm:$0xff] }
 0x12c   : > { %v2721_v5 = vpack.c.bf16 %v1759_v3, %v1758_v2  ;;  %v1780_v3 = vld [vmem:[%s4132_s3 + $0x140] sm:$0xff] }
 0x12d   : > { %2418 = vmatmul.mubr.f32.vlgmr.msra.gmra.mrb[6].mxu0 %v1119_v63  ;;  %v1740_v63 = vld [vmem:[%s4132_s3] sm:$0xff] }
 0x12e   : > { %2426 = vmatpush3.xpose.msra.mxu0 %v904_v4  ;;  %2427 = vmatprep.mubr.msk.f32.mxu0 %vm2957_vm0, %v2956_v7  ;;  %v2719_v4 = vpack.c.bf16 %v1741_v1, %v1740_v63  ;;  %v1752_v63 = vld [vmem:[%s4132_s3 + $0x60] sm:$0xff] }
 0x12f   : > { %2435 = vmatprep.subr.mxu0 %v2956_v7 }
 0x131   : > { %2428 = vmatmul.mubr.f32.vlgmr.msra.gmra.mrb[8].mxu0 %v1275_v8  ;;  %v1743_v8 = vld [vmem:[%s4132_s3 + $0x18] sm:$0xff] }
 0x132   : > { %2436 = vmatpush3.xpose.msra.mxu0 %v973_v6  ;;  %2437 = vmatprep.mubr.msk.f32.mxu0 %vm2957_vm0, %v2956_v7  ;;  %v1742_v6 = vld [vmem:[%s4132_s3 + $0x10] sm:$0xff] }
 0x133   : > { %2445 = vmatprep.subr.mxu0 %v2956_v7  ;;  %v2723_v13 = vpack.c.bf16 %v1743_v8, %v1742_v6  ;;  %v1770_v6 = vld [vmem:[%s4132_s3 + $0xf0] sm:$0xff]  ;;  %v1771_v8 = vld [vmem:[%s4132_s3 + $0xf8] sm:$0xff] }
 0x135   : > { %2438 = vmatmul.mubr.f32.vlgmr.msra.gmra.mrb[10].mxu0 %v1430_v12  ;;  %v1789_v12 = vld [vmem:[%s4132_s3 + $0x188] sm:$0xff] }
 0x136   : > { %2446 = vmatpush3.xpose.msra.mxu0 %v975_v14  ;;  %2447 = vmatprep.mubr.msk.f32.mxu0 %vm2957_vm0, %v2956_v7  ;;  %v2749_v14 = vpack.c.bf16 %v1789_v12, %v1788_v11  ;;  %v1799_v11 = vld [vmem:[%s4132_s3 + $0x1d8] sm:$0xff]  ;;  %v1754_v12 = vld [vmem:[%s4132_s3 + $0x70] sm:$0xff] }
 0x137   : > { %2718 = vmatprep.subr.bf16.mxu0 %v2717_v0  ;;  %v1753_v0 = vld [vmem:[%s4132_s3 + $0x68] sm:$0xff] }
 0x138   : > { %v2743_v2 = vpack.c.bf16 %v1753_v0, %v1752_v63  ;;  %v1984_v63 = vld [vmem:[%s4136_s7 + $0x10] sm:$0xff]  ;;  %v2958_v0 = vmov 0.0|0.0  }
 0x139   : > { %2448 = vmatmul.mubr.f32.vlgmr.msra.gmra.mrb[12].mxu0 %v1585_v15  ;;  %v1744_v15 = vld [vmem:[%s4132_s3 + $0x20] sm:$0xff] }
 0x13a   : > { %2720 = vmatpush3.bf16.msra.mxu0 %v2719_v4  ;;  %v1781_v4 = vld [vmem:[%s4132_s3 + $0x148] sm:$0xff] }
 0x13b   : > { %2722 = vmatprep.subr.bf16.mxu0 %v2721_v5  ;;  %v2767_v5 = vpack.c.bf16 %v1781_v4, %v1780_v3 }
 0x13e   : > { %2724 = vmatpush3.bf16.msra.mxu0 %v2723_v13  ;;  %v1755_v13 = vld [vmem:[%s4132_s3 + $0x78] sm:$0xff] }
 0x147   : > { %v1043_v18 = vpop.f32.mrb[4].mxu0 }
 0x148   : > { %v1044_v19 = vadd.f32 %v1043_v18, %v668_v17  ;;  %v1045_v20 = vpop.f32.mrb[5].mxu0  ;;  %v2725_v17 = vpack.c.bf16 %v1761_v10, %v1760_v9  ;;  %v1745_v18 = vld [vmem:[%s4132_s3 + $0x28] sm:$0xff]  ;;  %v1798_v9 = vld [vmem:[%s4132_s3 + $0x1d0] sm:$0xff]  ;;  %v2745_v10 = vpack.c.bf16 %v1771_v8, %v1770_v6 }
 0x149   : > { %v1114_v33 = vpop.f32.mrb[4].mxu1  ;;  %v1046_v51 = vadd.f32 %v1045_v20, %v672_v44  ;;  %v1762_v20 = vld [vmem:[%s4132_s3 + $0xb0] sm:$0xff]  ;;  %v1748_v44 = vld [vmem:[%s4132_s3 + $0x40] sm:$0xff] }
 0x14a   : > { %2421 = vmatpush3.msra.mxu1 %v1044_v19  ;;  %v1116_v34 = vpop.f32.mrb[5].mxu1  ;;  %v1115_v54 = vadd.f32 %v1114_v33, %v676_v49  ;;  %v1773_v19 = vld [vmem:[%s4132_s3 + $0x108] sm:$0xff]  ;;  %2726 = vmatprep.subr.bf16.mxu0 %v2725_v17  ;;  %v1747_v33 = vld [vmem:[%s4132_s3 + $0x38] sm:$0xff] }
 0x14b   : > { %2430 = vmatprep.subr.mxu1 %v2956_v7  ;;  %v1117_v57 = vadd.f32 %v1116_v34, %v680_v42  ;;  %v1764_v34 = vld [vmem:[%s4132_s3 + $0xc0] sm:$0xff]  ;;  %v1783_v17 = vld [vmem:[%s4132_s3 + $0x158] sm:$0xff] }
 0x200   : > { %v1186_v21 = vpop.f32.mrb[6].mxu0 }
 0x201   : > { %v2419_v22 = vpop.f32.mrb[7].mxu0  ;;  %v1191_v23 = vsel %vm1190_vm1, %v1186_v21, -inf }
 0x202   : > { %1192 = vmax.xlane.f32.xlu0 %v1191_v23  ;;  %v1763_v22 = vld [vmem:[%s4132_s3 + $0xb8] sm:$0xff]  ;;  %v1790_v23 = vld [vmem:[%s4132_s3 + $0x190] sm:$0xff] }
 0x204   : > { %v1342_v24 = vpop.f32.mrb[8].mxu0 }
 0x205   : > { %v2429_v25 = vpop.f32.mrb[9].mxu0  ;;  %v1346_v26 = vsel %vm1190_vm1, %v1342_v24, -inf }
 0x206   : > { %1347 = vmax.xlane.f32.xlu0 %v1346_v26  ;;  %v1774_v26 = vld [vmem:[%s4132_s3 + $0x110] sm:$0xff] }
 0x208   : > { %v1497_v27 = vpop.f32.mrb[10].mxu0 }
 0x209   : > { %v2439_v28 = vpop.f32.mrb[11].mxu0  ;;  %v1501_v29 = vsel %vm1190_vm1, %v1497_v27, -inf }
 0x20a   : > { %1502 = vmax.xlane.f32.xlu1 %v1501_v29  ;;  %v2727_v28 = vpack.c.bf16 %v1745_v18, %v1744_v15  ;;  %v1746_v29 = vld [vmem:[%s4132_s3 + $0x30] sm:$0xff]  ;;  %v2747_v15 = vpack.c.bf16 %v1755_v13, %v1754_v12  ;;  %v1989_v13 = vld [vmem:[%s4136_s7 + $0x38] sm:$0xff] }
 0x20b   : > { %v1988_v12 = vld [vmem:[%s4136_s7 + $0x30] sm:$0xff] }
 0x20c   : > { %v1652_v30 = vpop.f32.mrb[12].mxu0  ;;  %2728 = vmatpush3.bf16.msra.mxu0 %v2727_v28  ;;  %v1786_v28 = vld [vmem:[%s4132_s3 + $0x170] sm:$0xff] }
 0x20d   : > { %v2449_v31 = vpop.f32.mrb[13].mxu0  ;;  %v1656_v32 = vsel %vm1190_vm1, %v1652_v30, -inf }
 0x20e   : > { %1657 = vmax.xlane.f32.xlu1 %v1656_v32  ;;  %v1792_v31 = vld [vmem:[%s4132_s3 + $0x1a0] sm:$0xff]  ;;  %v2729_v32 = vpack.c.bf16 %v1763_v22, %v1762_v20  ;;  %v1801_v20 = vld [vmem:[%s4132_s3 + $0x1e8] sm:$0xff] }
 0x20f   : > { %v1784_v22 = vld [vmem:[%s4132_s3 + $0x160] sm:$0xff] }
 0x210   : > { %2730 = vmatprep.subr.bf16.mxu0 %v2729_v32 }
 0x28f   : > { %v1193_v35 = vpop.xlane.xlu0 %1192 }
 0x290   : > { %v1194_v36 = vsub.f32 %v1186_v21, %v1193_v35  ;;  %v2751_v21 = vpack.c.bf16 %v1773_v19, %v1772_v16  ;;  %v1793_v35 = vld [vmem:[%s4132_s3 + $0x1a8] sm:$0xff]  ;;  %v1782_v16 = vld [vmem:[%s4132_s3 + $0x150] sm:$0xff]  ;;  %v1800_v19 = vld [vmem:[%s4132_s3 + $0x1e0] sm:$0xff] }
 0x291   : > { %v2771_v18 = vpack.c.bf16 %v1783_v17, %v1782_v16  ;;  %v1991_v16 = vld [vmem:[%s4136_s7 + $0x48] sm:$0xff]  ;;  %v1992_v17 = vld [vmem:[%s4136_s7 + $0x50] sm:$0xff] }
 0x292   : > { %v1195_v37 = vmul.f32 1.442695, %v1194_v36  ;;  %v1765_v36 = vld [vmem:[%s4132_s3 + $0xc8] sm:$0xff] }
 0x293   : > { %v1348_v38 = vpop.xlane.xlu0 %1347 }
 0x294   : > { %2871 = vpow2.f32 %v1195_v37  ;;  %v1349_v39 = vsub.f32 %v1342_v24, %v1348_v38  ;;  %v1791_v24 = vld [vmem:[%s4132_s3 + $0x198] sm:$0xff]  ;;  %v2757_v37 = vpack.c.bf16 %v1793_v35, %v1792_v31  ;;  %v1776_v38 = vld [vmem:[%s4132_s3 + $0x120] sm:$0xff] }
 0x295   : > { %v2753_v25 = vpack.c.bf16 %v1791_v24, %v1790_v23  ;;  %v1785_v23 = vld [vmem:[%s4132_s3 + $0x168] sm:$0xff] }
 0x296   : > { %v1350_v40 = vmul.f32 1.442695, %v1349_v39  ;;  %v1777_v39 = vld [vmem:[%s4132_s3 + $0x128] sm:$0xff]  ;;  %v2775_v24 = vpack.c.bf16 %v1785_v23, %v1784_v22 }
 0x297   : > { %v1503_v41 = vpop.xlane.xlu1 %1502  ;;  %v1995_v22 = vld [vmem:[%s4136_s7 + $0x68] sm:$0xff] }
 0x298   : > { %2873 = vpow2.f32 %v1350_v40  ;;  %v1504_v43 = vsub.f32 %v1497_v27, %v1503_v41  ;;  %v1775_v27 = vld [vmem:[%s4132_s3 + $0x118] sm:$0xff]  ;;  %v1794_v40 = vld [vmem:[%s4132_s3 + $0x1b0] sm:$0xff] }
 0x299   : > { %v1795_v41 = vld [vmem:[%s4132_s3 + $0x1b8] sm:$0xff] }
 0x29a   : > { %v1505_v45 = vmul.f32 1.442695, %v1504_v43  ;;  %v2731_v43 = vpack.c.bf16 %v1747_v33, %v1746_v29  ;;  %v2761_v49 = vpack.c.bf16 %v1795_v41, %v1794_v40  ;;  %v1787_v29 = vld [vmem:[%s4132_s3 + $0x178] sm:$0xff] }
 0x29b   : > { %v1658_v47 = vpop.xlane.xlu1 %1657 }
 0x29c   : > { %2875 = vpow2.f32 %v1505_v45  ;;  %v1659_v48 = vsub.f32 %v1652_v30, %v1658_v47  ;;  %v2755_v30 = vpack.c.bf16 %v1775_v27, %v1774_v26  ;;  %v2759_v45 = vpack.c.bf16 %v1777_v39, %v1776_v38  ;;  %2732 = vmatpush3.bf16.msra.mxu0 %v2731_v43  ;;  %v1803_v26 = vld [vmem:[%s4132_s3 + $0x1f8] sm:$0xff] }
 0x29d   : > { %v2733_v47 = vpack.c.bf16 %v1765_v36, %v1764_v34 }
 0x29e   : > { %v2872_v50 = vpop.eup %2871  ;;  %v1660_v52 = vmul.f32 1.442695, %v1659_v48  ;;  %v1749_v48 = vld [vmem:[%s4132_s3 + $0x48] sm:$0xff] }
 0x29f   : > { %2423 = vmatmul.mubr.msk.f32.vlgmr.msra.gmra.mrb[6].mxu1 %vm1190_vm1, %v2872_v50  ;;  %v1197_v53 = vsel %vm1190_vm1, %v2872_v50, 0.0  ;;  %v1778_v50 = vld [vmem:[%s4132_s3 + $0x130] sm:$0xff]  ;;  %2734 = vmatprep.subr.bf16.mxu0 %v2733_v47 }
 0x2a0   : > { %2877 = vpow2.f32 %v1660_v52  ;;  %2431 = vmatpush3.msra.mxu1 %v1046_v51  ;;  %1198 = vadd.xlane.f32.xlu1 %v1197_v53  ;;  %v1779_v51 = vld [vmem:[%s4132_s3 + $0x138] sm:$0xff]  ;;  %v1766_v52 = vld [vmem:[%s4132_s3 + $0xd0] sm:$0xff] }
 0x2a1   : > { %2432 = vmatprep.mubr.msk.f32.mxu1 %vm2957_vm0, %v2956_v7  ;;  %2440 = vmatprep.subr.mxu1 %v2956_v7  ;;  %v1767_v53 = vld [vmem:[%s4132_s3 + $0xd8] sm:$0xff]  ;;  %v2763_v42 = vpack.c.bf16 %v1779_v51, %v1778_v50 }
 0x2a2   : > { %v2874_v55 = vpop.eup %2873 }
 0x2a3   : > { %2433 = vmatmul.mubr.msk.f32.vlgmr.msra.gmra.mrb[8].mxu1 %vm1190_vm1, %v2874_v55  ;;  %v1352_v56 = vsel %vm1190_vm1, %v2874_v55, 0.0  ;;  %v2737_v55 = vpack.c.bf16 %v1767_v53, %v1766_v52 }
 0x2a4   : > { %2441 = vmatpush3.msra.mxu1 %v1115_v54  ;;  %1353 = vadd.xlane.f32.xlu0 %v1352_v56  ;;  %v2735_v54 = vpack.c.bf16 %v1749_v48, %v1748_v44  ;;  %v1750_v56 = vld [vmem:[%s4132_s3 + $0x50] sm:$0xff] }
 0x2a5   : > { %2442 = vmatprep.mubr.msk.f32.mxu1 %vm2957_vm0, %v2956_v7  ;;  %2450 = vmatprep.subr.mxu1 %v2956_v7 }
 0x2a6   : > { %v2876_v46 = vpop.eup %2875  ;;  %2736 = vmatpush3.bf16.msra.mxu0 %v2735_v54 }
 0x2a7   : > { %2443 = vmatmul.mubr.msk.f32.vlgmr.msra.gmra.mrb[10].mxu1 %vm1190_vm1, %v2876_v46  ;;  %v1507_v58 = vsel %vm1190_vm1, %v2876_v46, 0.0  ;;  %2738 = vmatprep.subr.bf16.mxu0 %v2737_v55  ;;  %v2284_v55 = vld [vmem:[%s4133_s4] ss:$0 sm:$0xff] }
 0x2a8   : > { %2451 = vmatpush3.msra.mxu1 %v1117_v57  ;;  %1508 = vadd.xlane.f32.xlu1 %v1507_v58  ;;  %v1751_v57 = vld [vmem:[%s4132_s3 + $0x58] sm:$0xff]  ;;  %v1768_v58 = vld [vmem:[%s4132_s3 + $0xe0] sm:$0xff] }
 0x2a9   : > { %2452 = vmatprep.mubr.msk.f32.mxu1 %vm2957_vm0, %v2956_v7  ;;  %2750 = vmatprep.subr.bf16.mxu1 %v2749_v14  ;;  %v2739_v46 = vpack.c.bf16 %v1751_v57, %v1750_v56  ;;  %v2769_v14 = vpack.c.bf16 %v1799_v11, %v1798_v9  ;;  %v1986_v9 = vld [vmem:[%s4136_s7 + $0x20] sm:$0xff] }
 0x2aa   : > { %v2878_v59 = vpop.eup %2877 }
 0x2ab   : > { %2453 = vmatmul.mubr.msk.f32.vlgmr.msra.gmra.mrb[12].mxu1 %vm1190_vm1, %v2878_v59  ;;  %v1662_v60 = vsel %vm1190_vm1, %v2878_v59, 0.0  ;;  %2740 = vmatpush3.bf16.msra.mxu0 %v2739_v46  ;;  %v1769_v59 = vld [vmem:[%s4132_s3 + $0xe8] sm:$0xff] }
 0x2ac   : > { %1663 = vadd.xlane.f32.xlu0 %v1662_v60  ;;  %2752 = vmatpush3.bf16.msra.mxu1 %v2751_v21  ;;  %v1796_v60 = vld [vmem:[%s4132_s3 + $0x1c0] sm:$0xff]  ;;  %v2741_v61 = vpack.c.bf16 %v1769_v59, %v1768_v58  ;;  %v2773_v21 = vpack.c.bf16 %v1801_v20, %v1800_v19  ;;  %v1993_v19 = vld [vmem:[%s4136_s7 + $0x58] sm:$0xff] }
 0x2ad   : > { %2754 = vmatprep.subr.bf16.mxu1 %v2753_v25  ;;  %v2765_v1 = vpack.c.bf16 %v1797_v62, %v1796_v60  ;;  %v1802_v25 = vld [vmem:[%s4132_s3 + $0x1f0] sm:$0xff]  ;;  %v2891_v60 = vld [vmem:[%s3279_s16] sm:$0xff]  ;;  %v2797_v20 = vpack.c.bf16 %v1993_v19, %v1992_v17  ;;  %s431_s16 = scalar_lea.vmem [#allocation2], %s2278_s14  ;;  %s2896_s14 = sshll.u32 %s2959_s29, 4  ;;  %s2897_s14 = int_to_ptr.vmem [resolvable:$false] %s2896_s14 }
 0x2ae   : > { %2742 = vmatprep.subr.bf16.mxu0 %v2741_v61  ;;  %v2777_v27 = vpack.c.bf16 %v1803_v26, %v1802_v25  ;;  %v1982_v62 = vld [vmem:[%s4136_s7] sm:$0xff]  ;;  %v1997_v25 = vld [vmem:[%s4136_s7 + $0x78] sm:$0xff]  ;;  %s2215_s22 = sshll.u32 %s431_s16, 4  ;;  %s2898_s15 = scalar_lea.vmem %s2897_s14, 256  ;;  %s4089_s22 = int_to_ptr.vmem [resolvable:$true] %s2215_s22 }
 0x2af   : > { %2744 = vmatpush3.bf16.msra.mxu0 %v2743_v2  ;;  %v1985_v2 = vld [vmem:[%s4136_s7 + $0x18] sm:$0xff]  ;;  %s2892_s21 = scalar_lea.vmem %s4089_s22, 128  ;;  %p2899_p0 = scmp.lt.s32.totalorder %s4089_s22, %s2897_s14 }
 0x2b0   : > { %2756 = vmatpush3.bf16.msra.mxu1 %v2755_v30  ;;  %2746 = vmatprep.subr.bf16.mxu0 %v2745_v10  ;;  %v2779_v30 = vpack.c.bf16 %v1787_v29, %v1786_v28  ;;  %v2785_v3 = vpack.c.bf16 %v1985_v2, %v1984_v63  ;;  %v1987_v10 = vld [vmem:[%s4136_s7 + $0x28] sm:$0xff]  ;;  %v2078_v29 = vld [vmem:[%s4138_s9 + $0x10] sm:$0xff]  ;;  %p2893_p11 = scmp.ne.s32.totalorder %s4089_s22, %s2892_s21  ;;  %p2900_p1 = scmp.lt.s32.totalorder %s2898_s15, %s2892_s21 }
 0x2b1   : > { %2758 = vmatprep.subr.bf16.mxu1 %v2757_v37  ;;  %v2788_v11 = vpack.c.bf16 %v1987_v10, %v1986_v9  ;;  %v2077_v28 = vld [vmem:[%s4138_s9 + $0x8] sm:$0xff] }
 0x2b2   : > { %p2894_p12 = pnand %p2893_p11, %p3068_p5  ;;  %p2901_p2 = por %p2900_p1, %p2899_p0 }
 0x2b3   : > { %2748 = vmatpush3.bf16.msra.mxu0 %v2747_v15  ;;  %v1990_v15 = vld [vmem:[%s4136_s7 + $0x40] sm:$0xff] }
 0x2b4   : > { %2760 = vmatpush3.bf16.msra.mxu1 %v2759_v45  ;;  %2781 = vmatprep.subr.bf16.mxu0 %v2958_v0  ;;  %p2895_p13 = pneg %p2894_p12 }
 0x2b5   : > { %2762 = vmatprep.subr.bf16.mxu1 %v2761_v49 }
 0x2b6   : > { %p2902_p3 = pnand %p2901_p2, %p2895_p13 }
 0x2b8   : > { %2764 = vmatpush3.bf16.msra.mxu1 %v2763_v42 }
 0x2b9   : > { %2766 = vmatprep.subr.bf16.mxu1 %v2765_v1 }
 0x2bc   : > { %2768 = vmatpush3.bf16.msra.mxu1 %v2767_v5 }
 0x2bd   : > { %2770 = vmatprep.subr.bf16.mxu1 %v2769_v14  ;;  %v2791_v14 = vpack.c.bf16 %v1989_v13, %v1988_v12 }
 0x2c0   : > { %2772 = vmatpush3.bf16.msra.mxu1 %v2771_v18  ;;  %v2794_v18 = vpack.c.bf16 %v1991_v16, %v1990_v15 }
 0x2c1   : > { %2774 = vmatprep.subr.bf16.mxu1 %v2773_v21  ;;  %v1994_v21 = vld [vmem:[%s4136_s7 + $0x60] sm:$0xff] }
 0x2c2   : > { %v2800_v23 = vpack.c.bf16 %v1995_v22, %v1994_v21  ;;  %v2290_v22 = vld [vmem:[%s4141_s12] ss:$0 sm:$0xff] }
 0x2c4   : > { %2776 = vmatpush3.bf16.msra.mxu1 %v2775_v24  ;;  %v1996_v24 = vld [vmem:[%s4136_s7 + $0x70] sm:$0xff] }
 0x2c5   : > { %2778 = vmatprep.subr.bf16.mxu1 %v2777_v27  ;;  %v2803_v26 = vpack.c.bf16 %v1997_v25, %v1996_v24  ;;  %v2076_v27 = vld [vmem:[%s4138_s9] sm:$0xff] }
 0x2c8   : > { %2780 = vmatpush3.bf16.msra.mxu1 %v2779_v30  ;;  %v2806_v30 = vpack.c.bf16 %v2077_v28, %v2076_v27 }
 0x2c9   : > { %2805 = vmatprep.subr.bf16.mxu1 %v2958_v0 }
 0x32d   : > { %v1199_v32 = vpop.xlane.xlu1 %1198 }
 0x331   : > { %v1354_v31 = vpop.xlane.xlu0 %1353 }
 0x332   : > { %2879 = vrcp.f32 %v1354_v31  ;;  %v2079_v31 = vld [vmem:[%s4138_s9 + $0x18] sm:$0xff] }
 0x333   : > { %2881 = vrcp.f32 %v1199_v32  ;;  %v2809_v32 = vpack.c.bf16 %v2079_v31, %v2078_v29 }
 0x335   : > { %v1509_v34 = vpop.xlane.xlu1 %1508 }
 0x339   : > { %v1664_v33 = vpop.xlane.xlu0 %1663 }
 0x33a   : > { %2883 = vrcp.f32 %v1664_v33  ;;  %v2080_v33 = vld [vmem:[%s4138_s9 + $0x20] sm:$0xff] }
 0x33b   : > { %2885 = vrcp.f32 %v1509_v34  ;;  %v2081_v34 = vld [vmem:[%s4138_s9 + $0x28] sm:$0xff] }
 0x33c   : > { %v2880_v37 = vpop.eup %2879 }
 0x33d   : > { %v2882_v39 = vpop.eup %2881 }
 0x344   : > { %v2884_v47 = vpop.eup %2883 }
 0x345   : > { %v2886_v49 = vpop.eup %2885 }
 0x372   : > { %v1269_v35 = vpop.f32.mrb[6].mxu1 }
 0x373   : > { %v2424_v36 = vpop.f32.mrb[7].mxu1  ;;  %v1274_v43 = vmul.f32 %v2882_v39, %v1269_v35  ;;  %v2812_v35 = vpack.c.bf16 %v2081_v34, %v2080_v33  ;;  %v2084_v39 = vld [vmem:[%s4138_s9 + $0x40] sm:$0xff] }
 0x374   : > { %v2082_v36 = vld [vmem:[%s4138_s9 + $0x30] sm:$0xff] }
 0x376   : > { %v1424_v38 = vpop.f32.mrb[8].mxu1 }
 0x377   : > { %v1429_v40 = vmul.f32 %v2880_v37, %v1424_v38  ;;  %v2434_v41 = vpop.f32.mrb[9].mxu1  ;;  %v2083_v37 = vld [vmem:[%s4138_s9 + $0x38] sm:$0xff] }
 0x378   : > { %v2815_v38 = vpack.c.bf16 %v2083_v37, %v2082_v36 }
 0x379   : > { %1875 = vmatprep.mubr.f32.mxu0 %v1429_v40  ;;  %v2085_v40 = vld [vmem:[%s4138_s9 + $0x48] sm:$0xff] }
 0x37a   : > { %v1579_v44 = vpop.f32.mrb[10].mxu1  ;;  %1876 = vmatmul.mubr.f32.vlgmr.msra.gmra.mrb[14].mxu0 %v1274_v43  ;;  %v2818_v41 = vpack.c.bf16 %v2085_v40, %v2084_v39  ;;  %v2086_v43 = vld [vmem:[%s4138_s9 + $0x50] sm:$0xff] }
 0x37b   : > { %v2444_v45 = vpop.f32.mrb[11].mxu1  ;;  %2487 = vmatprep.mubr.msk.f32.mxu0 %vm2957_vm0, %v2956_v7  ;;  %v1584_v52 = vmul.f32 %v2886_v49, %v1579_v44  ;;  %v2087_v44 = vld [vmem:[%s4138_s9 + $0x58] sm:$0xff] }
 0x37c   : > { %v2821_v45 = vpack.c.bf16 %v2087_v44, %v2086_v43 }
 0x37e   : > { %v1734_v48 = vpop.f32.mrb[12].mxu1 }
 0x37f   : > { %v1739_v50 = vmul.f32 %v2884_v47, %v1734_v48  ;;  %v2454_v51 = vpop.f32.mrb[13].mxu1  ;;  %v2088_v47 = vld [vmem:[%s4138_s9 + $0x60] sm:$0xff]  ;;  %v2089_v48 = vld [vmem:[%s4138_s9 + $0x68] sm:$0xff] }
 0x380   : > { %v2824_v49 = vpack.c.bf16 %v2089_v48, %v2088_v47 }
 0x381   : > { %1945 = vmatprep.mubr.f32.mxu1 %v1739_v50 }
 0x382   : > { %1946 = vmatmul.mubr.f32.vlgmr.msra.gmra.mrb[14].mxu1 %v1584_v52 }
 0x383   : > { %2522 = vmatprep.mubr.msk.f32.mxu1 %vm2957_vm0, %v2956_v7  ;;  %v1983_v7 = vld [vmem:[%s4136_s7 + $0x8] sm:$0xff]  ;;  %2807 = vmatpush3.bf16.msra.mxu1 %v2806_v30 }
 0x384   : > { %v2782_v1 = vpack.c.bf16 %v1983_v7, %v1982_v62  ;;  %2808 = vmatprep.subr.bf16.mxu1 %v2958_v0  ;;  %v2287_v7 = vld [vmem:[%s4137_s8] ss:$0 sm:$0xff] }
 0x386   : > { %2783 = vmatpush3.bf16.msra.mxu0 %v2782_v1 }
 0x387   : > { %2784 = vmatprep.subr.bf16.mxu0 %v2958_v0  ;;  %2810 = vmatpush3.bf16.msra.mxu1 %v2809_v32 }
 0x388   : > { %2811 = vmatprep.subr.bf16.mxu1 %v2958_v0 }
 0x38a   : > { %2786 = vmatpush3.bf16.msra.mxu0 %v2785_v3  ;;  %v2288_v3 = vld [vmem:[%s4139_s10] ss:$0 sm:$0xff] }
 0x38b   : > { %2787 = vmatprep.subr.bf16.mxu0 %v2958_v0  ;;  %2813 = vmatpush3.bf16.msra.mxu1 %v2812_v35 }
 0x38c   : > { %2814 = vmatprep.subr.bf16.mxu1 %v2958_v0 }
 0x38e   : > { %2789 = vmatpush3.bf16.msra.mxu0 %v2788_v11 }
 0x38f   : > { %2790 = vmatprep.subr.bf16.mxu0 %v2958_v0  ;;  %2816 = vmatpush3.bf16.msra.mxu1 %v2815_v38 }
 0x390   : > { %2817 = vmatprep.subr.bf16.mxu1 %v2958_v0 }
 0x392   : > { %2792 = vmatpush3.bf16.msra.mxu0 %v2791_v14 }
 0x393   : > { %2793 = vmatprep.subr.bf16.mxu0 %v2958_v0  ;;  %2819 = vmatpush3.bf16.msra.mxu1 %v2818_v41 }
 0x394   : > { %2820 = vmatprep.subr.bf16.mxu1 %v2958_v0 }
 0x396   : > { %2795 = vmatpush3.bf16.msra.mxu0 %v2794_v18 }
 0x397   : > { %2796 = vmatprep.subr.bf16.mxu0 %v2958_v0  ;;  %2822 = vmatpush3.bf16.msra.mxu1 %v2821_v45 }
 0x398   : > { %2823 = vmatprep.subr.bf16.mxu1 %v2958_v0 }
 0x39a   : > { %2798 = vmatpush3.bf16.msra.mxu0 %v2797_v20  ;;  %v2289_v20 = vld [vmem:[%s4140_s11] ss:$0 sm:$0xff] }
 0x39b   : > { %2799 = vmatprep.subr.bf16.mxu0 %v2958_v0  ;;  %2825 = vmatpush3.bf16.msra.mxu1 %v2824_v49 }
 0x39c   : > { %2826 = vmatprep.subr.bf16.mxu1 %v2958_v0 }
 0x39e   : > { %2801 = vmatpush3.bf16.msra.mxu0 %v2800_v23 }
 0x39f   : > { %2802 = vmatprep.subr.bf16.mxu0 %v2958_v0 }
 0x3a2   : > { %2804 = vmatpush3.bf16.msra.mxu0 %v2803_v26 }
 0x44d   : > { %v2343_v53 = vpop.f32.mrb[14].mxu0 }
 0x44e   : > { %v2344_v54 = vpop.f32.mrb[15].mxu0 }
 0x44f   : > { %v2345_v42 = vadd.f32 %v2344_v54, %v2343_v53 }
 0x451   : > { %v1878_v46 = vadd.f32 %v2345_v42, %v2284_v55 }
 0x455   : > { %v2378_v56 = vpop.f32.mrb[14].mxu1 }
 0x456   : > { %v2379_v57 = vpop.f32.mrb[15].mxu1 }
 0x457   : > { %v2380_v58 = vadd.f32 %v2379_v57, %v2378_v56  ;;  %v2285_v56 = vld [vmem:[%s4134_s5] ss:$0 sm:$0xff] }
 0x459   : > { %v1948_v59 = vadd.f32 %v2380_v58, %v1878_v46  ;;  %v2286_v46 = vld [vmem:[%s4135_s6] ss:$0 sm:$0xff] }
 0x45b   : > { %v1951_v61 = vadd.f32 %v2891_v60, %v1948_v59  ;;  %v2090_v60 = vld [vmem:[%s4138_s9 + $0x70] sm:$0xff] }
 0x45d   : > { %1954 = vadd.xlane.f32.xlu0 %v1951_v61 }
 0x4ea   : > { %v1955_v4 = vpop.xlane.xlu0 %1954 }
 0x4eb   : > { %v3958_v5 = vmul.f32 0.03125, %v1955_v4 }
 0x4ed   : > { %v3961_v6 = vsub.f32 %v1951_v61, %v3958_v5  ;;  %v1961_v50 = vmul.f32 96.0, %v3958_v5  ;;  %v2091_v61 = vld [vmem:[%s4138_s9 + $0x78] sm:$0xff] }
 0x4ee   : > { %v2827_v62 = vpack.c.bf16 %v2091_v61, %v2090_v60 }
 0x4ef   : > { %v1958_v8 = vmul.f32 %v3961_v6, %v3961_v6  ;;  %v1962_v51 = vmul.f32 %v1961_v50, %v3958_v5 }
 0x4f0   : > { %2828 = vmatpush3.bf16.msra.mxu1 %v2827_v62 }
 0x4f1   : > { %1959 = vadd.xlane.f32.xlu1 %v1958_v8 }
 0x57e   : > { %v1960_v52 = vpop.xlane.xlu1 %1959 }
 0x57f   : > { %v1963_v53 = vsub.f32 %v1960_v52, %v1962_v51 }
 0x581   : > { %v1964_v54 = vmul.f32 0.03125, %v1963_v53 }
 0x583   : > { %v1965_v42 = vadd.f32 1e-05, %v1964_v54 }
 0x585   : > { %2887 = vrsqrt.f32 %v1965_v42 }
 0x58f   : > { %v2888_v55 = vpop.eup %2887 }
 0x590   : > { %v1967_v57 = vmul.f32 %v2888_v55, %v3961_v6 }
 0x592   : > { %v1974_v58 = vmul.f32 %v2285_v56, %v1967_v57 }
 0x594   : > { %v1981_v59 = vadd.f32 %v2286_v46, %v1974_v58 }
 0x596   : > { %2488 = vmatmul.mubr.f32.vlgmr.msra.gmra.mrb[16].mxu0 %v1981_v59 }
 0x669   : > { %v2071_v63 = vpop.f32.mrb[16].mxu0 }
 0x66a   : > { %v2072_v0 = vadd.f32 %v2287_v7, %v2071_v63  ;;  %v2489_v1 = vpop.f32.mrb[17].mxu0 }
 0x66c   : > { %v2075_v2 = vmax.f32 %v2072_v0, 0.0 }
 0x66e   : > { %2523 = vmatmul.mubr.f32.vlgmr.msra.gmra.mrb[16].mxu1 %v2075_v2 }
 0x741   : > { %v2165_v4 = vpop.f32.mrb[16].mxu1 }
 0x742   : > { %v2166_v5 = vadd.f32 %v2288_v3, %v2165_v4  ;;  %v2524_v6 = vpop.f32.mrb[17].mxu1 }
 0x744   : > { %v2169_v8 = vadd.f32 %v2166_v5, %v1981_v59 }
 0x746   : > { %2172 = vadd.xlane.f32.xlu0 %v2169_v8 }
 0x7d3   : > { %v2173_v9 = vpop.xlane.xlu0 %2172 }
 0x7d4   : > { %v2174_v10 = vmul.f32 0.03125, %v2173_v9 }
 0x7d6   : > { %v2175_v11 = vsub.f32 %v2169_v8, %v2174_v10  ;;  %v2179_v13 = vmul.f32 96.0, %v2174_v10 }
 0x7d8   : > { %v2176_v12 = vmul.f32 %v2175_v11, %v2175_v11  ;;  %v2180_v14 = vmul.f32 %v2179_v13, %v2174_v10 }
 0x7da   : > { %2177 = vadd.xlane.f32.xlu1 %v2176_v12 }
 0x867   : > { %v2178_v15 = vpop.xlane.xlu1 %2177 }
 0x868   : > { %v2181_v16 = vsub.f32 %v2178_v15, %v2180_v14 }
 0x86a   : > { %v2182_v17 = vmul.f32 0.03125, %v2181_v16 }
 0x86c   : > { %v2183_v18 = vadd.f32 1e-05, %v2182_v17 }
 0x86e   : > { %2889 = vrsqrt.f32 %v2183_v18 }
 0x878   : > { %v2890_v19 = vpop.eup %2889 }
 0x879   : > { %v2185_v21 = vmul.f32 %v2890_v19, %v2175_v11 }
 0x87b   : > { %v2192_v23 = vmul.f32 %v2289_v20, %v2185_v21 }
 0x87d   : > { %v2199_v24 = vadd.f32 %v2290_v22, %v2192_v23 }
 0x87f   : > { %2200 = vst [vmem:[%s431_s16] sm:$0xff] %v2199_v24 }
 0x880   : > { %2905 = shalt.err (!%p2902_p3)
}
 0x881   : > { %s2906_s17 = scalar_lea.hbm %s4087_s27, 128  ;;  %s2910_s16 = scalar_lea.hbm %s4142_s13, 256 }
 0x882   : > { %p2907_p4 = scmp.ne.s32.totalorder %s4087_s27, %s2906_s17  ;;  %p2911_p9 = scmp.lt.u32.totalorder %s4087_s27, %s4142_s13 }
 0x883   : > { %p2912_p10 = scmp.lt.u32.totalorder %s2910_s16, %s2906_s17  ;;  %p2914_p12 = scmp.lt.u32.totalorder %s2906_s17, %s4087_s27 }
 0x884   : > { %p2908_p7 = pnand %p2907_p4, %p3068_p5 }
 0x885   : > { %p2913_p11 = por %p2912_p10, %p2911_p9 }
 0x886   : > { %p2909_p8 = pneg %p2908_p7 }
 0x887   : > { %p2915_p13 = por %p2914_p12, %p2913_p11 }
 0x889   : > { %p2916_p0 = pnand %p2915_p13, %p2909_p8 }
 0x88b   : > { %2919 = shalt.err (!%p2916_p0)
}
 0x88c   : > { %2829 = dma.vmem_to_hbm [thread:$0]  (%p3068_p5), %s4089_s22, 128, %s4087_s27, %s2202_s30  }
 0x88d PF: > { %p2835_p1 = scmp.ge.s32.totalorder %s2954_s28, 2  ;;  %s2227_s29 = sand.u32 1, %s2942_s25  }
 0x88e   : > { %s2228_s14 = scalar_lea.sflag [#allocation3], %s2227_s29 }
 0x88f   : > { %p2832_p2 = pnand %p2835_p1, %p3072_p6 }
 0x891   : > { %2937 = dma.done.wait (!%p2832_p2), %s2228_s14, 128  }
 0x892   : > { %2939 = vsyncadd (!%p2832_p2), %s2228_s14, 4294967168  ;;  %s4154_s28 = sld [smem:[#allocation6_spill]]  ;;  %s4155_s15 = sld [smem:[#allocation5_spill]] }
 0x893   : > { %s4156_s27 = sld [smem:[#allocation7_spill]]  ;;  %s4157_s25 = smov %s2946_s26 }
 0x898   : > { %p23_p3 = scmp.ge.s32.totalorder %s4154_s28, 4   ;;  %s4158_s26 = smov %s4155_s15 }
 0x89a   :  { %25 = sbr.rel (!%p23_p3) target bundleno = 3 (0x3), region = 107 }
 0x8a1   :  { %2233 = vsyncpa [#allocation3], 1 }
 0x8a2   :  { %2235 = vsyncpa [#allocation3 + $0x1], 1 }

</bundles_post_ra>
